<compile_context>
chip_gen: v7x
topology: tpu7x:2x2x1
jax: 0.10.0
libtpu: 0.0.40
codegen_flags: <defaults>
</compile_context>

<pallas_src>
import math
from functools import partial

import jax
import jax.numpy as jnp
from jax.experimental import pallas as pl
from jax.experimental.pallas import tpu as pltpu

# ---------------- model hyper-parameters (small, deterministic) ----------------
VOCAB = 24
D_MODEL = 32
N_HEADS = 2
D_HEAD = D_MODEL // N_HEADS
D_FF = 64
N_MELS = 4
PRENET_H = 32
POST_CH = 16
KERNEL_SIZE = 5
SPK_DIM = 16
MAX_LEN = 32
NEG_INF = -1e9


# ========================= in-kernel building blocks =========================

def _layer_norm(x, g, b, eps=1e-5):
    mu = jnp.mean(x, axis=-1, keepdims=True)
    var = jnp.mean((x - mu) ** 2, axis=-1, keepdims=True)
    return (x - mu) * jax.lax.rsqrt(var + eps) * g + b


def _mha(q3, k3, v3, wo, bo, key_valid, *, causal):
    """Multi-head attention, batched over B, with the output projection folded per head.

    q3: [B, Tq, D], k3/v3: [B, Tk, D], wo: [D, D], bo: [1, D], key_valid: [B, Tk] bool.
    Returns (out [B*Tq, D], probs list of length N_HEADS, each [B, Tq, Tk]).
    """
    B, Tq, _ = q3.shape
    Tk = k3.shape[1]
    scale = 1.0 / math.sqrt(D_HEAD)

    # combined key-padding (+ causal) mask, built once (hoisted out of the head loop)
    valid = jnp.broadcast_to(key_valid[:, None, :], (B, Tq, Tk))
    if causal:
        row = jax.lax.broadcasted_iota(jnp.int32, (Tq, Tk), 0)
        col = jax.lax.broadcasted_iota(jnp.int32, (Tq, Tk), 1)
        valid = jnp.logical_and(valid, (row >= col)[None, :, :])

    acc = jnp.zeros((B * Tq, D_MODEL), jnp.float32)
    probs = []
    for h in range(N_HEADS):
        lo, hi = h * D_HEAD, (h + 1) * D_HEAD
        s = jnp.einsum('bqd,bkd->bqk', q3[:, :, lo:hi], k3[:, :, lo:hi],
                       preferred_element_type=jnp.float32) * scale
        s = jnp.where(valid, s, NEG_INF)
        m = jnp.max(s, axis=-1, keepdims=True)
        e = jnp.exp(s - m)
        l = jnp.sum(e, axis=-1, keepdims=True)
        p = e * pl.reciprocal(l, approx=True)          # EUP reciprocal (frees VALU)
        ctx = jnp.einsum('bqk,bkd->bqd', p, v3[:, :, lo:hi],
                         preferred_element_type=jnp.float32)
        # fold the per-head slice of the output projection (== concat(heads) @ wo)
        acc = acc + jnp.dot(ctx.reshape(B * Tq, D_HEAD), wo[lo:hi, :],
                            preferred_element_type=jnp.float32)
        probs.append(p)
    return acc + bo, probs


# ================================ fused kernel =================================

def _tts_kernel(
        # activations / indices
        pos_text_ref, pos_mel_ref, emb_ref, pe_text_ref, mel_ref, pe_mel_ref, spk_ref, alphas_ref,
        # encoder params
        spk_w_ref, spk_b_ref,
        enc_wqkv_ref, enc_bqkv_ref, enc_wo_ref, enc_bo_ref, enc_ln1_g_ref, enc_ln1_b_ref,
        enc_ffn_w1_ref, enc_ffn_b1_ref, enc_ffn_w2_ref, enc_ffn_b2_ref, enc_ln2_g_ref, enc_ln2_b_ref,
        # decoder params
        pre_w1_ref, pre_b1_ref, pre_w2_ref, pre_b2_ref,
        sa_wqkv_ref, sa_bqkv_ref, sa_wo_ref, sa_bo_ref, dec_ln1_g_ref, dec_ln1_b_ref,
        ca_wq_ref, ca_bq_ref, ca_wkv_ref, ca_bkv_ref, ca_wo_ref, ca_bo_ref,
        dec_ln2_g_ref, dec_ln2_b_ref,
        dec_ffn_w1_ref, dec_ffn_b1_ref, dec_ffn_w2_ref, dec_ffn_b2_ref, dec_ln3_g_ref, dec_ln3_b_ref,
        wms_ref, bms_ref, post_w1_ref, post_b1_ref, post_w2_ref, post_b2_ref,
        # outputs
        mel_out_ref, out_ref, gate_ref, attn_enc_ref, attn_dec_ref, attn_cd_ref,
        *, B, Tt, Tm):
    alpha_enc = alphas_ref[0]
    alpha_dec = alphas_ref[1]
    text_valid = pos_text_ref[...] != 0                 # [B, Tt] bool (padding mask)
    mel_valid = pos_mel_ref[...] != 0                   # [B, Tm]

    # ------------------------------- encoder -------------------------------
    # speaker conditioning (broadcast over time via a leading-dim broadcast)
    spk = jnp.dot(spk_ref[...], spk_w_ref[...],
                  preferred_element_type=jnp.float32) + spk_b_ref[...]       # [B, D]
    x3 = emb_ref[...] + alpha_enc * pe_text_ref[...] + spk[:, None, :]       # [B, Tt, D]
    x = x3.reshape(B * Tt, D_MODEL)

    # self-attention (packed QKV) + residual + LN (fused epilogue)
    qkv = jnp.dot(x, enc_wqkv_ref[...], preferred_element_type=jnp.float32) + enc_bqkv_ref[...]
    q3 = qkv[:, 0:D_MODEL].reshape(B, Tt, D_MODEL)
    k3 = qkv[:, D_MODEL:2 * D_MODEL].reshape(B, Tt, D_MODEL)
    v3 = qkv[:, 2 * D_MODEL:3 * D_MODEL].reshape(B, Tt, D_MODEL)
    attn_out, probs_enc = _mha(q3, k3, v3, enc_wo_ref[...], enc_bo_ref[...],
                               text_valid, causal=False)
    x = _layer_norm(x + attn_out, enc_ln1_g_ref[...], enc_ln1_b_ref[...])

    # FFN + residual + LN
    hidden = jnp.maximum(
        jnp.dot(x, enc_ffn_w1_ref[...], preferred_element_type=jnp.float32)
        + enc_ffn_b1_ref[...], 0.0)
    ff = jnp.dot(hidden, enc_ffn_w2_ref[...], preferred_element_type=jnp.float32) \
        + enc_ffn_b2_ref[...]
    enc2 = _layer_norm(x + ff, enc_ln2_g_ref[...], enc_ln2_b_ref[...])       # [B*Tt, D], stays VMEM

    for h, p in enumerate(probs_enc):
        attn_enc_ref[h] = p                              # [B, Tt, Tt] per head

    # ------------------------------- decoder -------------------------------
    # prenet + positional encoding
    mel2 = mel_ref[...].reshape(B * Tm, N_MELS)
    pre = jnp.maximum(
        jnp.dot(mel2, pre_w1_ref[...], preferred_element_type=jnp.float32) + pre_b1_ref[...], 0.0)
    pre = jnp.maximum(
        jnp.dot(pre, pre_w2_ref[...], preferred_element_type=jnp.float32) + pre_b2_ref[...], 0.0)
    x = pre + alpha_dec * pe_mel_ref[...].reshape(B * Tm, D_MODEL)           # [B*Tm, D]

    # masked self-attention + residual + LN
    qkv = jnp.dot(x, sa_wqkv_ref[...], preferred_element_type=jnp.float32) + sa_bqkv_ref[...]
    q3 = qkv[:, 0:D_MODEL].reshape(B, Tm, D_MODEL)
    k3 = qkv[:, D_MODEL:2 * D_MODEL].reshape(B, Tm, D_MODEL)
    v3 = qkv[:, 2 * D_MODEL:3 * D_MODEL].reshape(B, Tm, D_MODEL)
    sa, probs_dec = _mha(q3, k3, v3, sa_wo_ref[...], sa_bo_ref[...], mel_valid, causal=True)
    x = _layer_norm(x + sa, dec_ln1_g_ref[...], dec_ln1_b_ref[...])

    # encoder-decoder attention + residual + LN (packed KV on the encoder side)
    q = jnp.dot(x, ca_wq_ref[...], preferred_element_type=jnp.float32) + ca_bq_ref[...]
    kv = jnp.dot(enc2, ca_wkv_ref[...], preferred_element_type=jnp.float32) + ca_bkv_ref[...]
    q3 = q.reshape(B, Tm, D_MODEL)
    k3 = kv[:, 0:D_MODEL].reshape(B, Tt, D_MODEL)
    v3 = kv[:, D_MODEL:2 * D_MODEL].reshape(B, Tt, D_MODEL)
    ca, probs_cd = _mha(q3, k3, v3, ca_wo_ref[...], ca_bo_ref[...], text_valid, causal=False)
    x = _layer_norm(x + ca, dec_ln2_g_ref[...], dec_ln2_b_ref[...])

    # FFN + residual + LN
    hidden = jnp.maximum(
        jnp.dot(x, dec_ffn_w1_ref[...], preferred_element_type=jnp.float32)
        + dec_ffn_b1_ref[...], 0.0)
    ff = jnp.dot(hidden, dec_ffn_w2_ref[...], preferred_element_type=jnp.float32) \
        + dec_ffn_b2_ref[...]
    x = _layer_norm(x + ff, dec_ln3_g_ref[...], dec_ln3_b_ref[...])

    # fused mel + stop projection  (wms = [mel_w | stop_w])
    ms = jnp.dot(x, wms_ref[...], preferred_element_type=jnp.float32) + bms_ref[...]
    mel = ms[:, 0:N_MELS]                                # [B*Tm, N_MELS]
    gate = jax.nn.sigmoid(ms[:, N_MELS:N_MELS + 1])      # [B*Tm, 1]

    # postnet: two 'same' Conv1d (K=5) via batched shifted-matmul accumulation, fused
    pad = KERNEL_SIZE // 2
    pw1 = post_w1_ref[...]                               # [K*N_MELS, POST_CH]
    pw2 = post_w2_ref[...]                               # [K*POST_CH, N_MELS]

    mel3 = mel.reshape(B, Tm, N_MELS)
    zpad1 = jnp.zeros((B, pad, N_MELS), jnp.float32)
    xp = jnp.concatenate([zpad1, mel3, zpad1], axis=1)   # [B, Tm+4, N_MELS]
    acc = jnp.zeros((B * Tm, POST_CH), jnp.float32)
    for kk in range(KERNEL_SIZE):
        acc = acc + jnp.dot(xp[:, kk:kk + Tm, :].reshape(B * Tm, N_MELS),
                            pw1[kk * N_MELS:(kk + 1) * N_MELS, :],
                            preferred_element_type=jnp.float32)
    h1 = jnp.tanh(acc + post_b1_ref[...])                # [B*Tm, POST_CH]

    h13 = h1.reshape(B, Tm, POST_CH)
    zpad2 = jnp.zeros((B, pad, POST_CH), jnp.float32)
    hp = jnp.concatenate([zpad2, h13, zpad2], axis=1)    # [B, Tm+4, POST_CH]
    acc2 = jnp.zeros((B * Tm, N_MELS), jnp.float32)
    for kk in range(KERNEL_SIZE):
        acc2 = acc2 + jnp.dot(hp[:, kk:kk + Tm, :].reshape(B * Tm, POST_CH),
                              pw2[kk * POST_CH:(kk + 1) * POST_CH, :],
                              preferred_element_type=jnp.float32)
    out2 = mel + acc2 + post_b2_ref[...]                 # residual

    # ------------------------------- stores -------------------------------
    mel_out_ref[...] = mel
    out_ref[...] = out2
    gate_ref[...] = gate
    for h, p in enumerate(probs_dec):
        attn_dec_ref[h] = p
    for h, p in enumerate(probs_cd):
        attn_cd_ref[h] = p


# ================================ wrapper ======================================

def _full_spec(shape):
    nd = len(shape)
    return pl.BlockSpec(shape, lambda i, _nd=nd: (0,) * _nd)


def transformer_tts_forward(params, text, pos_text, mel_input, pos_mel, speaker_embedding):
    B, Tt = text.shape
    Tm = mel_input.shape[1]
    p = params

    # glue gathers (no clean Pallas equivalent needed for tiny table lookups)
    emb = jnp.take(p["embed"], text, axis=0)              # [B, Tt, D]
    pe_text = jnp.take(p["pe"], pos_text, axis=0)         # [B, Tt, D]
    pe_mel = jnp.take(p["pe"], pos_mel, axis=0)           # [B, Tm, D]
    alphas = jnp.concatenate([p["alpha_enc"], p["alpha_dec"]])   # [2]

    enc_att, enc_ffn = p["enc_attn"], p["enc_ffn"]
    sa, ca, dec_ffn = p["dec_self_attn"], p["dec_cross_attn"], p["dec_ffn"]

    inputs = [
        pos_text, pos_mel, emb, pe_text, mel_input, pe_mel, speaker_embedding, alphas,
        # encoder params
        p["spk_w"], p["spk_b"],
        enc_att["wqkv"], enc_att["bqkv"], enc_att["wo"], enc_att["bo"],
        p["enc_ln1_g"], p["enc_ln1_b"],
        enc_ffn["w1"], enc_ffn["b1"], enc_ffn["w2"], enc_ffn["b2"],
        p["enc_ln2_g"], p["enc_ln2_b"],
        # decoder params
        p["pre_w1"], p["pre_b1"], p["pre_w2"], p["pre_b2"],
        sa["wqkv"], sa["bqkv"], sa["wo"], sa["bo"], p["dec_ln1_g"], p["dec_ln1_b"],
        ca["wq"], ca["bq"], ca["wkv"], ca["bkv"], ca["wo"], ca["bo"],
        p["dec_ln2_g"], p["dec_ln2_b"],
        dec_ffn["w1"], dec_ffn["b1"], dec_ffn["w2"], dec_ffn["b2"],
        p["dec_ln3_g"], p["dec_ln3_b"],
        p["wms"], p["bms"],
        p["post_w1"], p["post_b1"], p["post_w2"], p["post_b2"],
    ]
    in_specs = [_full_spec(x.shape) for x in inputs]
    in_specs[7] = pl.BlockSpec(memory_space=pltpu.MemorySpace.SMEM)   # alphas scalars

    outs = pl.pallas_call(
        partial(_tts_kernel, B=B, Tt=Tt, Tm=Tm),
        grid=(1,),
        out_shape=(
            jax.ShapeDtypeStruct((B * Tm, N_MELS), jnp.float32),        # mel
            jax.ShapeDtypeStruct((B * Tm, N_MELS), jnp.float32),        # postnet out
            jax.ShapeDtypeStruct((B * Tm, 1), jnp.float32),             # gate
            jax.ShapeDtypeStruct((N_HEADS, B, Tt, Tt), jnp.float32),    # enc self-attn
            jax.ShapeDtypeStruct((N_HEADS, B, Tm, Tm), jnp.float32),    # dec self-attn
            jax.ShapeDtypeStruct((N_HEADS, B, Tm, Tt), jnp.float32),    # enc-dec attn
        ),
        in_specs=in_specs,
        out_specs=(
            _full_spec((B * Tm, N_MELS)),
            _full_spec((B * Tm, N_MELS)),
            _full_spec((B * Tm, 1)),
            _full_spec((N_HEADS, B, Tt, Tt)),
            _full_spec((N_HEADS, B, Tm, Tm)),
            _full_spec((N_HEADS, B, Tm, Tt)),
        ),
        compiler_params=pltpu.CompilerParams(dimension_semantics=("arbitrary",)),
    )(*inputs)

    mel_flat, out_flat, gate_flat, attn_enc, attn_dec, attn_cd = outs
    mel_output = mel_flat.reshape(B, Tm, N_MELS)
    out = out_flat.reshape(B, Tm, N_MELS)
    gate_output = gate_flat.reshape(B, Tm, 1)
    attention_enc = jnp.swapaxes(attn_enc, 0, 1)          # [B, H, Tt, Tt]
    attention_dec = jnp.swapaxes(attn_dec, 0, 1)          # [B, H, Tm, Tm]
    attention_enc_dec = jnp.swapaxes(attn_cd, 0, 1)       # [B, H, Tm, Tt]
    return (mel_output, out, gate_output, attention_dec, attention_enc_dec, attention_enc)


# ================================ parameter init ==============================

def sinusoid_table(max_len, d_model):
    pos = jnp.arange(max_len, dtype=jnp.float32)[:, None] + 1.0
    i = jnp.arange(d_model)[None, :]
    angle = pos / jnp.power(10000.0, (2.0 * (i // 2)) / d_model)
    pe = jnp.where(i % 2 == 0, jnp.sin(angle), jnp.cos(angle))
    pe = jnp.concatenate([jnp.zeros((1, d_model)), pe], axis=0)  # index 0 = padding
    return pe.astype(jnp.float32)


def _dense_init(key, fan_in, fan_out):
    kw, kb = jax.random.split(key)
    scale = 1.0 / math.sqrt(fan_in)
    w = jax.random.uniform(kw, (fan_in, fan_out), jnp.float32, -scale, scale)
    b = jax.random.uniform(kb, (fan_out,), jnp.float32, -scale, scale)
    return w, b


def init_params(key):
    keys = iter(jax.random.split(key, 64))
    nxt = lambda: next(keys)

    def dense(fi, fo):
        return _dense_init(nxt(), fi, fo)

    def mha_self():
        wq, bq = dense(D_MODEL, D_MODEL)
        wk, bk = dense(D_MODEL, D_MODEL)
        wv, bv = dense(D_MODEL, D_MODEL)
        wo, bo = dense(D_MODEL, D_MODEL)
        return {"wqkv": jnp.concatenate([wq, wk, wv], axis=1),
                "bqkv": jnp.concatenate([bq, bk, bv]).reshape(1, 3 * D_MODEL),
                "wo": wo, "bo": bo.reshape(1, D_MODEL)}

    def mha_cross():
        wq, bq = dense(D_MODEL, D_MODEL)
        wk, bk = dense(D_MODEL, D_MODEL)
        wv, bv = dense(D_MODEL, D_MODEL)
        wo, bo = dense(D_MODEL, D_MODEL)
        return {"wq": wq, "bq": bq.reshape(1, D_MODEL),
                "wkv": jnp.concatenate([wk, wv], axis=1),
                "bkv": jnp.concatenate([bk, bv]).reshape(1, 2 * D_MODEL),
                "wo": wo, "bo": bo.reshape(1, D_MODEL)}

    def ffn():
        w1, b1 = dense(D_MODEL, D_FF)
        w2, b2 = dense(D_FF, D_MODEL)
        return {"w1": w1, "b1": b1.reshape(1, D_FF), "w2": w2, "b2": b2.reshape(1, D_MODEL)}

    params = {}
    params["embed"] = 0.1 * jax.random.normal(nxt(), (VOCAB, D_MODEL), jnp.float32)
    params["pe"] = sinusoid_table(MAX_LEN, D_MODEL)
    params["alpha_enc"] = jnp.ones((1,), jnp.float32)
    params["alpha_dec"] = jnp.ones((1,), jnp.float32)
    spk_w, spk_b = dense(SPK_DIM, D_MODEL)
    params["spk_w"], params["spk_b"] = spk_w, spk_b.reshape(1, D_MODEL)

    params["enc_attn"] = mha_self()
    params["enc_ffn"] = ffn()
    for name in ("enc_ln1", "enc_ln2", "dec_ln1", "dec_ln2", "dec_ln3"):
        params[name + "_g"] = jnp.ones((1, D_MODEL), jnp.float32)
        params[name + "_b"] = jnp.zeros((1, D_MODEL), jnp.float32)

    pre_w1, pre_b1 = dense(N_MELS, PRENET_H)
    pre_w2, pre_b2 = dense(PRENET_H, D_MODEL)
    params["pre_w1"], params["pre_b1"] = pre_w1, pre_b1.reshape(1, PRENET_H)
    params["pre_w2"], params["pre_b2"] = pre_w2, pre_b2.reshape(1, D_MODEL)
    params["dec_self_attn"] = mha_self()
    params["dec_cross_attn"] = mha_cross()
    params["dec_ffn"] = ffn()

    mel_w, mel_b = dense(D_MODEL, N_MELS)
    stop_w, stop_b = dense(D_MODEL, 1)
    params["wms"] = jnp.concatenate([mel_w, stop_w], axis=1)               # [D, N_MELS + 1]
    params["bms"] = jnp.concatenate([mel_b, stop_b]).reshape(1, N_MELS + 1)

    post_w1, post_b1 = dense(KERNEL_SIZE * N_MELS, POST_CH)
    post_w2, post_b2 = dense(KERNEL_SIZE * POST_CH, N_MELS)
    params["post_w1"], params["post_b1"] = post_w1, post_b1.reshape(1, POST_CH)
    params["post_w2"], params["post_b2"] = post_w2, post_b2.reshape(1, N_MELS)
    return params


# ================================ main ========================================

if __name__ == "__main__":
    B, T_TEXT, T_MEL = 2, 8, 8

    params = init_params(jax.random.PRNGKey(42))

    key = jax.random.PRNGKey(0)
    k1, k2, k3 = jax.random.split(key, 3)
    text = jax.random.randint(k1, (B, T_TEXT), 1, VOCAB, dtype=jnp.int32)
    pos_text = jnp.tile(jnp.arange(1, T_TEXT + 1, dtype=jnp.int32)[None], (B, 1))
    mel_input = jax.random.normal(k2, (B, T_MEL, N_MELS), dtype=jnp.float32)
    pos_mel = jnp.tile(jnp.arange(1, T_MEL + 1, dtype=jnp.int32)[None], (B, 1))
    speaker_embedding = jax.random.normal(k3, (B, SPK_DIM), dtype=jnp.float32)

    forward = jax.jit(transformer_tts_forward)
    outputs = forward(params, text, pos_text, mel_input, pos_mel, speaker_embedding)
    outputs = jax.block_until_ready(outputs)

    mel_output, out, gate_output, attention_dec, attention_enc_dec, attention_enc = outputs
    assert mel_output.shape == (B, T_MEL, N_MELS)
    assert out.shape == (B, T_MEL, N_MELS)
    assert gate_output.shape == (B, T_MEL, 1)
    assert attention_dec.shape == (B, N_HEADS, T_MEL, T_MEL)
    assert attention_enc_dec.shape == (B, N_HEADS, T_MEL, T_TEXT)
    assert attention_enc.shape == (B, N_HEADS, T_TEXT, T_TEXT)
    assert all(bool(jnp.all(jnp.isfinite(o))) for o in outputs)

    print("KERNEL_OK")
</pallas_src>

<mosaic_0001>
module attributes {stable_mosaic.version = 11 : i64} {
  func.func @_tts_kernel(%arg0: i32, %arg1: memref<2x8xi32, #tpu.memory_space<vmem>>, %arg2: memref<2x8xi32, #tpu.memory_space<vmem>>, %arg3: memref<2x8x32xf32, #tpu.memory_space<vmem>>, %arg4: memref<2x8x32xf32, #tpu.memory_space<vmem>>, %arg5: memref<2x8x4xf32, #tpu.memory_space<vmem>>, %arg6: memref<2x8x32xf32, #tpu.memory_space<vmem>>, %arg7: memref<2x16xf32, #tpu.memory_space<vmem>>, %arg8: memref<2xf32, #tpu.memory_space<smem>>, %arg9: memref<16x32xf32, #tpu.memory_space<vmem>>, %arg10: memref<1x32xf32, #tpu.memory_space<vmem>>, %arg11: memref<32x96xf32, #tpu.memory_space<vmem>>, %arg12: memref<1x96xf32, #tpu.memory_space<vmem>>, %arg13: memref<32x32xf32, #tpu.memory_space<vmem>>, %arg14: memref<1x32xf32, #tpu.memory_space<vmem>>, %arg15: memref<1x32xf32, #tpu.memory_space<vmem>>, %arg16: memref<1x32xf32, #tpu.memory_space<vmem>>, %arg17: memref<32x64xf32, #tpu.memory_space<vmem>>, %arg18: memref<1x64xf32, #tpu.memory_space<vmem>>, %arg19: memref<64x32xf32, #tpu.memory_space<vmem>>, %arg20: memref<1x32xf32, #tpu.memory_space<vmem>>, %arg21: memref<1x32xf32, #tpu.memory_space<vmem>>, %arg22: memref<1x32xf32, #tpu.memory_space<vmem>>, %arg23: memref<4x32xf32, #tpu.memory_space<vmem>>, %arg24: memref<1x32xf32, #tpu.memory_space<vmem>>, %arg25: memref<32x32xf32, #tpu.memory_space<vmem>>, %arg26: memref<1x32xf32, #tpu.memory_space<vmem>>, %arg27: memref<32x96xf32, #tpu.memory_space<vmem>>, %arg28: memref<1x96xf32, #tpu.memory_space<vmem>>, %arg29: memref<32x32xf32, #tpu.memory_space<vmem>>, %arg30: memref<1x32xf32, #tpu.memory_space<vmem>>, %arg31: memref<1x32xf32, #tpu.memory_space<vmem>>, %arg32: memref<1x32xf32, #tpu.memory_space<vmem>>, %arg33: memref<32x32xf32, #tpu.memory_space<vmem>>, %arg34: memref<1x32xf32, #tpu.memory_space<vmem>>, %arg35: memref<32x64xf32, #tpu.memory_space<vmem>>, %arg36: memref<1x64xf32, #tpu.memory_space<vmem>>, %arg37: memref<32x32xf32, #tpu.memory_space<vmem>>, %arg38: memref<1x32xf32, #tpu.memory_space<vmem>>, %arg39: memref<1x32xf32, #tpu.memory_space<vmem>>, %arg40: memref<1x32xf32, #tpu.memory_space<vmem>>, %arg41: memref<32x64xf32, #tpu.memory_space<vmem>>, %arg42: memref<1x64xf32, #tpu.memory_space<vmem>>, %arg43: memref<64x32xf32, #tpu.memory_space<vmem>>, %arg44: memref<1x32xf32, #tpu.memory_space<vmem>>, %arg45: memref<1x32xf32, #tpu.memory_space<vmem>>, %arg46: memref<1x32xf32, #tpu.memory_space<vmem>>, %arg47: memref<32x5xf32, #tpu.memory_space<vmem>>, %arg48: memref<1x5xf32, #tpu.memory_space<vmem>>, %arg49: memref<20x16xf32, #tpu.memory_space<vmem>>, %arg50: memref<1x16xf32, #tpu.memory_space<vmem>>, %arg51: memref<80x4xf32, #tpu.memory_space<vmem>>, %arg52: memref<1x4xf32, #tpu.memory_space<vmem>>, %arg53: memref<16x4xf32, #tpu.memory_space<vmem>>, %arg54: memref<16x4xf32, #tpu.memory_space<vmem>>, %arg55: memref<16x1xf32, #tpu.memory_space<vmem>>, %arg56: memref<2x2x8x8xf32, #tpu.memory_space<vmem>>, %arg57: memref<2x2x8x8xf32, #tpu.memory_space<vmem>>, %arg58: memref<2x2x8x8xf32, #tpu.memory_space<vmem>>) attributes {dimension_semantics = [#tpu.dimension_semantics<arbitrary>], iteration_bounds = array<i64: 1>, scalar_prefetch = 0 : i64, scratch_operands = 0 : i64, tpu.core_type = #tpu.core_type<tc>, window_params = [{pipeline_mode = #tpu.pipeline_mode<synchronous>, transform_indices = @transform_0, window_bounds = array<i64: 2, 8>}, {pipeline_mode = #tpu.pipeline_mode<synchronous>, transform_indices = @transform_1, window_bounds = array<i64: 2, 8>}, {pipeline_mode = #tpu.pipeline_mode<synchronous>, transform_indices = @transform_2, window_bounds = array<i64: 2, 8, 32>}, {pipeline_mode = #tpu.pipeline_mode<synchronous>, transform_indices = @transform_3, window_bounds = array<i64: 2, 8, 32>}, {pipeline_mode = #tpu.pipeline_mode<synchronous>, transform_indices = @transform_4, window_bounds = array<i64: 2, 8, 4>}, {pipeline_mode = #tpu.pipeline_mode<synchronous>, transform_indices = @transform_5, window_bounds = array<i64: 2, 8, 32>}, {pipeline_mode = #tpu.pipeline_mode<synchronous>, transform_indices = @transform_6, window_bounds = array<i64: 2, 16>}, {transform_indices = @transform_7, window_bounds = array<i64: 2>}, {pipeline_mode = #tpu.pipeline_mode<synchronous>, transform_indices = @transform_8, window_bounds = array<i64: 16, 32>}, {pipeline_mode = #tpu.pipeline_mode<synchronous>, transform_indices = @transform_9, window_bounds = array<i64: 1, 32>}, {pipeline_mode = #tpu.pipeline_mode<synchronous>, transform_indices = @transform_10, window_bounds = array<i64: 32, 96>}, {pipeline_mode = #tpu.pipeline_mode<synchronous>, transform_indices = @transform_11, window_bounds = array<i64: 1, 96>}, {pipeline_mode = #tpu.pipeline_mode<synchronous>, transform_indices = @transform_12, window_bounds = array<i64: 32, 32>}, {pipeline_mode = #tpu.pipeline_mode<synchronous>, transform_indices = @transform_13, window_bounds = array<i64: 1, 32>}, {pipeline_mode = #tpu.pipeline_mode<synchronous>, transform_indices = @transform_14, window_bounds = array<i64: 1, 32>}, {pipeline_mode = #tpu.pipeline_mode<synchronous>, transform_indices = @transform_15, window_bounds = array<i64: 1, 32>}, {pipeline_mode = #tpu.pipeline_mode<synchronous>, transform_indices = @transform_16, window_bounds = array<i64: 32, 64>}, {pipeline_mode = #tpu.pipeline_mode<synchronous>, transform_indices = @transform_17, window_bounds = array<i64: 1, 64>}, {pipeline_mode = #tpu.pipeline_mode<synchronous>, transform_indices = @transform_18, window_bounds = array<i64: 64, 32>}, {pipeline_mode = #tpu.pipeline_mode<synchronous>, transform_indices = @transform_19, window_bounds = array<i64: 1, 32>}, {pipeline_mode = #tpu.pipeline_mode<synchronous>, transform_indices = @transform_20, window_bounds = array<i64: 1, 32>}, {pipeline_mode = #tpu.pipeline_mode<synchronous>, transform_indices = @transform_21, window_bounds = array<i64: 1, 32>}, {pipeline_mode = #tpu.pipeline_mode<synchronous>, transform_indices = @transform_22, window_bounds = array<i64: 4, 32>}, {pipeline_mode = #tpu.pipeline_mode<synchronous>, transform_indices = @transform_23, window_bounds = array<i64: 1, 32>}, {pipeline_mode = #tpu.pipeline_mode<synchronous>, transform_indices = @transform_24, window_bounds = array<i64: 32, 32>}, {pipeline_mode = #tpu.pipeline_mode<synchronous>, transform_indices = @transform_25, window_bounds = array<i64: 1, 32>}, {pipeline_mode = #tpu.pipeline_mode<synchronous>, transform_indices = @transform_26, window_bounds = array<i64: 32, 96>}, {pipeline_mode = #tpu.pipeline_mode<synchronous>, transform_indices = @transform_27, window_bounds = array<i64: 1, 96>}, {pipeline_mode = #tpu.pipeline_mode<synchronous>, transform_indices = @transform_28, window_bounds = array<i64: 32, 32>}, {pipeline_mode = #tpu.pipeline_mode<synchronous>, transform_indices = @transform_29, window_bounds = array<i64: 1, 32>}, {pipeline_mode = #tpu.pipeline_mode<synchronous>, transform_indices = @transform_30, window_bounds = array<i64: 1, 32>}, {pipeline_mode = #tpu.pipeline_mode<synchronous>, transform_indices = @transform_31, window_bounds = array<i64: 1, 32>}, {pipeline_mode = #tpu.pipeline_mode<synchronous>, transform_indices = @transform_32, window_bounds = array<i64: 32, 32>}, {pipeline_mode = #tpu.pipeline_mode<synchronous>, transform_indices = @transform_33, window_bounds = array<i64: 1, 32>}, {pipeline_mode = #tpu.pipeline_mode<synchronous>, transform_indices = @transform_34, window_bounds = array<i64: 32, 64>}, {pipeline_mode = #tpu.pipeline_mode<synchronous>, transform_indices = @transform_35, window_bounds = array<i64: 1, 64>}, {pipeline_mode = #tpu.pipeline_mode<synchronous>, transform_indices = @transform_36, window_bounds = array<i64: 32, 32>}, {pipeline_mode = #tpu.pipeline_mode<synchronous>, transform_indices = @transform_37, window_bounds = array<i64: 1, 32>}, {pipeline_mode = #tpu.pipeline_mode<synchronous>, transform_indices = @transform_38, window_bounds = array<i64: 1, 32>}, {pipeline_mode = #tpu.pipeline_mode<synchronous>, transform_indices = @transform_39, window_bounds = array<i64: 1, 32>}, {pipeline_mode = #tpu.pipeline_mode<synchronous>, transform_indices = @transform_40, window_bounds = array<i64: 32, 64>}, {pipeline_mode = #tpu.pipeline_mode<synchronous>, transform_indices = @transform_41, window_bounds = array<i64: 1, 64>}, {pipeline_mode = #tpu.pipeline_mode<synchronous>, transform_indices = @transform_42, window_bounds = array<i64: 64, 32>}, {pipeline_mode = #tpu.pipeline_mode<synchronous>, transform_indices = @transform_43, window_bounds = array<i64: 1, 32>}, {pipeline_mode = #tpu.pipeline_mode<synchronous>, transform_indices = @transform_44, window_bounds = array<i64: 1, 32>}, {pipeline_mode = #tpu.pipeline_mode<synchronous>, transform_indices = @transform_45, window_bounds = array<i64: 1, 32>}, {pipeline_mode = #tpu.pipeline_mode<synchronous>, transform_indices = @transform_46, window_bounds = array<i64: 32, 5>}, {pipeline_mode = #tpu.pipeline_mode<synchronous>, transform_indices = @transform_47, window_bounds = array<i64: 1, 5>}, {pipeline_mode = #tpu.pipeline_mode<synchronous>, transform_indices = @transform_48, window_bounds = array<i64: 20, 16>}, {pipeline_mode = #tpu.pipeline_mode<synchronous>, transform_indices = @transform_49, window_bounds = array<i64: 1, 16>}, {pipeline_mode = #tpu.pipeline_mode<synchronous>, transform_indices = @transform_50, window_bounds = array<i64: 80, 4>}, {pipeline_mode = #tpu.pipeline_mode<synchronous>, transform_indices = @transform_51, window_bounds = array<i64: 1, 4>}, {pipeline_mode = #tpu.pipeline_mode<synchronous>, transform_indices = @transform_52, window_bounds = array<i64: 16, 4>}, {pipeline_mode = #tpu.pipeline_mode<synchronous>, transform_indices = @transform_53, window_bounds = array<i64: 16, 4>}, {pipeline_mode = #tpu.pipeline_mode<synchronous>, transform_indices = @transform_54, window_bounds = array<i64: 16, 1>}, {pipeline_mode = #tpu.pipeline_mode<synchronous>, transform_indices = @transform_55, window_bounds = array<i64: 2, 2, 8, 8>}, {pipeline_mode = #tpu.pipeline_mode<synchronous>, transform_indices = @transform_56, window_bounds = array<i64: 2, 2, 8, 8>}, {pipeline_mode = #tpu.pipeline_mode<synchronous>, transform_indices = @transform_57, window_bounds = array<i64: 2, 2, 8, 8>}]} {
    %c0 = arith.constant 0 : index
    %0 = memref.load %arg8[%c0] : memref<2xf32, #tpu.memory_space<smem>>
    %c1 = arith.constant 1 : index
    %1 = memref.load %arg8[%c1] : memref<2xf32, #tpu.memory_space<smem>>
    %c0_0 = arith.constant 0 : index
    %c0_1 = arith.constant 0 : index
    %2 = vector.load %arg1[%c0_0, %c0_1] : memref<2x8xi32, #tpu.memory_space<vmem>>, vector<2x8xi32>
    %c0_i32 = arith.constant 0 : i32
    %3 = vector.broadcast %c0_i32 : i32 to vector<2x8xi32>
    %4 = arith.cmpi ne, %2, %3 : vector<2x8xi32>
    %c0_2 = arith.constant 0 : index
    %c0_3 = arith.constant 0 : index
    %5 = vector.load %arg2[%c0_2, %c0_3] : memref<2x8xi32, #tpu.memory_space<vmem>>, vector<2x8xi32>
    %c0_i32_4 = arith.constant 0 : i32
    %6 = vector.broadcast %c0_i32_4 : i32 to vector<2x8xi32>
    %7 = arith.cmpi ne, %5, %6 : vector<2x8xi32>
    %c0_5 = arith.constant 0 : index
    %c0_6 = arith.constant 0 : index
    %8 = vector.load %arg7[%c0_5, %c0_6] : memref<2x16xf32, #tpu.memory_space<vmem>>, vector<2x16xf32>
    %c0_7 = arith.constant 0 : index
    %c0_8 = arith.constant 0 : index
    %9 = vector.load %arg9[%c0_7, %c0_8] : memref<16x32xf32, #tpu.memory_space<vmem>>, vector<16x32xf32>
    %cst = arith.constant dense<0.000000e+00> : vector<2x32xf32>
    %10 = tpu.matmul %8, %9, %cst {dimension_numbers = #tpu.dot_dimension_numbers<[1], [0], [0], [1], [0, 0, 1, 1], [], []>} : vector<2x16xf32>, vector<16x32xf32>, vector<2x32xf32> -> vector<2x32xf32>
    %c0_9 = arith.constant 0 : index
    %c0_10 = arith.constant 0 : index
    %11 = vector.load %arg10[%c0_9, %c0_10] : memref<1x32xf32, #tpu.memory_space<vmem>>, vector<1x32xf32>
    %12 = vector.broadcast %11 : vector<1x32xf32> to vector<2x32xf32>
    %13 = arith.addf %10, %12 : vector<2x32xf32>
    %c0_11 = arith.constant 0 : index
    %c0_12 = arith.constant 0 : index
    %c0_13 = arith.constant 0 : index
    %14 = vector.load %arg3[%c0_11, %c0_12, %c0_13] : memref<2x8x32xf32, #tpu.memory_space<vmem>>, vector<2x8x32xf32>
    %c0_14 = arith.constant 0 : index
    %c0_15 = arith.constant 0 : index
    %c0_16 = arith.constant 0 : index
    %15 = vector.load %arg4[%c0_14, %c0_15, %c0_16] : memref<2x8x32xf32, #tpu.memory_space<vmem>>, vector<2x8x32xf32>
    %16 = vector.broadcast %0 : f32 to vector<2x8x32xf32>
    %17 = arith.mulf %16, %15 : vector<2x8x32xf32>
    %18 = arith.addf %14, %17 : vector<2x8x32xf32>
    %19 = vector.shape_cast %13 : vector<2x32xf32> to vector<2x1x32xf32>
    %20 = vector.broadcast %19 : vector<2x1x32xf32> to vector<2x8x32xf32>
    %21 = arith.addf %18, %20 : vector<2x8x32xf32>
    %22 = vector.shape_cast %21 : vector<2x8x32xf32> to vector<16x32xf32>
    %c0_17 = arith.constant 0 : index
    %c0_18 = arith.constant 0 : index
    %23 = vector.load %arg11[%c0_17, %c0_18] : memref<32x96xf32, #tpu.memory_space<vmem>>, vector<32x96xf32>
    %cst_19 = arith.constant dense<0.000000e+00> : vector<16x96xf32>
    %24 = tpu.matmul %22, %23, %cst_19 {dimension_numbers = #tpu.dot_dimension_numbers<[1], [0], [0], [1], [0, 0, 1, 1], [], []>} : vector<16x32xf32>, vector<32x96xf32>, vector<16x96xf32> -> vector<16x96xf32>
    %c0_20 = arith.constant 0 : index
    %c0_21 = arith.constant 0 : index
    %25 = vector.load %arg12[%c0_20, %c0_21] : memref<1x96xf32, #tpu.memory_space<vmem>>, vector<1x96xf32>
    %26 = vector.broadcast %25 : vector<1x96xf32> to vector<16x96xf32>
    %27 = arith.addf %24, %26 : vector<16x96xf32>
    %28 = vector.extract_strided_slice %27 {offsets = [0, 0], sizes = [16, 32], strides = [1, 1]} : vector<16x96xf32> to vector<16x32xf32>
    %29 = vector.shape_cast %28 : vector<16x32xf32> to vector<2x8x32xf32>
    %30 = vector.extract_strided_slice %27 {offsets = [0, 32], sizes = [16, 32], strides = [1, 1]} : vector<16x96xf32> to vector<16x32xf32>
    %31 = vector.shape_cast %30 : vector<16x32xf32> to vector<2x8x32xf32>
    %32 = vector.extract_strided_slice %27 {offsets = [0, 64], sizes = [16, 32], strides = [1, 1]} : vector<16x96xf32> to vector<16x32xf32>
    %33 = vector.shape_cast %32 : vector<16x32xf32> to vector<2x8x32xf32>
    %c0_22 = arith.constant 0 : index
    %c0_23 = arith.constant 0 : index
    %34 = vector.load %arg13[%c0_22, %c0_23] : memref<32x32xf32, #tpu.memory_space<vmem>>, vector<32x32xf32>
    %c0_24 = arith.constant 0 : index
    %c0_25 = arith.constant 0 : index
    %35 = vector.load %arg14[%c0_24, %c0_25] : memref<1x32xf32, #tpu.memory_space<vmem>>, vector<1x32xf32>
    %36 = vector.shape_cast %4 : vector<2x8xi1> to vector<2x1x8xi1>
    %37 = vector.shape_cast %36 : vector<2x1x8xi1> to vector<2x1x8xi1>
    %38 = vector.broadcast %37 : vector<2x1x8xi1> to vector<2x8x8xi1>
    %cst_26 = arith.constant 0.000000e+00 : f32
    %39 = vector.broadcast %cst_26 : f32 to vector<16x32xf32>
    %40 = vector.extract_strided_slice %29 {offsets = [0, 0, 0], sizes = [2, 8, 16], strides = [1, 1, 1]} : vector<2x8x32xf32> to vector<2x8x16xf32>
    %41 = vector.extract_strided_slice %31 {offsets = [0, 0, 0], sizes = [2, 8, 16], strides = [1, 1, 1]} : vector<2x8x32xf32> to vector<2x8x16xf32>
    "tpu.trace_start"() <{level = 10 : i32, message = "bqd,bkd->bqk"}> : () -> ()
    %cst_27 = arith.constant dense<0.000000e+00> : vector<2x8x8xf32>
    %42 = tpu.matmul %40, %41, %cst_27 {dimension_numbers = #tpu.dot_dimension_numbers<[2], [2], [1], [1], [0, 0, 0, 1, 1, 1], [0], [0]>} : vector<2x8x16xf32>, vector<2x8x16xf32>, vector<2x8x8xf32> -> vector<2x8x8xf32>
    "tpu.trace_stop"() : () -> ()
    %cst_28 = arith.constant 2.500000e-01 : f32
    %43 = vector.broadcast %cst_28 : f32 to vector<2x8x8xf32>
    %44 = arith.mulf %42, %43 : vector<2x8x8xf32>
    %cst_29 = arith.constant -1.000000e+09 : f32
    %45 = vector.broadcast %cst_29 : f32 to vector<2x8x8xf32>
    %46 = arith.select %38, %44, %45 : vector<2x8x8xi1>, vector<2x8x8xf32>
    %cst_30 = arith.constant dense<0xFF800000> : vector<2x8xf32>
    %47 = vector.multi_reduction <maximumf>, %46, %cst_30 [2] : vector<2x8x8xf32> to vector<2x8xf32>
    %48 = vector.shape_cast %47 : vector<2x8xf32> to vector<2x8x1xf32>
    %49 = vector.broadcast %48 : vector<2x8x1xf32> to vector<2x8x8xf32>
    %50 = arith.subf %46, %49 : vector<2x8x8xf32>
    %51 = math.exp %50 : vector<2x8x8xf32>
    %cst_31 = arith.constant dense<0.000000e+00> : vector<2x8xf32>
    %52 = vector.multi_reduction <add>, %51, %cst_31 [2] : vector<2x8x8xf32> to vector<2x8xf32>
    %53 = vector.shape_cast %52 : vector<2x8xf32> to vector<2x8x1xf32>
    %54 = tpu.reciprocal %53 {approx = true} : vector<2x8x1xf32> -> vector<2x8x1xf32>
    %55 = vector.broadcast %54 : vector<2x8x1xf32> to vector<2x8x8xf32>
    %56 = arith.mulf %51, %55 : vector<2x8x8xf32>
    %57 = vector.extract_strided_slice %33 {offsets = [0, 0, 0], sizes = [2, 8, 16], strides = [1, 1, 1]} : vector<2x8x32xf32> to vector<2x8x16xf32>
    "tpu.trace_start"() <{level = 10 : i32, message = "bqk,bkd->bqd"}> : () -> ()
    %cst_32 = arith.constant dense<0.000000e+00> : vector<2x8x16xf32>
    %58 = tpu.matmul %56, %57, %cst_32 {dimension_numbers = #tpu.dot_dimension_numbers<[2], [1], [1], [2], [0, 0, 0, 1, 1, 2], [0], [0]>} : vector<2x8x8xf32>, vector<2x8x16xf32>, vector<2x8x16xf32> -> vector<2x8x16xf32>
    "tpu.trace_stop"() : () -> ()
    %59 = vector.shape_cast %58 : vector<2x8x16xf32> to vector<16x16xf32>
    %60 = vector.extract_strided_slice %34 {offsets = [0, 0], sizes = [16, 32], strides = [1, 1]} : vector<32x32xf32> to vector<16x32xf32>
    %cst_33 = arith.constant dense<0.000000e+00> : vector<16x32xf32>
    %61 = tpu.matmul %59, %60, %cst_33 {dimension_numbers = #tpu.dot_dimension_numbers<[1], [0], [0], [1], [0, 0, 1, 1], [], []>} : vector<16x16xf32>, vector<16x32xf32>, vector<16x32xf32> -> vector<16x32xf32>
    %62 = arith.addf %39, %61 : vector<16x32xf32>
    %63 = vector.extract_strided_slice %29 {offsets = [0, 0, 16], sizes = [2, 8, 16], strides = [1, 1, 1]} : vector<2x8x32xf32> to vector<2x8x16xf32>
    %64 = vector.extract_strided_slice %31 {offsets = [0, 0, 16], sizes = [2, 8, 16], strides = [1, 1, 1]} : vector<2x8x32xf32> to vector<2x8x16xf32>
    "tpu.trace_start"() <{level = 10 : i32, message = "bqd,bkd->bqk"}> : () -> ()
    %cst_34 = arith.constant dense<0.000000e+00> : vector<2x8x8xf32>
    %65 = tpu.matmul %63, %64, %cst_34 {dimension_numbers = #tpu.dot_dimension_numbers<[2], [2], [1], [1], [0, 0, 0, 1, 1, 1], [0], [0]>} : vector<2x8x16xf32>, vector<2x8x16xf32>, vector<2x8x8xf32> -> vector<2x8x8xf32>
    "tpu.trace_stop"() : () -> ()
    %cst_35 = arith.constant 2.500000e-01 : f32
    %66 = vector.broadcast %cst_35 : f32 to vector<2x8x8xf32>
    %67 = arith.mulf %65, %66 : vector<2x8x8xf32>
    %cst_36 = arith.constant -1.000000e+09 : f32
    %68 = vector.broadcast %cst_36 : f32 to vector<2x8x8xf32>
    %69 = arith.select %38, %67, %68 : vector<2x8x8xi1>, vector<2x8x8xf32>
    %cst_37 = arith.constant dense<0xFF800000> : vector<2x8xf32>
    %70 = vector.multi_reduction <maximumf>, %69, %cst_37 [2] : vector<2x8x8xf32> to vector<2x8xf32>
    %71 = vector.shape_cast %70 : vector<2x8xf32> to vector<2x8x1xf32>
    %72 = vector.broadcast %71 : vector<2x8x1xf32> to vector<2x8x8xf32>
    %73 = arith.subf %69, %72 : vector<2x8x8xf32>
    %74 = math.exp %73 : vector<2x8x8xf32>
    %cst_38 = arith.constant dense<0.000000e+00> : vector<2x8xf32>
    %75 = vector.multi_reduction <add>, %74, %cst_38 [2] : vector<2x8x8xf32> to vector<2x8xf32>
    %76 = vector.shape_cast %75 : vector<2x8xf32> to vector<2x8x1xf32>
    %77 = tpu.reciprocal %76 {approx = true} : vector<2x8x1xf32> -> vector<2x8x1xf32>
    %78 = vector.broadcast %77 : vector<2x8x1xf32> to vector<2x8x8xf32>
    %79 = arith.mulf %74, %78 : vector<2x8x8xf32>
    %80 = vector.extract_strided_slice %33 {offsets = [0, 0, 16], sizes = [2, 8, 16], strides = [1, 1, 1]} : vector<2x8x32xf32> to vector<2x8x16xf32>
    "tpu.trace_start"() <{level = 10 : i32, message = "bqk,bkd->bqd"}> : () -> ()
    %cst_39 = arith.constant dense<0.000000e+00> : vector<2x8x16xf32>
    %81 = tpu.matmul %79, %80, %cst_39 {dimension_numbers = #tpu.dot_dimension_numbers<[2], [1], [1], [2], [0, 0, 0, 1, 1, 2], [0], [0]>} : vector<2x8x8xf32>, vector<2x8x16xf32>, vector<2x8x16xf32> -> vector<2x8x16xf32>
    "tpu.trace_stop"() : () -> ()
    %82 = vector.shape_cast %81 : vector<2x8x16xf32> to vector<16x16xf32>
    %83 = vector.extract_strided_slice %34 {offsets = [16, 0], sizes = [16, 32], strides = [1, 1]} : vector<32x32xf32> to vector<16x32xf32>
    %cst_40 = arith.constant dense<0.000000e+00> : vector<16x32xf32>
    %84 = tpu.matmul %82, %83, %cst_40 {dimension_numbers = #tpu.dot_dimension_numbers<[1], [0], [0], [1], [0, 0, 1, 1], [], []>} : vector<16x16xf32>, vector<16x32xf32>, vector<16x32xf32> -> vector<16x32xf32>
    %85 = arith.addf %62, %84 : vector<16x32xf32>
    %86 = vector.broadcast %35 : vector<1x32xf32> to vector<16x32xf32>
    %87 = arith.addf %85, %86 : vector<16x32xf32>
    %88 = arith.addf %22, %87 : vector<16x32xf32>
    %c0_41 = arith.constant 0 : index
    %c0_42 = arith.constant 0 : index
    %89 = vector.load %arg15[%c0_41, %c0_42] : memref<1x32xf32, #tpu.memory_space<vmem>>, vector<1x32xf32>
    %c0_43 = arith.constant 0 : index
    %c0_44 = arith.constant 0 : index
    %90 = vector.load %arg16[%c0_43, %c0_44] : memref<1x32xf32, #tpu.memory_space<vmem>>, vector<1x32xf32>
    %cst_45 = arith.constant dense<0.000000e+00> : vector<16xf32>
    %91 = vector.multi_reduction <add>, %88, %cst_45 [1] : vector<16x32xf32> to vector<16xf32>
    %92 = vector.shape_cast %91 : vector<16xf32> to vector<16x1xf32>
    %cst_46 = arith.constant 3.200000e+01 : f32
    %93 = vector.broadcast %cst_46 : f32 to vector<16x1xf32>
    %94 = arith.divf %92, %93 : vector<16x1xf32>
    %95 = vector.broadcast %94 : vector<16x1xf32> to vector<16x32xf32>
    %96 = arith.subf %88, %95 : vector<16x32xf32>
    %97 = arith.mulf %96, %96 : vector<16x32xf32>
    %cst_47 = arith.constant dense<0.000000e+00> : vector<16xf32>
    %98 = vector.multi_reduction <add>, %97, %cst_47 [1] : vector<16x32xf32> to vector<16xf32>
    %99 = vector.shape_cast %98 : vector<16xf32> to vector<16x1xf32>
    %cst_48 = arith.constant 3.200000e+01 : f32
    %100 = vector.broadcast %cst_48 : f32 to vector<16x1xf32>
    %101 = arith.divf %99, %100 : vector<16x1xf32>
    %102 = vector.broadcast %94 : vector<16x1xf32> to vector<16x32xf32>
    %103 = arith.subf %88, %102 : vector<16x32xf32>
    %cst_49 = arith.constant 9.99999974E-6 : f32
    %104 = vector.broadcast %cst_49 : f32 to vector<16x1xf32>
    %105 = arith.addf %101, %104 : vector<16x1xf32>
    %106 = math.rsqrt %105 : vector<16x1xf32>
    %107 = vector.broadcast %106 : vector<16x1xf32> to vector<16x32xf32>
    %108 = arith.mulf %103, %107 : vector<16x32xf32>
    %109 = vector.broadcast %89 : vector<1x32xf32> to vector<16x32xf32>
    %110 = arith.mulf %108, %109 : vector<16x32xf32>
    %111 = vector.broadcast %90 : vector<1x32xf32> to vector<16x32xf32>
    %112 = arith.addf %110, %111 : vector<16x32xf32>
    %c0_50 = arith.constant 0 : index
    %c0_51 = arith.constant 0 : index
    %113 = vector.load %arg17[%c0_50, %c0_51] : memref<32x64xf32, #tpu.memory_space<vmem>>, vector<32x64xf32>
    %cst_52 = arith.constant dense<0.000000e+00> : vector<16x64xf32>
    %114 = tpu.matmul %112, %113, %cst_52 {dimension_numbers = #tpu.dot_dimension_numbers<[1], [0], [0], [1], [0, 0, 1, 1], [], []>} : vector<16x32xf32>, vector<32x64xf32>, vector<16x64xf32> -> vector<16x64xf32>
    %c0_53 = arith.constant 0 : index
    %c0_54 = arith.constant 0 : index
    %115 = vector.load %arg18[%c0_53, %c0_54] : memref<1x64xf32, #tpu.memory_space<vmem>>, vector<1x64xf32>
    %116 = vector.broadcast %115 : vector<1x64xf32> to vector<16x64xf32>
    %117 = arith.addf %114, %116 : vector<16x64xf32>
    %cst_55 = arith.constant 0.000000e+00 : f32
    %118 = vector.broadcast %cst_55 : f32 to vector<16x64xf32>
    %119 = arith.maximumf %117, %118 : vector<16x64xf32>
    %c0_56 = arith.constant 0 : index
    %c0_57 = arith.constant 0 : index
    %120 = vector.load %arg19[%c0_56, %c0_57] : memref<64x32xf32, #tpu.memory_space<vmem>>, vector<64x32xf32>
    %cst_58 = arith.constant dense<0.000000e+00> : vector<16x32xf32>
    %121 = tpu.matmul %119, %120, %cst_58 {dimension_numbers = #tpu.dot_dimension_numbers<[1], [0], [0], [1], [0, 0, 1, 1], [], []>} : vector<16x64xf32>, vector<64x32xf32>, vector<16x32xf32> -> vector<16x32xf32>
    %c0_59 = arith.constant 0 : index
    %c0_60 = arith.constant 0 : index
    %122 = vector.load %arg20[%c0_59, %c0_60] : memref<1x32xf32, #tpu.memory_space<vmem>>, vector<1x32xf32>
    %123 = vector.broadcast %122 : vector<1x32xf32> to vector<16x32xf32>
    %124 = arith.addf %121, %123 : vector<16x32xf32>
    %125 = arith.addf %112, %124 : vector<16x32xf32>
    %c0_61 = arith.constant 0 : index
    %c0_62 = arith.constant 0 : index
    %126 = vector.load %arg21[%c0_61, %c0_62] : memref<1x32xf32, #tpu.memory_space<vmem>>, vector<1x32xf32>
    %c0_63 = arith.constant 0 : index
    %c0_64 = arith.constant 0 : index
    %127 = vector.load %arg22[%c0_63, %c0_64] : memref<1x32xf32, #tpu.memory_space<vmem>>, vector<1x32xf32>
    %cst_65 = arith.constant dense<0.000000e+00> : vector<16xf32>
    %128 = vector.multi_reduction <add>, %125, %cst_65 [1] : vector<16x32xf32> to vector<16xf32>
    %129 = vector.shape_cast %128 : vector<16xf32> to vector<16x1xf32>
    %cst_66 = arith.constant 3.200000e+01 : f32
    %130 = vector.broadcast %cst_66 : f32 to vector<16x1xf32>
    %131 = arith.divf %129, %130 : vector<16x1xf32>
    %132 = vector.broadcast %131 : vector<16x1xf32> to vector<16x32xf32>
    %133 = arith.subf %125, %132 : vector<16x32xf32>
    %134 = arith.mulf %133, %133 : vector<16x32xf32>
    %cst_67 = arith.constant dense<0.000000e+00> : vector<16xf32>
    %135 = vector.multi_reduction <add>, %134, %cst_67 [1] : vector<16x32xf32> to vector<16xf32>
    %136 = vector.shape_cast %135 : vector<16xf32> to vector<16x1xf32>
    %cst_68 = arith.constant 3.200000e+01 : f32
    %137 = vector.broadcast %cst_68 : f32 to vector<16x1xf32>
    %138 = arith.divf %136, %137 : vector<16x1xf32>
    %139 = vector.broadcast %131 : vector<16x1xf32> to vector<16x32xf32>
    %140 = arith.subf %125, %139 : vector<16x32xf32>
    %cst_69 = arith.constant 9.99999974E-6 : f32
    %141 = vector.broadcast %cst_69 : f32 to vector<16x1xf32>
    %142 = arith.addf %138, %141 : vector<16x1xf32>
    %143 = math.rsqrt %142 : vector<16x1xf32>
    %144 = vector.broadcast %143 : vector<16x1xf32> to vector<16x32xf32>
    %145 = arith.mulf %140, %144 : vector<16x32xf32>
    %146 = vector.broadcast %126 : vector<1x32xf32> to vector<16x32xf32>
    %147 = arith.mulf %145, %146 : vector<16x32xf32>
    %148 = vector.broadcast %127 : vector<1x32xf32> to vector<16x32xf32>
    %149 = arith.addf %147, %148 : vector<16x32xf32>
    %c0_70 = arith.constant 0 : index
    %c0_71 = arith.constant 0 : index
    %c0_72 = arith.constant 0 : index
    %c0_73 = arith.constant 0 : index
    %150 = vector.load %arg56[%c0_70, %c0_71, %c0_72, %c0_73] : memref<2x2x8x8xf32, #tpu.memory_space<vmem>>, vector<1x2x8x8xf32>
    %151 = vector.shape_cast %150 : vector<1x2x8x8xf32> to vector<2x8x8xf32>
    %152 = vector.shape_cast %56 : vector<2x8x8xf32> to vector<1x2x8x8xf32>
    tpu.vector_store %arg56[%c0_70, %c0_71, %c0_72, %c0_73], %152 {strides = array<i32>} : memref<2x2x8x8xf32, #tpu.memory_space<vmem>>, vector<1x2x8x8xf32>,
    %c1_74 = arith.constant 1 : index
    %c0_75 = arith.constant 0 : index
    %c0_76 = arith.constant 0 : index
    %c0_77 = arith.constant 0 : index
    %153 = vector.load %arg56[%c1_74, %c0_75, %c0_76, %c0_77] : memref<2x2x8x8xf32, #tpu.memory_space<vmem>>, vector<1x2x8x8xf32>
    %154 = vector.shape_cast %153 : vector<1x2x8x8xf32> to vector<2x8x8xf32>
    %155 = vector.shape_cast %79 : vector<2x8x8xf32> to vector<1x2x8x8xf32>
    tpu.vector_store %arg56[%c1_74, %c0_75, %c0_76, %c0_77], %155 {strides = array<i32>} : memref<2x2x8x8xf32, #tpu.memory_space<vmem>>, vector<1x2x8x8xf32>,
    %c0_78 = arith.constant 0 : index
    %c0_79 = arith.constant 0 : index
    %c0_80 = arith.constant 0 : index
    %156 = vector.load %arg5[%c0_78, %c0_79, %c0_80] : memref<2x8x4xf32, #tpu.memory_space<vmem>>, vector<2x8x4xf32>
    %157 = vector.shape_cast %156 : vector<2x8x4xf32> to vector<16x4xf32>
    %c0_81 = arith.constant 0 : index
    %c0_82 = arith.constant 0 : index
    %158 = vector.load %arg23[%c0_81, %c0_82] : memref<4x32xf32, #tpu.memory_space<vmem>>, vector<4x32xf32>
    %cst_83 = arith.constant dense<0.000000e+00> : vector<16x32xf32>
    %159 = tpu.matmul %157, %158, %cst_83 {dimension_numbers = #tpu.dot_dimension_numbers<[1], [0], [0], [1], [0, 0, 1, 1], [], []>} : vector<16x4xf32>, vector<4x32xf32>, vector<16x32xf32> -> vector<16x32xf32>
    %c0_84 = arith.constant 0 : index
    %c0_85 = arith.constant 0 : index
    %160 = vector.load %arg24[%c0_84, %c0_85] : memref<1x32xf32, #tpu.memory_space<vmem>>, vector<1x32xf32>
    %161 = vector.broadcast %160 : vector<1x32xf32> to vector<16x32xf32>
    %162 = arith.addf %159, %161 : vector<16x32xf32>
    %cst_86 = arith.constant 0.000000e+00 : f32
    %163 = vector.broadcast %cst_86 : f32 to vector<16x32xf32>
    %164 = arith.maximumf %162, %163 : vector<16x32xf32>
    %c0_87 = arith.constant 0 : index
    %c0_88 = arith.constant 0 : index
    %165 = vector.load %arg25[%c0_87, %c0_88] : memref<32x32xf32, #tpu.memory_space<vmem>>, vector<32x32xf32>
    %cst_89 = arith.constant dense<0.000000e+00> : vector<16x32xf32>
    %166 = tpu.matmul %164, %165, %cst_89 {dimension_numbers = #tpu.dot_dimension_numbers<[1], [0], [0], [1], [0, 0, 1, 1], [], []>} : vector<16x32xf32>, vector<32x32xf32>, vector<16x32xf32> -> vector<16x32xf32>
    %c0_90 = arith.constant 0 : index
    %c0_91 = arith.constant 0 : index
    %167 = vector.load %arg26[%c0_90, %c0_91] : memref<1x32xf32, #tpu.memory_space<vmem>>, vector<1x32xf32>
    %168 = vector.broadcast %167 : vector<1x32xf32> to vector<16x32xf32>
    %169 = arith.addf %166, %168 : vector<16x32xf32>
    %cst_92 = arith.constant 0.000000e+00 : f32
    %170 = vector.broadcast %cst_92 : f32 to vector<16x32xf32>
    %171 = arith.maximumf %169, %170 : vector<16x32xf32>
    %c0_93 = arith.constant 0 : index
    %c0_94 = arith.constant 0 : index
    %c0_95 = arith.constant 0 : index
    %172 = vector.load %arg6[%c0_93, %c0_94, %c0_95] : memref<2x8x32xf32, #tpu.memory_space<vmem>>, vector<2x8x32xf32>
    %173 = vector.shape_cast %172 : vector<2x8x32xf32> to vector<16x32xf32>
    %174 = vector.broadcast %1 : f32 to vector<16x32xf32>
    %175 = arith.mulf %174, %173 : vector<16x32xf32>
    %176 = arith.addf %171, %175 : vector<16x32xf32>
    %c0_96 = arith.constant 0 : index
    %c0_97 = arith.constant 0 : index
    %177 = vector.load %arg27[%c0_96, %c0_97] : memref<32x96xf32, #tpu.memory_space<vmem>>, vector<32x96xf32>
    %cst_98 = arith.constant dense<0.000000e+00> : vector<16x96xf32>
    %178 = tpu.matmul %176, %177, %cst_98 {dimension_numbers = #tpu.dot_dimension_numbers<[1], [0], [0], [1], [0, 0, 1, 1], [], []>} : vector<16x32xf32>, vector<32x96xf32>, vector<16x96xf32> -> vector<16x96xf32>
    %c0_99 = arith.constant 0 : index
    %c0_100 = arith.constant 0 : index
    %179 = vector.load %arg28[%c0_99, %c0_100] : memref<1x96xf32, #tpu.memory_space<vmem>>, vector<1x96xf32>
    %180 = vector.broadcast %179 : vector<1x96xf32> to vector<16x96xf32>
    %181 = arith.addf %178, %180 : vector<16x96xf32>
    %182 = vector.extract_strided_slice %181 {offsets = [0, 0], sizes = [16, 32], strides = [1, 1]} : vector<16x96xf32> to vector<16x32xf32>
    %183 = vector.shape_cast %182 : vector<16x32xf32> to vector<2x8x32xf32>
    %184 = vector.extract_strided_slice %181 {offsets = [0, 32], sizes = [16, 32], strides = [1, 1]} : vector<16x96xf32> to vector<16x32xf32>
    %185 = vector.shape_cast %184 : vector<16x32xf32> to vector<2x8x32xf32>
    %186 = vector.extract_strided_slice %181 {offsets = [0, 64], sizes = [16, 32], strides = [1, 1]} : vector<16x96xf32> to vector<16x32xf32>
    %187 = vector.shape_cast %186 : vector<16x32xf32> to vector<2x8x32xf32>
    %c0_101 = arith.constant 0 : index
    %c0_102 = arith.constant 0 : index
    %188 = vector.load %arg29[%c0_101, %c0_102] : memref<32x32xf32, #tpu.memory_space<vmem>>, vector<32x32xf32>
    %c0_103 = arith.constant 0 : index
    %c0_104 = arith.constant 0 : index
    %189 = vector.load %arg30[%c0_103, %c0_104] : memref<1x32xf32, #tpu.memory_space<vmem>>, vector<1x32xf32>
    %190 = vector.shape_cast %7 : vector<2x8xi1> to vector<2x1x8xi1>
    %191 = vector.shape_cast %190 : vector<2x1x8xi1> to vector<2x1x8xi1>
    %192 = vector.broadcast %191 : vector<2x1x8xi1> to vector<2x8x8xi1>
    %193 = tpu.iota {dimensions = array<i32: 0>} : vector<8x8xi32>
    %194 = tpu.iota {dimensions = array<i32: 1>} : vector<8x8xi32>
    %195 = arith.cmpi sge, %193, %194 : vector<8x8xi32>
    %196 = vector.shape_cast %195 : vector<8x8xi1> to vector<1x8x8xi1>
    %197 = vector.broadcast %196 : vector<1x8x8xi1> to vector<2x8x8xi1>
    %198 = arith.andi %192, %197 : vector<2x8x8xi1>
    %cst_105 = arith.constant 0.000000e+00 : f32
    %199 = vector.broadcast %cst_105 : f32 to vector<16x32xf32>
    %200 = vector.extract_strided_slice %183 {offsets = [0, 0, 0], sizes = [2, 8, 16], strides = [1, 1, 1]} : vector<2x8x32xf32> to vector<2x8x16xf32>
    %201 = vector.extract_strided_slice %185 {offsets = [0, 0, 0], sizes = [2, 8, 16], strides = [1, 1, 1]} : vector<2x8x32xf32> to vector<2x8x16xf32>
    "tpu.trace_start"() <{level = 10 : i32, message = "bqd,bkd->bqk"}> : () -> ()
    %cst_106 = arith.constant dense<0.000000e+00> : vector<2x8x8xf32>
    %202 = tpu.matmul %200, %201, %cst_106 {dimension_numbers = #tpu.dot_dimension_numbers<[2], [2], [1], [1], [0, 0, 0, 1, 1, 1], [0], [0]>} : vector<2x8x16xf32>, vector<2x8x16xf32>, vector<2x8x8xf32> -> vector<2x8x8xf32>
    "tpu.trace_stop"() : () -> ()
    %cst_107 = arith.constant 2.500000e-01 : f32
    %203 = vector.broadcast %cst_107 : f32 to vector<2x8x8xf32>
    %204 = arith.mulf %202, %203 : vector<2x8x8xf32>
    %cst_108 = arith.constant -1.000000e+09 : f32
    %205 = vector.broadcast %cst_108 : f32 to vector<2x8x8xf32>
    %206 = arith.select %198, %204, %205 : vector<2x8x8xi1>, vector<2x8x8xf32>
    %cst_109 = arith.constant dense<0xFF800000> : vector<2x8xf32>
    %207 = vector.multi_reduction <maximumf>, %206, %cst_109 [2] : vector<2x8x8xf32> to vector<2x8xf32>
    %208 = vector.shape_cast %207 : vector<2x8xf32> to vector<2x8x1xf32>
    %209 = vector.broadcast %208 : vector<2x8x1xf32> to vector<2x8x8xf32>
    %210 = arith.subf %206, %209 : vector<2x8x8xf32>
    %211 = math.exp %210 : vector<2x8x8xf32>
    %cst_110 = arith.constant dense<0.000000e+00> : vector<2x8xf32>
    %212 = vector.multi_reduction <add>, %211, %cst_110 [2] : vector<2x8x8xf32> to vector<2x8xf32>
    %213 = vector.shape_cast %212 : vector<2x8xf32> to vector<2x8x1xf32>
    %214 = tpu.reciprocal %213 {approx = true} : vector<2x8x1xf32> -> vector<2x8x1xf32>
    %215 = vector.broadcast %214 : vector<2x8x1xf32> to vector<2x8x8xf32>
    %216 = arith.mulf %211, %215 : vector<2x8x8xf32>
    %217 = vector.extract_strided_slice %187 {offsets = [0, 0, 0], sizes = [2, 8, 16], strides = [1, 1, 1]} : vector<2x8x32xf32> to vector<2x8x16xf32>
    "tpu.trace_start"() <{level = 10 : i32, message = "bqk,bkd->bqd"}> : () -> ()
    %cst_111 = arith.constant dense<0.000000e+00> : vector<2x8x16xf32>
    %218 = tpu.matmul %216, %217, %cst_111 {dimension_numbers = #tpu.dot_dimension_numbers<[2], [1], [1], [2], [0, 0, 0, 1, 1, 2], [0], [0]>} : vector<2x8x8xf32>, vector<2x8x16xf32>, vector<2x8x16xf32> -> vector<2x8x16xf32>
    "tpu.trace_stop"() : () -> ()
    %219 = vector.shape_cast %218 : vector<2x8x16xf32> to vector<16x16xf32>
    %220 = vector.extract_strided_slice %188 {offsets = [0, 0], sizes = [16, 32], strides = [1, 1]} : vector<32x32xf32> to vector<16x32xf32>
    %cst_112 = arith.constant dense<0.000000e+00> : vector<16x32xf32>
    %221 = tpu.matmul %219, %220, %cst_112 {dimension_numbers = #tpu.dot_dimension_numbers<[1], [0], [0], [1], [0, 0, 1, 1], [], []>} : vector<16x16xf32>, vector<16x32xf32>, vector<16x32xf32> -> vector<16x32xf32>
    %222 = arith.addf %199, %221 : vector<16x32xf32>
    %223 = vector.extract_strided_slice %183 {offsets = [0, 0, 16], sizes = [2, 8, 16], strides = [1, 1, 1]} : vector<2x8x32xf32> to vector<2x8x16xf32>
    %224 = vector.extract_strided_slice %185 {offsets = [0, 0, 16], sizes = [2, 8, 16], strides = [1, 1, 1]} : vector<2x8x32xf32> to vector<2x8x16xf32>
    "tpu.trace_start"() <{level = 10 : i32, message = "bqd,bkd->bqk"}> : () -> ()
    %cst_113 = arith.constant dense<0.000000e+00> : vector<2x8x8xf32>
    %225 = tpu.matmul %223, %224, %cst_113 {dimension_numbers = #tpu.dot_dimension_numbers<[2], [2], [1], [1], [0, 0, 0, 1, 1, 1], [0], [0]>} : vector<2x8x16xf32>, vector<2x8x16xf32>, vector<2x8x8xf32> -> vector<2x8x8xf32>
    "tpu.trace_stop"() : () -> ()
    %cst_114 = arith.constant 2.500000e-01 : f32
    %226 = vector.broadcast %cst_114 : f32 to vector<2x8x8xf32>
    %227 = arith.mulf %225, %226 : vector<2x8x8xf32>
    %cst_115 = arith.constant -1.000000e+09 : f32
    %228 = vector.broadcast %cst_115 : f32 to vector<2x8x8xf32>
    %229 = arith.select %198, %227, %228 : vector<2x8x8xi1>, vector<2x8x8xf32>
    %cst_116 = arith.constant dense<0xFF800000> : vector<2x8xf32>
    %230 = vector.multi_reduction <maximumf>, %229, %cst_116 [2] : vector<2x8x8xf32> to vector<2x8xf32>
    %231 = vector.shape_cast %230 : vector<2x8xf32> to vector<2x8x1xf32>
    %232 = vector.broadcast %231 : vector<2x8x1xf32> to vector<2x8x8xf32>
    %233 = arith.subf %229, %232 : vector<2x8x8xf32>
    %234 = math.exp %233 : vector<2x8x8xf32>
    %cst_117 = arith.constant dense<0.000000e+00> : vector<2x8xf32>
    %235 = vector.multi_reduction <add>, %234, %cst_117 [2] : vector<2x8x8xf32> to vector<2x8xf32>
    %236 = vector.shape_cast %235 : vector<2x8xf32> to vector<2x8x1xf32>
    %237 = tpu.reciprocal %236 {approx = true} : vector<2x8x1xf32> -> vector<2x8x1xf32>
    %238 = vector.broadcast %237 : vector<2x8x1xf32> to vector<2x8x8xf32>
    %239 = arith.mulf %234, %238 : vector<2x8x8xf32>
    %240 = vector.extract_strided_slice %187 {offsets = [0, 0, 16], sizes = [2, 8, 16], strides = [1, 1, 1]} : vector<2x8x32xf32> to vector<2x8x16xf32>
    "tpu.trace_start"() <{level = 10 : i32, message = "bqk,bkd->bqd"}> : () -> ()
    %cst_118 = arith.constant dense<0.000000e+00> : vector<2x8x16xf32>
    %241 = tpu.matmul %239, %240, %cst_118 {dimension_numbers = #tpu.dot_dimension_numbers<[2], [1], [1], [2], [0, 0, 0, 1, 1, 2], [0], [0]>} : vector<2x8x8xf32>, vector<2x8x16xf32>, vector<2x8x16xf32> -> vector<2x8x16xf32>
    "tpu.trace_stop"() : () -> ()
    %242 = vector.shape_cast %241 : vector<2x8x16xf32> to vector<16x16xf32>
    %243 = vector.extract_strided_slice %188 {offsets = [16, 0], sizes = [16, 32], strides = [1, 1]} : vector<32x32xf32> to vector<16x32xf32>
    %cst_119 = arith.constant dense<0.000000e+00> : vector<16x32xf32>
    %244 = tpu.matmul %242, %243, %cst_119 {dimension_numbers = #tpu.dot_dimension_numbers<[1], [0], [0], [1], [0, 0, 1, 1], [], []>} : vector<16x16xf32>, vector<16x32xf32>, vector<16x32xf32> -> vector<16x32xf32>
    %245 = arith.addf %222, %244 : vector<16x32xf32>
    %246 = vector.broadcast %189 : vector<1x32xf32> to vector<16x32xf32>
    %247 = arith.addf %245, %246 : vector<16x32xf32>
    %248 = arith.addf %176, %247 : vector<16x32xf32>
    %c0_120 = arith.constant 0 : index
    %c0_121 = arith.constant 0 : index
    %249 = vector.load %arg31[%c0_120, %c0_121] : memref<1x32xf32, #tpu.memory_space<vmem>>, vector<1x32xf32>
    %c0_122 = arith.constant 0 : index
    %c0_123 = arith.constant 0 : index
    %250 = vector.load %arg32[%c0_122, %c0_123] : memref<1x32xf32, #tpu.memory_space<vmem>>, vector<1x32xf32>
    %cst_124 = arith.constant dense<0.000000e+00> : vector<16xf32>
    %251 = vector.multi_reduction <add>, %248, %cst_124 [1] : vector<16x32xf32> to vector<16xf32>
    %252 = vector.shape_cast %251 : vector<16xf32> to vector<16x1xf32>
    %cst_125 = arith.constant 3.200000e+01 : f32
    %253 = vector.broadcast %cst_125 : f32 to vector<16x1xf32>
    %254 = arith.divf %252, %253 : vector<16x1xf32>
    %255 = vector.broadcast %254 : vector<16x1xf32> to vector<16x32xf32>
    %256 = arith.subf %248, %255 : vector<16x32xf32>
    %257 = arith.mulf %256, %256 : vector<16x32xf32>
    %cst_126 = arith.constant dense<0.000000e+00> : vector<16xf32>
    %258 = vector.multi_reduction <add>, %257, %cst_126 [1] : vector<16x32xf32> to vector<16xf32>
    %259 = vector.shape_cast %258 : vector<16xf32> to vector<16x1xf32>
    %cst_127 = arith.constant 3.200000e+01 : f32
    %260 = vector.broadcast %cst_127 : f32 to vector<16x1xf32>
    %261 = arith.divf %259, %260 : vector<16x1xf32>
    %262 = vector.broadcast %254 : vector<16x1xf32> to vector<16x32xf32>
    %263 = arith.subf %248, %262 : vector<16x32xf32>
    %cst_128 = arith.constant 9.99999974E-6 : f32
    %264 = vector.broadcast %cst_128 : f32 to vector<16x1xf32>
    %265 = arith.addf %261, %264 : vector<16x1xf32>
    %266 = math.rsqrt %265 : vector<16x1xf32>
    %267 = vector.broadcast %266 : vector<16x1xf32> to vector<16x32xf32>
    %268 = arith.mulf %263, %267 : vector<16x32xf32>
    %269 = vector.broadcast %249 : vector<1x32xf32> to vector<16x32xf32>
    %270 = arith.mulf %268, %269 : vector<16x32xf32>
    %271 = vector.broadcast %250 : vector<1x32xf32> to vector<16x32xf32>
    %272 = arith.addf %270, %271 : vector<16x32xf32>
    %c0_129 = arith.constant 0 : index
    %c0_130 = arith.constant 0 : index
    %273 = vector.load %arg33[%c0_129, %c0_130] : memref<32x32xf32, #tpu.memory_space<vmem>>, vector<32x32xf32>
    %cst_131 = arith.constant dense<0.000000e+00> : vector<16x32xf32>
    %274 = tpu.matmul %272, %273, %cst_131 {dimension_numbers = #tpu.dot_dimension_numbers<[1], [0], [0], [1], [0, 0, 1, 1], [], []>} : vector<16x32xf32>, vector<32x32xf32>, vector<16x32xf32> -> vector<16x32xf32>
    %c0_132 = arith.constant 0 : index
    %c0_133 = arith.constant 0 : index
    %275 = vector.load %arg34[%c0_132, %c0_133] : memref<1x32xf32, #tpu.memory_space<vmem>>, vector<1x32xf32>
    %276 = vector.broadcast %275 : vector<1x32xf32> to vector<16x32xf32>
    %277 = arith.addf %274, %276 : vector<16x32xf32>
    %c0_134 = arith.constant 0 : index
    %c0_135 = arith.constant 0 : index
    %278 = vector.load %arg35[%c0_134, %c0_135] : memref<32x64xf32, #tpu.memory_space<vmem>>, vector<32x64xf32>
    %cst_136 = arith.constant dense<0.000000e+00> : vector<16x64xf32>
    %279 = tpu.matmul %149, %278, %cst_136 {dimension_numbers = #tpu.dot_dimension_numbers<[1], [0], [0], [1], [0, 0, 1, 1], [], []>} : vector<16x32xf32>, vector<32x64xf32>, vector<16x64xf32> -> vector<16x64xf32>
    %c0_137 = arith.constant 0 : index
    %c0_138 = arith.constant 0 : index
    %280 = vector.load %arg36[%c0_137, %c0_138] : memref<1x64xf32, #tpu.memory_space<vmem>>, vector<1x64xf32>
    %281 = vector.broadcast %280 : vector<1x64xf32> to vector<16x64xf32>
    %282 = arith.addf %279, %281 : vector<16x64xf32>
    %283 = vector.shape_cast %277 : vector<16x32xf32> to vector<2x8x32xf32>
    %284 = vector.extract_strided_slice %282 {offsets = [0, 0], sizes = [16, 32], strides = [1, 1]} : vector<16x64xf32> to vector<16x32xf32>
    %285 = vector.shape_cast %284 : vector<16x32xf32> to vector<2x8x32xf32>
    %286 = vector.extract_strided_slice %282 {offsets = [0, 32], sizes = [16, 32], strides = [1, 1]} : vector<16x64xf32> to vector<16x32xf32>
    %287 = vector.shape_cast %286 : vector<16x32xf32> to vector<2x8x32xf32>
    %c0_139 = arith.constant 0 : index
    %c0_140 = arith.constant 0 : index
    %288 = vector.load %arg37[%c0_139, %c0_140] : memref<32x32xf32, #tpu.memory_space<vmem>>, vector<32x32xf32>
    %c0_141 = arith.constant 0 : index
    %c0_142 = arith.constant 0 : index
    %289 = vector.load %arg38[%c0_141, %c0_142] : memref<1x32xf32, #tpu.memory_space<vmem>>, vector<1x32xf32>
    %290 = vector.shape_cast %4 : vector<2x8xi1> to vector<2x1x8xi1>
    %291 = vector.shape_cast %290 : vector<2x1x8xi1> to vector<2x1x8xi1>
    %292 = vector.broadcast %291 : vector<2x1x8xi1> to vector<2x8x8xi1>
    %cst_143 = arith.constant 0.000000e+00 : f32
    %293 = vector.broadcast %cst_143 : f32 to vector<16x32xf32>
    %294 = vector.extract_strided_slice %283 {offsets = [0, 0, 0], sizes = [2, 8, 16], strides = [1, 1, 1]} : vector<2x8x32xf32> to vector<2x8x16xf32>
    %295 = vector.extract_strided_slice %285 {offsets = [0, 0, 0], sizes = [2, 8, 16], strides = [1, 1, 1]} : vector<2x8x32xf32> to vector<2x8x16xf32>
    "tpu.trace_start"() <{level = 10 : i32, message = "bqd,bkd->bqk"}> : () -> ()
    %cst_144 = arith.constant dense<0.000000e+00> : vector<2x8x8xf32>
    %296 = tpu.matmul %294, %295, %cst_144 {dimension_numbers = #tpu.dot_dimension_numbers<[2], [2], [1], [1], [0, 0, 0, 1, 1, 1], [0], [0]>} : vector<2x8x16xf32>, vector<2x8x16xf32>, vector<2x8x8xf32> -> vector<2x8x8xf32>
    "tpu.trace_stop"() : () -> ()
    %cst_145 = arith.constant 2.500000e-01 : f32
    %297 = vector.broadcast %cst_145 : f32 to vector<2x8x8xf32>
    %298 = arith.mulf %296, %297 : vector<2x8x8xf32>
    %cst_146 = arith.constant -1.000000e+09 : f32
    %299 = vector.broadcast %cst_146 : f32 to vector<2x8x8xf32>
    %300 = arith.select %292, %298, %299 : vector<2x8x8xi1>, vector<2x8x8xf32>
    %cst_147 = arith.constant dense<0xFF800000> : vector<2x8xf32>
    %301 = vector.multi_reduction <maximumf>, %300, %cst_147 [2] : vector<2x8x8xf32> to vector<2x8xf32>
    %302 = vector.shape_cast %301 : vector<2x8xf32> to vector<2x8x1xf32>
    %303 = vector.broadcast %302 : vector<2x8x1xf32> to vector<2x8x8xf32>
    %304 = arith.subf %300, %303 : vector<2x8x8xf32>
    %305 = math.exp %304 : vector<2x8x8xf32>
    %cst_148 = arith.constant dense<0.000000e+00> : vector<2x8xf32>
    %306 = vector.multi_reduction <add>, %305, %cst_148 [2] : vector<2x8x8xf32> to vector<2x8xf32>
    %307 = vector.shape_cast %306 : vector<2x8xf32> to vector<2x8x1xf32>
    %308 = tpu.reciprocal %307 {approx = true} : vector<2x8x1xf32> -> vector<2x8x1xf32>
    %309 = vector.broadcast %308 : vector<2x8x1xf32> to vector<2x8x8xf32>
    %310 = arith.mulf %305, %309 : vector<2x8x8xf32>
    %311 = vector.extract_strided_slice %287 {offsets = [0, 0, 0], sizes = [2, 8, 16], strides = [1, 1, 1]} : vector<2x8x32xf32> to vector<2x8x16xf32>
    "tpu.trace_start"() <{level = 10 : i32, message = "bqk,bkd->bqd"}> : () -> ()
    %cst_149 = arith.constant dense<0.000000e+00> : vector<2x8x16xf32>
    %312 = tpu.matmul %310, %311, %cst_149 {dimension_numbers = #tpu.dot_dimension_numbers<[2], [1], [1], [2], [0, 0, 0, 1, 1, 2], [0], [0]>} : vector<2x8x8xf32>, vector<2x8x16xf32>, vector<2x8x16xf32> -> vector<2x8x16xf32>
    "tpu.trace_stop"() : () -> ()
    %313 = vector.shape_cast %312 : vector<2x8x16xf32> to vector<16x16xf32>
    %314 = vector.extract_strided_slice %288 {offsets = [0, 0], sizes = [16, 32], strides = [1, 1]} : vector<32x32xf32> to vector<16x32xf32>
    %cst_150 = arith.constant dense<0.000000e+00> : vector<16x32xf32>
    %315 = tpu.matmul %313, %314, %cst_150 {dimension_numbers = #tpu.dot_dimension_numbers<[1], [0], [0], [1], [0, 0, 1, 1], [], []>} : vector<16x16xf32>, vector<16x32xf32>, vector<16x32xf32> -> vector<16x32xf32>
    %316 = arith.addf %293, %315 : vector<16x32xf32>
    %317 = vector.extract_strided_slice %283 {offsets = [0, 0, 16], sizes = [2, 8, 16], strides = [1, 1, 1]} : vector<2x8x32xf32> to vector<2x8x16xf32>
    %318 = vector.extract_strided_slice %285 {offsets = [0, 0, 16], sizes = [2, 8, 16], strides = [1, 1, 1]} : vector<2x8x32xf32> to vector<2x8x16xf32>
    "tpu.trace_start"() <{level = 10 : i32, message = "bqd,bkd->bqk"}> : () -> ()
    %cst_151 = arith.constant dense<0.000000e+00> : vector<2x8x8xf32>
    %319 = tpu.matmul %317, %318, %cst_151 {dimension_numbers = #tpu.dot_dimension_numbers<[2], [2], [1], [1], [0, 0, 0, 1, 1, 1], [0], [0]>} : vector<2x8x16xf32>, vector<2x8x16xf32>, vector<2x8x8xf32> -> vector<2x8x8xf32>
    "tpu.trace_stop"() : () -> ()
    %cst_152 = arith.constant 2.500000e-01 : f32
    %320 = vector.broadcast %cst_152 : f32 to vector<2x8x8xf32>
    %321 = arith.mulf %319, %320 : vector<2x8x8xf32>
    %cst_153 = arith.constant -1.000000e+09 : f32
    %322 = vector.broadcast %cst_153 : f32 to vector<2x8x8xf32>
    %323 = arith.select %292, %321, %322 : vector<2x8x8xi1>, vector<2x8x8xf32>
    %cst_154 = arith.constant dense<0xFF800000> : vector<2x8xf32>
    %324 = vector.multi_reduction <maximumf>, %323, %cst_154 [2] : vector<2x8x8xf32> to vector<2x8xf32>
    %325 = vector.shape_cast %324 : vector<2x8xf32> to vector<2x8x1xf32>
    %326 = vector.broadcast %325 : vector<2x8x1xf32> to vector<2x8x8xf32>
    %327 = arith.subf %323, %326 : vector<2x8x8xf32>
    %328 = math.exp %327 : vector<2x8x8xf32>
    %cst_155 = arith.constant dense<0.000000e+00> : vector<2x8xf32>
    %329 = vector.multi_reduction <add>, %328, %cst_155 [2] : vector<2x8x8xf32> to vector<2x8xf32>
    %330 = vector.shape_cast %329 : vector<2x8xf32> to vector<2x8x1xf32>
    %331 = tpu.reciprocal %330 {approx = true} : vector<2x8x1xf32> -> vector<2x8x1xf32>
    %332 = vector.broadcast %331 : vector<2x8x1xf32> to vector<2x8x8xf32>
    %333 = arith.mulf %328, %332 : vector<2x8x8xf32>
    %334 = vector.extract_strided_slice %287 {offsets = [0, 0, 16], sizes = [2, 8, 16], strides = [1, 1, 1]} : vector<2x8x32xf32> to vector<2x8x16xf32>
    "tpu.trace_start"() <{level = 10 : i32, message = "bqk,bkd->bqd"}> : () -> ()
    %cst_156 = arith.constant dense<0.000000e+00> : vector<2x8x16xf32>
    %335 = tpu.matmul %333, %334, %cst_156 {dimension_numbers = #tpu.dot_dimension_numbers<[2], [1], [1], [2], [0, 0, 0, 1, 1, 2], [0], [0]>} : vector<2x8x8xf32>, vector<2x8x16xf32>, vector<2x8x16xf32> -> vector<2x8x16xf32>
    "tpu.trace_stop"() : () -> ()
    %336 = vector.shape_cast %335 : vector<2x8x16xf32> to vector<16x16xf32>
    %337 = vector.extract_strided_slice %288 {offsets = [16, 0], sizes = [16, 32], strides = [1, 1]} : vector<32x32xf32> to vector<16x32xf32>
    %cst_157 = arith.constant dense<0.000000e+00> : vector<16x32xf32>
    %338 = tpu.matmul %336, %337, %cst_157 {dimension_numbers = #tpu.dot_dimension_numbers<[1], [0], [0], [1], [0, 0, 1, 1], [], []>} : vector<16x16xf32>, vector<16x32xf32>, vector<16x32xf32> -> vector<16x32xf32>
    %339 = arith.addf %316, %338 : vector<16x32xf32>
    %340 = vector.broadcast %289 : vector<1x32xf32> to vector<16x32xf32>
    %341 = arith.addf %339, %340 : vector<16x32xf32>
    %342 = arith.addf %272, %341 : vector<16x32xf32>
    %c0_158 = arith.constant 0 : index
    %c0_159 = arith.constant 0 : index
    %343 = vector.load %arg39[%c0_158, %c0_159] : memref<1x32xf32, #tpu.memory_space<vmem>>, vector<1x32xf32>
    %c0_160 = arith.constant 0 : index
    %c0_161 = arith.constant 0 : index
    %344 = vector.load %arg40[%c0_160, %c0_161] : memref<1x32xf32, #tpu.memory_space<vmem>>, vector<1x32xf32>
    %cst_162 = arith.constant dense<0.000000e+00> : vector<16xf32>
    %345 = vector.multi_reduction <add>, %342, %cst_162 [1] : vector<16x32xf32> to vector<16xf32>
    %346 = vector.shape_cast %345 : vector<16xf32> to vector<16x1xf32>
    %cst_163 = arith.constant 3.200000e+01 : f32
    %347 = vector.broadcast %cst_163 : f32 to vector<16x1xf32>
    %348 = arith.divf %346, %347 : vector<16x1xf32>
    %349 = vector.broadcast %348 : vector<16x1xf32> to vector<16x32xf32>
    %350 = arith.subf %342, %349 : vector<16x32xf32>
    %351 = arith.mulf %350, %350 : vector<16x32xf32>
    %cst_164 = arith.constant dense<0.000000e+00> : vector<16xf32>
    %352 = vector.multi_reduction <add>, %351, %cst_164 [1] : vector<16x32xf32> to vector<16xf32>
    %353 = vector.shape_cast %352 : vector<16xf32> to vector<16x1xf32>
    %cst_165 = arith.constant 3.200000e+01 : f32
    %354 = vector.broadcast %cst_165 : f32 to vector<16x1xf32>
    %355 = arith.divf %353, %354 : vector<16x1xf32>
    %356 = vector.broadcast %348 : vector<16x1xf32> to vector<16x32xf32>
    %357 = arith.subf %342, %356 : vector<16x32xf32>
    %cst_166 = arith.constant 9.99999974E-6 : f32
    %358 = vector.broadcast %cst_166 : f32 to vector<16x1xf32>
    %359 = arith.addf %355, %358 : vector<16x1xf32>
    %360 = math.rsqrt %359 : vector<16x1xf32>
    %361 = vector.broadcast %360 : vector<16x1xf32> to vector<16x32xf32>
    %362 = arith.mulf %357, %361 : vector<16x32xf32>
    %363 = vector.broadcast %343 : vector<1x32xf32> to vector<16x32xf32>
    %364 = arith.mulf %362, %363 : vector<16x32xf32>
    %365 = vector.broadcast %344 : vector<1x32xf32> to vector<16x32xf32>
    %366 = arith.addf %364, %365 : vector<16x32xf32>
    %c0_167 = arith.constant 0 : index
    %c0_168 = arith.constant 0 : index
    %367 = vector.load %arg41[%c0_167, %c0_168] : memref<32x64xf32, #tpu.memory_space<vmem>>, vector<32x64xf32>
    %cst_169 = arith.constant dense<0.000000e+00> : vector<16x64xf32>
    %368 = tpu.matmul %366, %367, %cst_169 {dimension_numbers = #tpu.dot_dimension_numbers<[1], [0], [0], [1], [0, 0, 1, 1], [], []>} : vector<16x32xf32>, vector<32x64xf32>, vector<16x64xf32> -> vector<16x64xf32>
    %c0_170 = arith.constant 0 : index
    %c0_171 = arith.constant 0 : index
    %369 = vector.load %arg42[%c0_170, %c0_171] : memref<1x64xf32, #tpu.memory_space<vmem>>, vector<1x64xf32>
    %370 = vector.broadcast %369 : vector<1x64xf32> to vector<16x64xf32>
    %371 = arith.addf %368, %370 : vector<16x64xf32>
    %cst_172 = arith.constant 0.000000e+00 : f32
    %372 = vector.broadcast %cst_172 : f32 to vector<16x64xf32>
    %373 = arith.maximumf %371, %372 : vector<16x64xf32>
    %c0_173 = arith.constant 0 : index
    %c0_174 = arith.constant 0 : index
    %374 = vector.load %arg43[%c0_173, %c0_174] : memref<64x32xf32, #tpu.memory_space<vmem>>, vector<64x32xf32>
    %cst_175 = arith.constant dense<0.000000e+00> : vector<16x32xf32>
    %375 = tpu.matmul %373, %374, %cst_175 {dimension_numbers = #tpu.dot_dimension_numbers<[1], [0], [0], [1], [0, 0, 1, 1], [], []>} : vector<16x64xf32>, vector<64x32xf32>, vector<16x32xf32> -> vector<16x32xf32>
    %c0_176 = arith.constant 0 : index
    %c0_177 = arith.constant 0 : index
    %376 = vector.load %arg44[%c0_176, %c0_177] : memref<1x32xf32, #tpu.memory_space<vmem>>, vector<1x32xf32>
    %377 = vector.broadcast %376 : vector<1x32xf32> to vector<16x32xf32>
    %378 = arith.addf %375, %377 : vector<16x32xf32>
    %379 = arith.addf %366, %378 : vector<16x32xf32>
    %c0_178 = arith.constant 0 : index
    %c0_179 = arith.constant 0 : index
    %380 = vector.load %arg45[%c0_178, %c0_179] : memref<1x32xf32, #tpu.memory_space<vmem>>, vector<1x32xf32>
    %c0_180 = arith.constant 0 : index
    %c0_181 = arith.constant 0 : index
    %381 = vector.load %arg46[%c0_180, %c0_181] : memref<1x32xf32, #tpu.memory_space<vmem>>, vector<1x32xf32>
    %cst_182 = arith.constant dense<0.000000e+00> : vector<16xf32>
    %382 = vector.multi_reduction <add>, %379, %cst_182 [1] : vector<16x32xf32> to vector<16xf32>
    %383 = vector.shape_cast %382 : vector<16xf32> to vector<16x1xf32>
    %cst_183 = arith.constant 3.200000e+01 : f32
    %384 = vector.broadcast %cst_183 : f32 to vector<16x1xf32>
    %385 = arith.divf %383, %384 : vector<16x1xf32>
    %386 = vector.broadcast %385 : vector<16x1xf32> to vector<16x32xf32>
    %387 = arith.subf %379, %386 : vector<16x32xf32>
    %388 = arith.mulf %387, %387 : vector<16x32xf32>
    %cst_184 = arith.constant dense<0.000000e+00> : vector<16xf32>
    %389 = vector.multi_reduction <add>, %388, %cst_184 [1] : vector<16x32xf32> to vector<16xf32>
    %390 = vector.shape_cast %389 : vector<16xf32> to vector<16x1xf32>
    %cst_185 = arith.constant 3.200000e+01 : f32
    %391 = vector.broadcast %cst_185 : f32 to vector<16x1xf32>
    %392 = arith.divf %390, %391 : vector<16x1xf32>
    %393 = vector.broadcast %385 : vector<16x1xf32> to vector<16x32xf32>
    %394 = arith.subf %379, %393 : vector<16x32xf32>
    %cst_186 = arith.constant 9.99999974E-6 : f32
    %395 = vector.broadcast %cst_186 : f32 to vector<16x1xf32>
    %396 = arith.addf %392, %395 : vector<16x1xf32>
    %397 = math.rsqrt %396 : vector<16x1xf32>
    %398 = vector.broadcast %397 : vector<16x1xf32> to vector<16x32xf32>
    %399 = arith.mulf %394, %398 : vector<16x32xf32>
    %400 = vector.broadcast %380 : vector<1x32xf32> to vector<16x32xf32>
    %401 = arith.mulf %399, %400 : vector<16x32xf32>
    %402 = vector.broadcast %381 : vector<1x32xf32> to vector<16x32xf32>
    %403 = arith.addf %401, %402 : vector<16x32xf32>
    %c0_187 = arith.constant 0 : index
    %c0_188 = arith.constant 0 : index
    %404 = vector.load %arg47[%c0_187, %c0_188] : memref<32x5xf32, #tpu.memory_space<vmem>>, vector<32x5xf32>
    %cst_189 = arith.constant dense<0.000000e+00> : vector<16x5xf32>
    %405 = tpu.matmul %403, %404, %cst_189 {dimension_numbers = #tpu.dot_dimension_numbers<[1], [0], [0], [1], [0, 0, 1, 1], [], []>} : vector<16x32xf32>, vector<32x5xf32>, vector<16x5xf32> -> vector<16x5xf32>
    %c0_190 = arith.constant 0 : index
    %c0_191 = arith.constant 0 : index
    %406 = vector.load %arg48[%c0_190, %c0_191] : memref<1x5xf32, #tpu.memory_space<vmem>>, vector<1x5xf32>
    %407 = vector.broadcast %406 : vector<1x5xf32> to vector<16x5xf32>
    %408 = arith.addf %405, %407 : vector<16x5xf32>
    %409 = vector.extract_strided_slice %408 {offsets = [0, 0], sizes = [16, 4], strides = [1, 1]} : vector<16x5xf32> to vector<16x4xf32>
    %410 = vector.extract_strided_slice %408 {offsets = [0, 4], sizes = [16, 1], strides = [1, 1]} : vector<16x5xf32> to vector<16x1xf32>
    %411 = arith.negf %410 : vector<16x1xf32>
    %412 = math.exp %411 : vector<16x1xf32>
    %cst_192 = arith.constant 1.000000e+00 : f32
    %413 = vector.broadcast %cst_192 : f32 to vector<16x1xf32>
    %414 = arith.addf %413, %412 : vector<16x1xf32>
    %415 = arith.divf %413, %414 : vector<16x1xf32>
    %c0_193 = arith.constant 0 : index
    %c0_194 = arith.constant 0 : index
    %416 = vector.load %arg49[%c0_193, %c0_194] : memref<20x16xf32, #tpu.memory_space<vmem>>, vector<20x16xf32>
    %c0_195 = arith.constant 0 : index
    %c0_196 = arith.constant 0 : index
    %417 = vector.load %arg51[%c0_195, %c0_196] : memref<80x4xf32, #tpu.memory_space<vmem>>, vector<80x4xf32>
    %418 = vector.shape_cast %409 : vector<16x4xf32> to vector<2x8x4xf32>
    %cst_197 = arith.constant 0.000000e+00 : f32
    %419 = vector.broadcast %cst_197 : f32 to vector<2x2x4xf32>
    %420 = tpu.concatenate %419, %418, %419 in 1 : vector<2x2x4xf32>, vector<2x8x4xf32>, vector<2x2x4xf32> -> vector<2x12x4xf32>
    %cst_198 = arith.constant 0.000000e+00 : f32
    %421 = vector.broadcast %cst_198 : f32 to vector<16x16xf32>
    %422 = vector.extract_strided_slice %420 {offsets = [0, 0, 0], sizes = [2, 8, 4], strides = [1, 1, 1]} : vector<2x12x4xf32> to vector<2x8x4xf32>
    %423 = vector.shape_cast %422 : vector<2x8x4xf32> to vector<16x4xf32>
    %424 = vector.extract_strided_slice %416 {offsets = [0, 0], sizes = [4, 16], strides = [1, 1]} : vector<20x16xf32> to vector<4x16xf32>
    %cst_199 = arith.constant dense<0.000000e+00> : vector<16x16xf32>
    %425 = tpu.matmul %423, %424, %cst_199 {dimension_numbers = #tpu.dot_dimension_numbers<[1], [0], [0], [1], [0, 0, 1, 1], [], []>} : vector<16x4xf32>, vector<4x16xf32>, vector<16x16xf32> -> vector<16x16xf32>
    %426 = arith.addf %421, %425 : vector<16x16xf32>
    %427 = vector.extract_strided_slice %420 {offsets = [0, 1, 0], sizes = [2, 8, 4], strides = [1, 1, 1]} : vector<2x12x4xf32> to vector<2x8x4xf32>
    %428 = vector.shape_cast %427 : vector<2x8x4xf32> to vector<16x4xf32>
    %429 = vector.extract_strided_slice %416 {offsets = [4, 0], sizes = [4, 16], strides = [1, 1]} : vector<20x16xf32> to vector<4x16xf32>
    %cst_200 = arith.constant dense<0.000000e+00> : vector<16x16xf32>
    %430 = tpu.matmul %428, %429, %cst_200 {dimension_numbers = #tpu.dot_dimension_numbers<[1], [0], [0], [1], [0, 0, 1, 1], [], []>} : vector<16x4xf32>, vector<4x16xf32>, vector<16x16xf32> -> vector<16x16xf32>
    %431 = arith.addf %426, %430 : vector<16x16xf32>
    %432 = vector.extract_strided_slice %420 {offsets = [0, 2, 0], sizes = [2, 8, 4], strides = [1, 1, 1]} : vector<2x12x4xf32> to vector<2x8x4xf32>
    %433 = vector.shape_cast %432 : vector<2x8x4xf32> to vector<16x4xf32>
    %434 = vector.extract_strided_slice %416 {offsets = [8, 0], sizes = [4, 16], strides = [1, 1]} : vector<20x16xf32> to vector<4x16xf32>
    %cst_201 = arith.constant dense<0.000000e+00> : vector<16x16xf32>
    %435 = tpu.matmul %433, %434, %cst_201 {dimension_numbers = #tpu.dot_dimension_numbers<[1], [0], [0], [1], [0, 0, 1, 1], [], []>} : vector<16x4xf32>, vector<4x16xf32>, vector<16x16xf32> -> vector<16x16xf32>
    %436 = arith.addf %431, %435 : vector<16x16xf32>
    %437 = vector.extract_strided_slice %420 {offsets = [0, 3, 0], sizes = [2, 8, 4], strides = [1, 1, 1]} : vector<2x12x4xf32> to vector<2x8x4xf32>
    %438 = vector.shape_cast %437 : vector<2x8x4xf32> to vector<16x4xf32>
    %439 = vector.extract_strided_slice %416 {offsets = [12, 0], sizes = [4, 16], strides = [1, 1]} : vector<20x16xf32> to vector<4x16xf32>
    %cst_202 = arith.constant dense<0.000000e+00> : vector<16x16xf32>
    %440 = tpu.matmul %438, %439, %cst_202 {dimension_numbers = #tpu.dot_dimension_numbers<[1], [0], [0], [1], [0, 0, 1, 1], [], []>} : vector<16x4xf32>, vector<4x16xf32>, vector<16x16xf32> -> vector<16x16xf32>
    %441 = arith.addf %436, %440 : vector<16x16xf32>
    %442 = vector.extract_strided_slice %420 {offsets = [0, 4, 0], sizes = [2, 8, 4], strides = [1, 1, 1]} : vector<2x12x4xf32> to vector<2x8x4xf32>
    %443 = vector.shape_cast %442 : vector<2x8x4xf32> to vector<16x4xf32>
    %444 = vector.extract_strided_slice %416 {offsets = [16, 0], sizes = [4, 16], strides = [1, 1]} : vector<20x16xf32> to vector<4x16xf32>
    %cst_203 = arith.constant dense<0.000000e+00> : vector<16x16xf32>
    %445 = tpu.matmul %443, %444, %cst_203 {dimension_numbers = #tpu.dot_dimension_numbers<[1], [0], [0], [1], [0, 0, 1, 1], [], []>} : vector<16x4xf32>, vector<4x16xf32>, vector<16x16xf32> -> vector<16x16xf32>
    %446 = arith.addf %441, %445 : vector<16x16xf32>
    %c0_204 = arith.constant 0 : index
    %c0_205 = arith.constant 0 : index
    %447 = vector.load %arg50[%c0_204, %c0_205] : memref<1x16xf32, #tpu.memory_space<vmem>>, vector<1x16xf32>
    %448 = vector.broadcast %447 : vector<1x16xf32> to vector<16x16xf32>
    %449 = arith.addf %446, %448 : vector<16x16xf32>
    %450 = math.tanh %449 : vector<16x16xf32>
    %451 = vector.shape_cast %450 : vector<16x16xf32> to vector<2x8x16xf32>
    %cst_206 = arith.constant 0.000000e+00 : f32
    %452 = vector.broadcast %cst_206 : f32 to vector<2x2x16xf32>
    %453 = tpu.concatenate %452, %451, %452 in 1 : vector<2x2x16xf32>, vector<2x8x16xf32>, vector<2x2x16xf32> -> vector<2x12x16xf32>
    %cst_207 = arith.constant 0.000000e+00 : f32
    %454 = vector.broadcast %cst_207 : f32 to vector<16x4xf32>
    %455 = vector.extract_strided_slice %453 {offsets = [0, 0, 0], sizes = [2, 8, 16], strides = [1, 1, 1]} : vector<2x12x16xf32> to vector<2x8x16xf32>
    %456 = vector.shape_cast %455 : vector<2x8x16xf32> to vector<16x16xf32>
    %457 = vector.extract_strided_slice %417 {offsets = [0, 0], sizes = [16, 4], strides = [1, 1]} : vector<80x4xf32> to vector<16x4xf32>
    %cst_208 = arith.constant dense<0.000000e+00> : vector<16x4xf32>
    %458 = tpu.matmul %456, %457, %cst_208 {dimension_numbers = #tpu.dot_dimension_numbers<[1], [0], [0], [1], [0, 0, 1, 1], [], []>} : vector<16x16xf32>, vector<16x4xf32>, vector<16x4xf32> -> vector<16x4xf32>
    %459 = arith.addf %454, %458 : vector<16x4xf32>
    %460 = vector.extract_strided_slice %453 {offsets = [0, 1, 0], sizes = [2, 8, 16], strides = [1, 1, 1]} : vector<2x12x16xf32> to vector<2x8x16xf32>
    %461 = vector.shape_cast %460 : vector<2x8x16xf32> to vector<16x16xf32>
    %462 = vector.extract_strided_slice %417 {offsets = [16, 0], sizes = [16, 4], strides = [1, 1]} : vector<80x4xf32> to vector<16x4xf32>
    %cst_209 = arith.constant dense<0.000000e+00> : vector<16x4xf32>
    %463 = tpu.matmul %461, %462, %cst_209 {dimension_numbers = #tpu.dot_dimension_numbers<[1], [0], [0], [1], [0, 0, 1, 1], [], []>} : vector<16x16xf32>, vector<16x4xf32>, vector<16x4xf32> -> vector<16x4xf32>
    %464 = arith.addf %459, %463 : vector<16x4xf32>
    %465 = vector.extract_strided_slice %453 {offsets = [0, 2, 0], sizes = [2, 8, 16], strides = [1, 1, 1]} : vector<2x12x16xf32> to vector<2x8x16xf32>
    %466 = vector.shape_cast %465 : vector<2x8x16xf32> to vector<16x16xf32>
    %467 = vector.extract_strided_slice %417 {offsets = [32, 0], sizes = [16, 4], strides = [1, 1]} : vector<80x4xf32> to vector<16x4xf32>
    %cst_210 = arith.constant dense<0.000000e+00> : vector<16x4xf32>
    %468 = tpu.matmul %466, %467, %cst_210 {dimension_numbers = #tpu.dot_dimension_numbers<[1], [0], [0], [1], [0, 0, 1, 1], [], []>} : vector<16x16xf32>, vector<16x4xf32>, vector<16x4xf32> -> vector<16x4xf32>
    %469 = arith.addf %464, %468 : vector<16x4xf32>
    %470 = vector.extract_strided_slice %453 {offsets = [0, 3, 0], sizes = [2, 8, 16], strides = [1, 1, 1]} : vector<2x12x16xf32> to vector<2x8x16xf32>
    %471 = vector.shape_cast %470 : vector<2x8x16xf32> to vector<16x16xf32>
    %472 = vector.extract_strided_slice %417 {offsets = [48, 0], sizes = [16, 4], strides = [1, 1]} : vector<80x4xf32> to vector<16x4xf32>
    %cst_211 = arith.constant dense<0.000000e+00> : vector<16x4xf32>
    %473 = tpu.matmul %471, %472, %cst_211 {dimension_numbers = #tpu.dot_dimension_numbers<[1], [0], [0], [1], [0, 0, 1, 1], [], []>} : vector<16x16xf32>, vector<16x4xf32>, vector<16x4xf32> -> vector<16x4xf32>
    %474 = arith.addf %469, %473 : vector<16x4xf32>
    %475 = vector.extract_strided_slice %453 {offsets = [0, 4, 0], sizes = [2, 8, 16], strides = [1, 1, 1]} : vector<2x12x16xf32> to vector<2x8x16xf32>
    %476 = vector.shape_cast %475 : vector<2x8x16xf32> to vector<16x16xf32>
    %477 = vector.extract_strided_slice %417 {offsets = [64, 0], sizes = [16, 4], strides = [1, 1]} : vector<80x4xf32> to vector<16x4xf32>
    %cst_212 = arith.constant dense<0.000000e+00> : vector<16x4xf32>
    %478 = tpu.matmul %476, %477, %cst_212 {dimension_numbers = #tpu.dot_dimension_numbers<[1], [0], [0], [1], [0, 0, 1, 1], [], []>} : vector<16x16xf32>, vector<16x4xf32>, vector<16x4xf32> -> vector<16x4xf32>
    %479 = arith.addf %474, %478 : vector<16x4xf32>
    %480 = arith.addf %409, %479 : vector<16x4xf32>
    %c0_213 = arith.constant 0 : index
    %c0_214 = arith.constant 0 : index
    %481 = vector.load %arg52[%c0_213, %c0_214] : memref<1x4xf32, #tpu.memory_space<vmem>>, vector<1x4xf32>
    %482 = vector.broadcast %481 : vector<1x4xf32> to vector<16x4xf32>
    %483 = arith.addf %480, %482 : vector<16x4xf32>
    %c0_215 = arith.constant 0 : index
    %c0_216 = arith.constant 0 : index
    %484 = vector.load %arg53[%c0_215, %c0_216] : memref<16x4xf32, #tpu.memory_space<vmem>>, vector<16x4xf32>
    tpu.vector_store %arg53[%c0_215, %c0_216], %409 {strides = array<i32>} : memref<16x4xf32, #tpu.memory_space<vmem>>, vector<16x4xf32>,
    %c0_217 = arith.constant 0 : index
    %c0_218 = arith.constant 0 : index
    %485 = vector.load %arg54[%c0_217, %c0_218] : memref<16x4xf32, #tpu.memory_space<vmem>>, vector<16x4xf32>
    tpu.vector_store %arg54[%c0_217, %c0_218], %483 {strides = array<i32>} : memref<16x4xf32, #tpu.memory_space<vmem>>, vector<16x4xf32>,
    %c0_219 = arith.constant 0 : index
    %c0_220 = arith.constant 0 : index
    %486 = vector.load %arg55[%c0_219, %c0_220] : memref<16x1xf32, #tpu.memory_space<vmem>>, vector<16x1xf32>
    tpu.vector_store %arg55[%c0_219, %c0_220], %415 {strides = array<i32>} : memref<16x1xf32, #tpu.memory_space<vmem>>, vector<16x1xf32>,
    %c0_221 = arith.constant 0 : index
    %c0_222 = arith.constant 0 : index
    %c0_223 = arith.constant 0 : index
    %c0_224 = arith.constant 0 : index
    %487 = vector.load %arg57[%c0_221, %c0_222, %c0_223, %c0_224] : memref<2x2x8x8xf32, #tpu.memory_space<vmem>>, vector<1x2x8x8xf32>
    %488 = vector.shape_cast %487 : vector<1x2x8x8xf32> to vector<2x8x8xf32>
    %489 = vector.shape_cast %216 : vector<2x8x8xf32> to vector<1x2x8x8xf32>
    tpu.vector_store %arg57[%c0_221, %c0_222, %c0_223, %c0_224], %489 {strides = array<i32>} : memref<2x2x8x8xf32, #tpu.memory_space<vmem>>, vector<1x2x8x8xf32>,
    %c1_225 = arith.constant 1 : index
    %c0_226 = arith.constant 0 : index
    %c0_227 = arith.constant 0 : index
    %c0_228 = arith.constant 0 : index
    %490 = vector.load %arg57[%c1_225, %c0_226, %c0_227, %c0_228] : memref<2x2x8x8xf32, #tpu.memory_space<vmem>>, vector<1x2x8x8xf32>
    %491 = vector.shape_cast %490 : vector<1x2x8x8xf32> to vector<2x8x8xf32>
    %492 = vector.shape_cast %239 : vector<2x8x8xf32> to vector<1x2x8x8xf32>
    tpu.vector_store %arg57[%c1_225, %c0_226, %c0_227, %c0_228], %492 {strides = array<i32>} : memref<2x2x8x8xf32, #tpu.memory_space<vmem>>, vector<1x2x8x8xf32>,
    %c0_229 = arith.constant 0 : index
    %c0_230 = arith.constant 0 : index
    %c0_231 = arith.constant 0 : index
    %c0_232 = arith.constant 0 : index
    %493 = vector.load %arg58[%c0_229, %c0_230, %c0_231, %c0_232] : memref<2x2x8x8xf32, #tpu.memory_space<vmem>>, vector<1x2x8x8xf32>
    %494 = vector.shape_cast %493 : vector<1x2x8x8xf32> to vector<2x8x8xf32>
    %495 = vector.shape_cast %310 : vector<2x8x8xf32> to vector<1x2x8x8xf32>
    tpu.vector_store %arg58[%c0_229, %c0_230, %c0_231, %c0_232], %495 {strides = array<i32>} : memref<2x2x8x8xf32, #tpu.memory_space<vmem>>, vector<1x2x8x8xf32>,
    %c1_233 = arith.constant 1 : index
    %c0_234 = arith.constant 0 : index
    %c0_235 = arith.constant 0 : index
    %c0_236 = arith.constant 0 : index
    %496 = vector.load %arg58[%c1_233, %c0_234, %c0_235, %c0_236] : memref<2x2x8x8xf32, #tpu.memory_space<vmem>>, vector<1x2x8x8xf32>
    %497 = vector.shape_cast %496 : vector<1x2x8x8xf32> to vector<2x8x8xf32>
    %498 = vector.shape_cast %333 : vector<2x8x8xf32> to vector<1x2x8x8xf32>
    tpu.vector_store %arg58[%c1_233, %c0_234, %c0_235, %c0_236], %498 {strides = array<i32>} : memref<2x2x8x8xf32, #tpu.memory_space<vmem>>, vector<1x2x8x8xf32>,
    return
  }
  func.func @transform_0(%arg0: i32) -> (i32, i32) {
    %c0_i32 = arith.constant 0 : i32
    %c0_i32_0 = arith.constant 0 : i32
    %c0_i32_1 = arith.constant 0 : i32
    return %c0_i32, %c0_i32_0 : i32, i32
  }
  func.func @transform_1(%arg0: i32) -> (i32, i32) {
    %c0_i32 = arith.constant 0 : i32
    %c0_i32_0 = arith.constant 0 : i32
    %c0_i32_1 = arith.constant 0 : i32
    return %c0_i32, %c0_i32_0 : i32, i32
  }
  func.func @transform_2(%arg0: i32) -> (i32, i32, i32) {
    %c0_i32 = arith.constant 0 : i32
    %c0_i32_0 = arith.constant 0 : i32
    %c0_i32_1 = arith.constant 0 : i32
    %c0_i32_2 = arith.constant 0 : i32
    return %c0_i32, %c0_i32_0, %c0_i32_1 : i32, i32, i32
  }
  func.func @transform_3(%arg0: i32) -> (i32, i32, i32) {
    %c0_i32 = arith.constant 0 : i32
    %c0_i32_0 = arith.constant 0 : i32
    %c0_i32_1 = arith.constant 0 : i32
    %c0_i32_2 = arith.constant 0 : i32
    return %c0_i32, %c0_i32_0, %c0_i32_1 : i32, i32, i32
  }
  func.func @transform_4(%arg0: i32) -> (i32, i32, i32) {
    %c0_i32 = arith.constant 0 : i32
    %c0_i32_0 = arith.constant 0 : i32
    %c0_i32_1 = arith.constant 0 : i32
    %c0_i32_2 = arith.constant 0 : i32
    return %c0_i32, %c0_i32_0, %c0_i32_1 : i32, i32, i32
  }
  func.func @transform_5(%arg0: i32) -> (i32, i32, i32) {
    %c0_i32 = arith.constant 0 : i32
    %c0_i32_0 = arith.constant 0 : i32
    %c0_i32_1 = arith.constant 0 : i32
    %c0_i32_2 = arith.constant 0 : i32
    return %c0_i32, %c0_i32_0, %c0_i32_1 : i32, i32, i32
  }
  func.func @transform_6(%arg0: i32) -> (i32, i32) {
    %c0_i32 = arith.constant 0 : i32
    %c0_i32_0 = arith.constant 0 : i32
    %c0_i32_1 = arith.constant 0 : i32
    return %c0_i32, %c0_i32_0 : i32, i32
  }
  func.func @transform_7(%arg0: i32) -> i32 {
    %c0_i32 = arith.constant 0 : i32
    %c0_i32_0 = arith.constant 0 : i32
    return %c0_i32 : i32
  }
  func.func @transform_8(%arg0: i32) -> (i32, i32) {
    %c0_i32 = arith.constant 0 : i32
    %c0_i32_0 = arith.constant 0 : i32
    %c0_i32_1 = arith.constant 0 : i32
    return %c0_i32, %c0_i32_0 : i32, i32
  }
  func.func @transform_9(%arg0: i32) -> (i32, i32) {
    %c0_i32 = arith.constant 0 : i32
    %c0_i32_0 = arith.constant 0 : i32
    %c0_i32_1 = arith.constant 0 : i32
    return %c0_i32, %c0_i32_0 : i32, i32
  }
  func.func @transform_10(%arg0: i32) -> (i32, i32) {
    %c0_i32 = arith.constant 0 : i32
    %c0_i32_0 = arith.constant 0 : i32
    %c0_i32_1 = arith.constant 0 : i32
    return %c0_i32, %c0_i32_0 : i32, i32
  }
  func.func @transform_11(%arg0: i32) -> (i32, i32) {
    %c0_i32 = arith.constant 0 : i32
    %c0_i32_0 = arith.constant 0 : i32
    %c0_i32_1 = arith.constant 0 : i32
    return %c0_i32, %c0_i32_0 : i32, i32
  }
  func.func @transform_12(%arg0: i32) -> (i32, i32) {
    %c0_i32 = arith.constant 0 : i32
    %c0_i32_0 = arith.constant 0 : i32
    %c0_i32_1 = arith.constant 0 : i32
    return %c0_i32, %c0_i32_0 : i32, i32
  }
  func.func @transform_13(%arg0: i32) -> (i32, i32) {
    %c0_i32 = arith.constant 0 : i32
    %c0_i32_0 = arith.constant 0 : i32
    %c0_i32_1 = arith.constant 0 : i32
    return %c0_i32, %c0_i32_0 : i32, i32
  }
  func.func @transform_14(%arg0: i32) -> (i32, i32) {
    %c0_i32 = arith.constant 0 : i32
    %c0_i32_0 = arith.constant 0 : i32
    %c0_i32_1 = arith.constant 0 : i32
    return %c0_i32, %c0_i32_0 : i32, i32
  }
  func.func @transform_15(%arg0: i32) -> (i32, i32) {
    %c0_i32 = arith.constant 0 : i32
    %c0_i32_0 = arith.constant 0 : i32
    %c0_i32_1 = arith.constant 0 : i32
    return %c0_i32, %c0_i32_0 : i32, i32
  }
  func.func @transform_16(%arg0: i32) -> (i32, i32) {
    %c0_i32 = arith.constant 0 : i32
    %c0_i32_0 = arith.constant 0 : i32
    %c0_i32_1 = arith.constant 0 : i32
    return %c0_i32, %c0_i32_0 : i32, i32
  }
  func.func @transform_17(%arg0: i32) -> (i32, i32) {
    %c0_i32 = arith.constant 0 : i32
    %c0_i32_0 = arith.constant 0 : i32
    %c0_i32_1 = arith.constant 0 : i32
    return %c0_i32, %c0_i32_0 : i32, i32
  }
  func.func @transform_18(%arg0: i32) -> (i32, i32) {
    %c0_i32 = arith.constant 0 : i32
    %c0_i32_0 = arith.constant 0 : i32
    %c0_i32_1 = arith.constant 0 : i32
    return %c0_i32, %c0_i32_0 : i32, i32
  }
  func.func @transform_19(%arg0: i32) -> (i32, i32) {
    %c0_i32 = arith.constant 0 : i32
    %c0_i32_0 = arith.constant 0 : i32
    %c0_i32_1 = arith.constant 0 : i32
    return %c0_i32, %c0_i32_0 : i32, i32
  }
  func.func @transform_20(%arg0: i32) -> (i32, i32) {
    %c0_i32 = arith.constant 0 : i32
    %c0_i32_0 = arith.constant 0 : i32
    %c0_i32_1 = arith.constant 0 : i32
    return %c0_i32, %c0_i32_0 : i32, i32
  }
  func.func @transform_21(%arg0: i32) -> (i32, i32) {
    %c0_i32 = arith.constant 0 : i32
    %c0_i32_0 = arith.constant 0 : i32
    %c0_i32_1 = arith.constant 0 : i32
    return %c0_i32, %c0_i32_0 : i32, i32
  }
  func.func @transform_22(%arg0: i32) -> (i32, i32) {
    %c0_i32 = arith.constant 0 : i32
    %c0_i32_0 = arith.constant 0 : i32
    %c0_i32_1 = arith.constant 0 : i32
    return %c0_i32, %c0_i32_0 : i32, i32
  }
  func.func @transform_23(%arg0: i32) -> (i32, i32) {
    %c0_i32 = arith.constant 0 : i32
    %c0_i32_0 = arith.constant 0 : i32
    %c0_i32_1 = arith.constant 0 : i32
    return %c0_i32, %c0_i32_0 : i32, i32
  }
  func.func @transform_24(%arg0: i32) -> (i32, i32) {
    %c0_i32 = arith.constant 0 : i32
    %c0_i32_0 = arith.constant 0 : i32
    %c0_i32_1 = arith.constant 0 : i32
    return %c0_i32, %c0_i32_0 : i32, i32
  }
  func.func @transform_25(%arg0: i32) -> (i32, i32) {
    %c0_i32 = arith.constant 0 : i32
    %c0_i32_0 = arith.constant 0 : i32
    %c0_i32_1 = arith.constant 0 : i32
    return %c0_i32, %c0_i32_0 : i32, i32
  }
  func.func @transform_26(%arg0: i32) -> (i32, i32) {
    %c0_i32 = arith.constant 0 : i32
    %c0_i32_0 = arith.constant 0 : i32
    %c0_i32_1 = arith.constant 0 : i32
    return %c0_i32, %c0_i32_0 : i32, i32
  }
  func.func @transform_27(%arg0: i32) -> (i32, i32) {
    %c0_i32 = arith.constant 0 : i32
    %c0_i32_0 = arith.constant 0 : i32
    %c0_i32_1 = arith.constant 0 : i32
    return %c0_i32, %c0_i32_0 : i32, i32
  }
  func.func @transform_28(%arg0: i32) -> (i32, i32) {
    %c0_i32 = arith.constant 0 : i32
    %c0_i32_0 = arith.constant 0 : i32
    %c0_i32_1 = arith.constant 0 : i32
    return %c0_i32, %c0_i32_0 : i32, i32
  }
  func.func @transform_29(%arg0: i32) -> (i32, i32) {
    %c0_i32 = arith.constant 0 : i32
    %c0_i32_0 = arith.constant 0 : i32
    %c0_i32_1 = arith.constant 0 : i32
    return %c0_i32, %c0_i32_0 : i32, i32
  }
  func.func @transform_30(%arg0: i32) -> (i32, i32) {
    %c0_i32 = arith.constant 0 : i32
    %c0_i32_0 = arith.constant 0 : i32
    %c0_i32_1 = arith.constant 0 : i32
    return %c0_i32, %c0_i32_0 : i32, i32
  }
  func.func @transform_31(%arg0: i32) -> (i32, i32) {
    %c0_i32 = arith.constant 0 : i32
    %c0_i32_0 = arith.constant 0 : i32
    %c0_i32_1 = arith.constant 0 : i32
    return %c0_i32, %c0_i32_0 : i32, i32
  }
  func.func @transform_32(%arg0: i32) -> (i32, i32) {
    %c0_i32 = arith.constant 0 : i32
    %c0_i32_0 = arith.constant 0 : i32
    %c0_i32_1 = arith.constant 0 : i32
    return %c0_i32, %c0_i32_0 : i32, i32
  }
  func.func @transform_33(%arg0: i32) -> (i32, i32) {
    %c0_i32 = arith.constant 0 : i32
    %c0_i32_0 = arith.constant 0 : i32
    %c0_i32_1 = arith.constant 0 : i32
    return %c0_i32, %c0_i32_0 : i32, i32
  }
  func.func @transform_34(%arg0: i32) -> (i32, i32) {
    %c0_i32 = arith.constant 0 : i32
    %c0_i32_0 = arith.constant 0 : i32
    %c0_i32_1 = arith.constant 0 : i32
    return %c0_i32, %c0_i32_0 : i32, i32
  }
  func.func @transform_35(%arg0: i32) -> (i32, i32) {
    %c0_i32 = arith.constant 0 : i32
    %c0_i32_0 = arith.constant 0 : i32
    %c0_i32_1 = arith.constant 0 : i32
    return %c0_i32, %c0_i32_0 : i32, i32
  }
  func.func @transform_36(%arg0: i32) -> (i32, i32) {
    %c0_i32 = arith.constant 0 : i32
    %c0_i32_0 = arith.constant 0 : i32
    %c0_i32_1 = arith.constant 0 : i32
    return %c0_i32, %c0_i32_0 : i32, i32
  }
  func.func @transform_37(%arg0: i32) -> (i32, i32) {
    %c0_i32 = arith.constant 0 : i32
    %c0_i32_0 = arith.constant 0 : i32
    %c0_i32_1 = arith.constant 0 : i32
    return %c0_i32, %c0_i32_0 : i32, i32
  }
  func.func @transform_38(%arg0: i32) -> (i32, i32) {
    %c0_i32 = arith.constant 0 : i32
    %c0_i32_0 = arith.constant 0 : i32
    %c0_i32_1 = arith.constant 0 : i32
    return %c0_i32, %c0_i32_0 : i32, i32
  }
  func.func @transform_39(%arg0: i32) -> (i32, i32) {
    %c0_i32 = arith.constant 0 : i32
    %c0_i32_0 = arith.constant 0 : i32
    %c0_i32_1 = arith.constant 0 : i32
    return %c0_i32, %c0_i32_0 : i32, i32
  }
  func.func @transform_40(%arg0: i32) -> (i32, i32) {
    %c0_i32 = arith.constant 0 : i32
    %c0_i32_0 = arith.constant 0 : i32
    %c0_i32_1 = arith.constant 0 : i32
    return %c0_i32, %c0_i32_0 : i32, i32
  }
  func.func @transform_41(%arg0: i32) -> (i32, i32) {
    %c0_i32 = arith.constant 0 : i32
    %c0_i32_0 = arith.constant 0 : i32
    %c0_i32_1 = arith.constant 0 : i32
    return %c0_i32, %c0_i32_0 : i32, i32
  }
  func.func @transform_42(%arg0: i32) -> (i32, i32) {
    %c0_i32 = arith.constant 0 : i32
    %c0_i32_0 = arith.constant 0 : i32
    %c0_i32_1 = arith.constant 0 : i32
    return %c0_i32, %c0_i32_0 : i32, i32
  }
  func.func @transform_43(%arg0: i32) -> (i32, i32) {
    %c0_i32 = arith.constant 0 : i32
    %c0_i32_0 = arith.constant 0 : i32
    %c0_i32_1 = arith.constant 0 : i32
    return %c0_i32, %c0_i32_0 : i32, i32
  }
  func.func @transform_44(%arg0: i32) -> (i32, i32) {
    %c0_i32 = arith.constant 0 : i32
    %c0_i32_0 = arith.constant 0 : i32
    %c0_i32_1 = arith.constant 0 : i32
    return %c0_i32, %c0_i32_0 : i32, i32
  }
  func.func @transform_45(%arg0: i32) -> (i32, i32) {
    %c0_i32 = arith.constant 0 : i32
    %c0_i32_0 = arith.constant 0 : i32
    %c0_i32_1 = arith.constant 0 : i32
    return %c0_i32, %c0_i32_0 : i32, i32
  }
  func.func @transform_46(%arg0: i32) -> (i32, i32) {
    %c0_i32 = arith.constant 0 : i32
    %c0_i32_0 = arith.constant 0 : i32
    %c0_i32_1 = arith.constant 0 : i32
    return %c0_i32, %c0_i32_0 : i32, i32
  }
  func.func @transform_47(%arg0: i32) -> (i32, i32) {
    %c0_i32 = arith.constant 0 : i32
    %c0_i32_0 = arith.constant 0 : i32
    %c0_i32_1 = arith.constant 0 : i32
    return %c0_i32, %c0_i32_0 : i32, i32
  }
  func.func @transform_48(%arg0: i32) -> (i32, i32) {
    %c0_i32 = arith.constant 0 : i32
    %c0_i32_0 = arith.constant 0 : i32
    %c0_i32_1 = arith.constant 0 : i32
    return %c0_i32, %c0_i32_0 : i32, i32
  }
  func.func @transform_49(%arg0: i32) -> (i32, i32) {
    %c0_i32 = arith.constant 0 : i32
    %c0_i32_0 = arith.constant 0 : i32
    %c0_i32_1 = arith.constant 0 : i32
    return %c0_i32, %c0_i32_0 : i32, i32
  }
  func.func @transform_50(%arg0: i32) -> (i32, i32) {
    %c0_i32 = arith.constant 0 : i32
    %c0_i32_0 = arith.constant 0 : i32
    %c0_i32_1 = arith.constant 0 : i32
    return %c0_i32, %c0_i32_0 : i32, i32
  }
  func.func @transform_51(%arg0: i32) -> (i32, i32) {
    %c0_i32 = arith.constant 0 : i32
    %c0_i32_0 = arith.constant 0 : i32
    %c0_i32_1 = arith.constant 0 : i32
    return %c0_i32, %c0_i32_0 : i32, i32
  }
  func.func @transform_52(%arg0: i32) -> (i32, i32) {
    %c0_i32 = arith.constant 0 : i32
    %c0_i32_0 = arith.constant 0 : i32
    %c0_i32_1 = arith.constant 0 : i32
    return %c0_i32, %c0_i32_0 : i32, i32
  }
  func.func @transform_53(%arg0: i32) -> (i32, i32) {
    %c0_i32 = arith.constant 0 : i32
    %c0_i32_0 = arith.constant 0 : i32
    %c0_i32_1 = arith.constant 0 : i32
    return %c0_i32, %c0_i32_0 : i32, i32
  }
  func.func @transform_54(%arg0: i32) -> (i32, i32) {
    %c0_i32 = arith.constant 0 : i32
    %c0_i32_0 = arith.constant 0 : i32
    %c0_i32_1 = arith.constant 0 : i32
    return %c0_i32, %c0_i32_0 : i32, i32
  }
  func.func @transform_55(%arg0: i32) -> (i32, i32, i32, i32) {
    %c0_i32 = arith.constant 0 : i32
    %c0_i32_0 = arith.constant 0 : i32
    %c0_i32_1 = arith.constant 0 : i32
    %c0_i32_2 = arith.constant 0 : i32
    %c0_i32_3 = arith.constant 0 : i32
    return %c0_i32, %c0_i32_0, %c0_i32_1, %c0_i32_2 : i32, i32, i32, i32
  }
  func.func @transform_56(%arg0: i32) -> (i32, i32, i32, i32) {
    %c0_i32 = arith.constant 0 : i32
    %c0_i32_0 = arith.constant 0 : i32
    %c0_i32_1 = arith.constant 0 : i32
    %c0_i32_2 = arith.constant 0 : i32
    %c0_i32_3 = arith.constant 0 : i32
    return %c0_i32, %c0_i32_0, %c0_i32_1, %c0_i32_2 : i32, i32, i32, i32
  }
  func.func @transform_57(%arg0: i32) -> (i32, i32, i32, i32) {
    %c0_i32 = arith.constant 0 : i32
    %c0_i32_0 = arith.constant 0 : i32
    %c0_i32_1 = arith.constant 0 : i32
    %c0_i32_2 = arith.constant 0 : i32
    %c0_i32_3 = arith.constant 0 : i32
    return %c0_i32, %c0_i32_0, %c0_i32_1, %c0_i32_2 : i32, i32, i32, i32
  }
}

</mosaic_0001>

<bundles_post_ra>
// kernel: transformer_tts_forward.1
= control target key start
LH: loop header
LB: loop body
LE: loop exit
PB: predicated region body
PF: predicated region fallthrough
CT: control target
= control target key end

     0   :  { %s6417_s6 = smov 1   ;;  %s6418_s10 = smov 2   ;;  %s7414_s0 = inlined_call_operand.smem [shape: u32[58], index: -1, kind: input, shape index: {}] }
   0x1   :  { %s6497_s5 = sld [smem:[%s7414_s0]]   ;;  %s6419_s14 = smov 3  }
   0x2   :  { %s6502_s9 = sld [smem:[%s7414_s0 + %s6417_s6]]   ;;  %s6420_s18 = smov 4  }
   0x3   :  { %s6507_s13 = sld [smem:[%s7414_s0 + %s6418_s10]]   ;;  %s6421_s22 = smov 5  }
   0x4   :  { %s6512_s17 = sld [smem:[%s7414_s0 + %s6419_s14]]   ;;  %s6422_s26 = smov 6  }
   0x5   :  { %s6517_s21 = sld [smem:[%s7414_s0 + %s6420_s18]]   ;;  %s6423_s30 = smov 7  }
   0x6   :  { %s6522_s25 = sld [smem:[%s7414_s0 + %s6421_s22]]   ;;  %s6424_s4 = smov 8  }
   0x7   :  { %s6527_s29 = sld [smem:[%s7414_s0 + %s6422_s26]]   ;;  %s6425_s10 = smov 9  }
   0x8   :  { %7432 = sst [smem:[#allocation12_spill]] %s6502_s9  ;;  %s6426_s15 = smov 10  }
   0x9   :  { %s6532_s3 = sld [smem:[%s7414_s0 + %s6423_s30]]   ;;  %s6427_s20 = smov 11  }
   0xa   :  { %s6537_s8 = sld [smem:[%s7414_s0 + %s6424_s4]]   ;;  %s6428_s26 = smov 12  }
   0xb   :  { %7433 = sst [smem:[#allocation13_spill]] %s6517_s21  ;;  %s6429_s1 = smov 13  }
   0xc   :  { %7434 = sst [smem:[#allocation14_spill]] %s6522_s25  ;;  %s6430_s7 = smov 14  }
   0xd   :  { %s6542_s14 = sld [smem:[%s7414_s0 + %s6425_s10]]   ;;  %s6432_s22 = smov 16  }
   0xe   :  { %s6547_s19 = sld [smem:[%s7414_s0 + %s6426_s15]]   ;;  %s6431_s15 = smov 15  }
   0xf   :  { %s6552_s24 = sld [smem:[%s7414_s0 + %s6427_s20]]   ;;  %s6433_s28 = smov 17  }
  0x10   :  { %s6557_s30 = sld [smem:[%s7414_s0 + %s6428_s26]]  }
  0x11   :  { %s6562_s6 = sld [smem:[%s7414_s0 + %s6429_s1]]  }
  0x12   :  { %s6567_s12 = sld [smem:[%s7414_s0 + %s6430_s7]]   ;;  %s6434_s7 = smov 18  }
  0x13   :  { %s6572_s20 = sld [smem:[%s7414_s0 + %s6431_s15]]   ;;  %s6435_s15 = smov 19  }
  0x14   :  { %s6577_s27 = sld [smem:[%s7414_s0 + %s6432_s22]]   ;;  %s6436_s22 = smov 20  }
  0x15   :  { %s6582_s4 = sld [smem:[%s7414_s0 + %s6433_s28]]   ;;  %s6437_s28 = smov 21  }
  0x16   :  { %s6587_s9 = sld [smem:[%s7414_s0 + %s6434_s7]]   ;;  %s6438_s7 = smov 22  }
  0x17   :  { %s6592_s25 = sld [smem:[%s7414_s0 + %s6435_s15]]   ;;  %s6439_s15 = smov 23  }
  0x18   :  { %7435 = sst [smem:[#allocation15_spill]] %s6567_s12 }
  0x19   :  { %7436 = sst [smem:[#allocation16_spill]] %s6572_s20 }
  0x1a   :  { %7437 = sst [smem:[#allocation17_spill]] %s6577_s27 }
  0x1b   :  { %7438 = sst [smem:[#allocation18_spill]] %s6582_s4 }
  0x1c   :  { %7439 = sst [smem:[#allocation19_spill]] %s6587_s9 }
  0x1d   :  { %7440 = sst [smem:[#allocation20_spill]] %s6592_s25 }
  0x1e   :  { %s6597_s21 = sld [smem:[%s7414_s0 + %s6436_s22]]   ;;  %s6440_s22 = smov 24  }
  0x1f   :  { %s6602_s4 = sld [smem:[%s7414_s0 + %s6437_s28]]   ;;  %s6441_s28 = smov 25  }
  0x20   :  { %s6607_s20 = sld [smem:[%s7414_s0 + %s6438_s7]]   ;;  %s6442_s7 = smov 26  }
  0x21   :  { %s6612_s25 = sld [smem:[%s7414_s0 + %s6439_s15]]   ;;  %s6443_s15 = smov 27  }
  0x22   :  { %s6627_s12 = sld [smem:[%s7414_s0 + %s6442_s7]]   ;;  %s6446_s7 = smov 30  }
  0x24   :  { %7441 = sst [smem:[#allocation21_spill]] %s6597_s21 }
  0x25   :  { %7442 = sst [smem:[#allocation22_spill]] %s6602_s4 }
  0x26   :  { %7443 = sst [smem:[#allocation23_spill]] %s6607_s20 }
  0x27   :  { %7444 = sst [smem:[#allocation24_spill]] %s6612_s25 }
  0x28   :  { %s6617_s21 = sld [smem:[%s7414_s0 + %s6440_s22]]   ;;  %s6444_s22 = smov 28  }
  0x29   :  { %s6622_s4 = sld [smem:[%s7414_s0 + %s6441_s28]]   ;;  %s6445_s28 = smov 29  }
  0x2a   :  { %7447 = sst [smem:[#allocation27_spill]] %s6627_s12 }
  0x2b   :  { %s6632_s25 = sld [smem:[%s7414_s0 + %s6443_s15]]   ;;  %s6447_s15 = smov 31  }
  0x2c   :  { %s6647_s12 = sld [smem:[%s7414_s0 + %s6446_s7]]   ;;  %s6450_s7 = smov 34  }
  0x2e   :  { %7445 = sst [smem:[#allocation25_spill]] %s6617_s21 }
  0x2f   :  { %7446 = sst [smem:[#allocation26_spill]] %s6622_s4 }
  0x30   :  { %s6637_s21 = sld [smem:[%s7414_s0 + %s6444_s22]]   ;;  %s6448_s22 = smov 32  }
  0x31   :  { %7448 = sst [smem:[#allocation28_spill]] %s6632_s25 }
  0x32   :  { %s6642_s4 = sld [smem:[%s7414_s0 + %s6445_s28]]   ;;  %s6449_s28 = smov 33  }
  0x33   :  { %7451 = sst [smem:[#allocation31_spill]] %s6647_s12 }
  0x34   :  { %s6652_s25 = sld [smem:[%s7414_s0 + %s6447_s15]]   ;;  %s6451_s15 = smov 35  }
  0x35   :  { %s6667_s12 = sld [smem:[%s7414_s0 + %s6450_s7]]   ;;  %s6454_s7 = smov 38  }
  0x36   :  { %7449 = sst [smem:[#allocation29_spill]] %s6637_s21 }
  0x37   :  { %s6657_s21 = sld [smem:[%s7414_s0 + %s6448_s22]]   ;;  %s6452_s22 = smov 36  }
  0x38   :  { %7450 = sst [smem:[#allocation30_spill]] %s6642_s4 }
  0x39   :  { %s6662_s4 = sld [smem:[%s7414_s0 + %s6449_s28]]   ;;  %s6453_s28 = smov 37  }
  0x3a   :  { %7452 = sst [smem:[#allocation32_spill]] %s6652_s25 }
  0x3b   :  { %7455 = sst [smem:[#allocation35_spill]] %s6667_s12 }
  0x3c   :  { %s6672_s25 = sld [smem:[%s7414_s0 + %s6451_s15]]   ;;  %s6455_s15 = smov 39  }
  0x3d   :  { %7453 = sst [smem:[#allocation33_spill]] %s6657_s21 }
  0x3e   :  { %s6677_s21 = sld [smem:[%s7414_s0 + %s6452_s22]]   ;;  %s6456_s22 = smov 40  }
  0x3f   :  { %7454 = sst [smem:[#allocation34_spill]] %s6662_s4 }
  0x40   :  { %s6682_s4 = sld [smem:[%s7414_s0 + %s6453_s28]]   ;;  %s6457_s28 = smov 41  }
  0x41   :  { %s6687_s12 = sld [smem:[%s7414_s0 + %s6454_s7]]   ;;  %s6458_s7 = smov 42  }
  0x42   :  { %7456 = sst [smem:[#allocation36_spill]] %s6672_s25 }
  0x43   :  { %s6692_s25 = sld [smem:[%s7414_s0 + %s6455_s15]]   ;;  %s6459_s15 = smov 43  }
  0x44   :  { %7457 = sst [smem:[#allocation37_spill]] %s6677_s21 }
  0x45   :  { %s6697_s21 = sld [smem:[%s7414_s0 + %s6456_s22]]   ;;  %s6460_s22 = smov 44  }
  0x46   :  { %7458 = sst [smem:[#allocation38_spill]] %s6682_s4 }
  0x47   :  { %7459 = sst [smem:[#allocation39_spill]] %s6687_s12 }
  0x48   :  { %s6702_s4 = sld [smem:[%s7414_s0 + %s6457_s28]]   ;;  %s6461_s28 = smov 45  }
  0x49   :  { %7460 = sst [smem:[#allocation40_spill]] %s6692_s25 }
  0x4a   :  { %s6707_s12 = sld [smem:[%s7414_s0 + %s6458_s7]]   ;;  %s6462_s7 = smov 46  }
  0x4b   :  { %7461 = sst [smem:[#allocation41_spill]] %s6697_s21 }
  0x4c   :  { %s6712_s25 = sld [smem:[%s7414_s0 + %s6459_s15]]   ;;  %s6463_s15 = smov 47  }
  0x4d   :  { %s6717_s21 = sld [smem:[%s7414_s0 + %s6460_s22]]   ;;  %s6464_s22 = smov 48  }
  0x4e   :  { %7462 = sst [smem:[#allocation42_spill]] %s6702_s4 }
  0x4f   :  { %s6722_s4 = sld [smem:[%s7414_s0 + %s6461_s28]]   ;;  %s6465_s28 = smov 49  }
  0x50   :  { %7463 = sst [smem:[#allocation43_spill]] %s6707_s12 }
  0x51   :  { %s6727_s12 = sld [smem:[%s7414_s0 + %s6462_s7]]   ;;  %s6466_s7 = smov 50  }
  0x52   :  { %7464 = sst [smem:[#allocation44_spill]] %s6712_s25 }
  0x53   :  { %7465 = sst [smem:[#allocation45_spill]] %s6717_s21 }
  0x54   :  { %s6732_s25 = sld [smem:[%s7414_s0 + %s6463_s15]]   ;;  %s6467_s15 = smov 51  }
  0x55   :  { %7466 = sst [smem:[#allocation46_spill]] %s6722_s4 }
  0x56   :  { %s6737_s21 = sld [smem:[%s7414_s0 + %s6464_s22]]   ;;  %s6468_s22 = smov 52  }
  0x57   :  { %7467 = sst [smem:[#allocation47_spill]] %s6727_s12 }
  0x58   :  { %s6742_s4 = sld [smem:[%s7414_s0 + %s6465_s28]]   ;;  %s6469_s28 = smov 53  }
  0x59   :  { %s6747_s12 = sld [smem:[%s7414_s0 + %s6466_s7]]   ;;  %s6470_s7 = smov 54  }
  0x5a   :  { %s6752_s9 = sld [smem:[%s7414_s0 + %s6467_s15]]   ;;  %s6471_s15 = smov 55  }
  0x5b   :  { %s6762_s20 = sld [smem:[%s7414_s0 + %s6469_s28]]   ;;  %s6473_s28 = smov 57  }
  0x5c   :  { %7468 = sst [smem:[#allocation48_spill]] %s6737_s21 }
  0x5d   :  { %s6757_s21 = sld [smem:[%s7414_s0 + %s6468_s22]]   ;;  %s6472_s22 = smov 56  }
  0x5e   :  { %s6772_s27 = sld [smem:[%s7414_s0 + %s6471_s15]]  }
  0x5f   :  { %7469 = sst [smem:[#allocation49_spill]] %s6747_s12 }
  0x60   :  { %s6767_s12 = sld [smem:[%s7414_s0 + %s6470_s7]]  }
  0x61   :  { %7471 = sst [smem:[#allocation51_spill]] %s6762_s20 }
  0x62   :  { %s6782_s20 = sld [smem:[%s7414_s0 + %s6473_s28]]  }
  0x63   :  { %7470 = sst [smem:[#allocation50_spill]] %s6757_s21 }
  0x64   :  { %s6777_s21 = sld [smem:[%s7414_s0 + %s6472_s22]]  }
  0x65   :  { %121 = vsyncpa [#allocation4], 0 }
  0x66   :  { %122 = vsyncpa [#allocation3], 0 }
  0x67   :  { %123 = vsyncpa [#allocation7], 0  ;;  %s144_s7 = sshll.u32 %s6532_s3, 4  ;;  %s6474_s10 = smov [#allocation6]   ;;  %s145_s7 = int_to_ptr.vmem [resolvable:$true] %s144_s7 }
  0x68   :  { %s244_s11 = sshll.u32 %s6474_s10, 4  ;;  %s6333_s15 = scalar_lea.hbm %s6742_s4, 16  ;;  %s245_s11 = int_to_ptr.vmem [resolvable:$true] %s244_s11 }
  0x69   :  { %p6334_p0 = scmp.ne.s32.totalorder %s6742_s4, %s6333_s15  ;;  %p6337_p1 = scmp.lt.u32.totalorder %s6333_s15, %s6742_s4 }
  0x6b   :  { %p6339_p2 = pnand %p6337_p1, %p6334_p0 }
  0x6d   :  { %6342 = shalt.err (!%p6339_p2)
}
  0x6e   :  { %s6343_s16 = scalar_lea.vmem %s245_s11, 16  ;;  %s6347_s0 = scalar_lea.vmem %s245_s11, 32 }
  0x6f   :  { %p6344_p3 = scmp.ne.s32.totalorder %s245_s11, %s6343_s16  ;;  %p6348_p4 = scmp.lt.s32.totalorder %s245_s11, %s245_s11 }
  0x70   :  { %p6349_p5 = scmp.lt.s32.totalorder %s6347_s0, %s6343_s16 }
  0x72   :  { %p6350_p6 = por %p6349_p5, %p6348_p4 }
  0x74   :  { %p6351_p7 = pnand %p6350_p6, %p6344_p3 }
  0x76   :  { %6354 = shalt.err (!%p6351_p7)
}
  0x77   :  { %247 = dma.hbm_to_vmem [thread:$0]  %s6742_s4, 16, %s245_s11, [#allocation7]  }
  0x78   :  { %s6355_s3 = scalar_lea.vmem %s145_s7, 16  ;;  %p6360_p9 = scmp.lt.s32.totalorder %s145_s7, %s145_s7 }
  0x79   :  { %p6356_p8 = scmp.ne.s32.totalorder %s145_s7, %s6355_s3  ;;  %p6361_p10 = scmp.lt.s32.totalorder %s6355_s3, %s6355_s3 }
  0x7b   :  { %p6362_p11 = por %p6361_p10, %p6360_p9 }
  0x7d   :  { %p6363_p12 = pnand %p6362_p11, %p6356_p8 }
  0x7f   :  { %6366 = shalt.err (!%p6363_p12)
}
  0x80   :  { %s6475_s18 = smov [#allocation2]   ;;  %s6476_s22 = smov [#allocation5]  }
  0x81   :  { %147 = dma.vmem_to_smem %s145_s7, 16, %s6475_s18, [#allocation4]  }
  0x82   :  { %s232_s23 = sshll.u32 %s6476_s22, 4  ;;  %s6477_s26 = smov [#allocation8]   ;;  %s233_s23 = int_to_ptr.vmem [resolvable:$true] %s232_s23 }
  0x83   :  { %s256_s28 = sshll.u32 %s6477_s26, 4  ;;  %s6367_s1 = scalar_lea.hbm %s6732_s25, 16  ;;  %s257_s28 = int_to_ptr.vmem [resolvable:$true] %s256_s28 }
  0x84   :  { %p6368_p13 = scmp.ne.s32.totalorder %s6732_s25, %s6367_s1  ;;  %p6371_p0 = scmp.lt.u32.totalorder %s6367_s1, %s6732_s25 }
  0x86   :  { %p6373_p1 = pnand %p6371_p0, %p6368_p13 }
  0x88   :  { %6376 = shalt.err (!%p6373_p1)
}
  0x89   :  { %s6377_s4 = scalar_lea.vmem %s233_s23, 16  ;;  %s6381_s2 = scalar_lea.vmem %s233_s23, 32 }
  0x8a   :  { %p6378_p2 = scmp.ne.s32.totalorder %s233_s23, %s6377_s4  ;;  %p6382_p3 = scmp.lt.s32.totalorder %s233_s23, %s233_s23 }
  0x8b   :  { %p6383_p4 = scmp.lt.s32.totalorder %s6381_s2, %s6377_s4 }
  0x8d   :  { %p6384_p5 = por %p6383_p4, %p6382_p3 }
  0x8f   :  { %p6385_p6 = pnand %p6384_p5, %p6378_p2 }
  0x91   :  { %6388 = shalt.err (!%p6385_p6)
}
  0x92   :  { %235 = dma.hbm_to_vmem [thread:$0]  %s6732_s25, 16, %s233_s23, [#allocation3]  }
  0x93   :  { %s6389_s7 = scalar_lea.hbm %s6752_s9, 16 }
  0x94   :  { %p6390_p7 = scmp.ne.s32.totalorder %s6752_s9, %s6389_s7  ;;  %p6393_p8 = scmp.lt.u32.totalorder %s6389_s7, %s6752_s9 }
  0x96   :  { %p6395_p9 = pnand %p6393_p8, %p6390_p7 }
  0x98   :  { %6398 = shalt.err (!%p6395_p9)
}
  0x99   :  { %s6399_s10 = scalar_lea.vmem %s257_s28, 16  ;;  %s6403_s11 = scalar_lea.vmem %s257_s28, 32 }
  0x9a   :  { %p6400_p10 = scmp.ne.s32.totalorder %s257_s28, %s6399_s10  ;;  %p6404_p11 = scmp.lt.s32.totalorder %s257_s28, %s257_s28 }
  0x9b   :  { %p6405_p12 = scmp.lt.s32.totalorder %s6403_s11, %s6399_s10 }
  0x9d   :  { %p6406_p13 = por %p6405_p12, %p6404_p11 }
  0x9f   :  { %p6407_p0 = pnand %p6406_p13, %p6400_p10 }
  0xa1   :  { %6410 = shalt.err (!%p6407_p0)
}
  0xa2   :  { %259 = dma.hbm_to_vmem [thread:$0]  %s6752_s9, 16, %s257_s28, [#allocation7]  }
  0xa3   :  { %6411 = dma.done.wait [#allocation4], 16  }
  0xa4   :  { %6412 = vsyncadd [#allocation4], 4294967280 }
  0xa5   :  { %6413 = dma.done.wait [#allocation3], 16  }
  0xa6   :  { %6414 = vsyncadd [#allocation3], 4294967280 }
  0xa7   :  { %6415 = dma.done.wait [#allocation7], 32  }
  0xa8   :  { %6416 = vsyncadd [#allocation7], 4294967264 }
  0xa9   :  { %272 = sfence }
  0xaa   :  { %v280_v0 = vld [vmem:[%s6537_s8] sm:$0xff]  ;;  %v281_v1 = vld [vmem:[%s6537_s8 + $0x8] sm:$0xff]  ;;  %v6478_v2 = vmov 0.0|0.0   ;;  %vm6479_vm0 = vmmov 0   ;;  %v6480_v4 = vmov 0.0   ;;  %vm289_vm1 = vcmask 130048  }
  0xab   :  { %6016 = vmatprep.subr.bf16.mxu1 %v6478_v2  ;;  %v6017_v3 = vpack.c.bf16 %v281_v1, %v280_v0  ;;  %5660 = vmatprep.mubr.msk.f32.mxu1 %vm6479_vm0, %v6480_v4  ;;  %v279_v5 = vld [vmem:[%s6527_s29] sm:$0x3]  ;;  %v408_v7 = vld [vmem:[%s6547_s19 + $0x8] sm:$0xff]  ;;  %v409_v9 = vld [vmem:[%s6547_s19 + $0x10] sm:$0xff]  ;;  %s273_s9 = sld [smem:[#allocation2]]  ;;  %v376_v14 = vlaneseq  ;;  %vm418_vm2 = vcmask 261120  }
  0xac   :  { %5674 = vmatprep.subr.mxu0 %v6480_v4  ;;  %5676 = vmatprep.mubr.msk.f32.mxu0 %vm6479_vm0, %v6480_v4  ;;  %v407_v6 = vld [vmem:[%s6547_s19] sm:$0xff]  ;;  %v410_v10 = vld [vmem:[%s6547_s19 + $0x18] sm:$0xff]  ;;  %v6481_v12 = vmov 1966171168   ;;  %v366_v22 = vld [vmem:[%s6512_s17 + $0x8] sm:$0xff]  ;;  %v6483_v48 = vmov 0  }
  0xad   :  { %6018 = vmatpush3.bf16.msra.mxu1 %v6017_v3  ;;  %v6019_v8 = vpack.c.bf16 %v408_v7, %v407_v6  ;;  %v6023_v11 = vpack.c.bf16 %v410_v10, %v409_v9  ;;  %v374_v13 = vunpack.c.l.s4 %v6481_v12  ;;  %v6812_v16 = vshrl.u32 %v376_v14, 7  ;;  %v5343_v17 = vld [vmem:[%s6542_s14] ss:$0 sm:$0xff]  ;;  %v364_v30 = vld [vmem:[%s6507_s13 + $0x8] sm:$0xff]  ;;  %s6486_s25 = smov 112   ;;  %s6487_s29 = smov 48  }
  0xae   :  { %v365_v19 = vld [vmem:[%s6512_s17] sm:$0xff]  ;;  %vm700_vm7 = vcmask 64512   ;;  %s6485_s17 = smov 80   ;;  %s7476_s8 = sld [smem:[#allocation17_spill]]  ;;  %vm1685_vm9 = vcmask 1043456   ;;  %vm1678_vm10 = vcmask 31744  }
  0xaf   :  { %6020 = vmatprep.subr.bf16.mxu1 %v6019_v8  ;;  %v375_v15 = vunpack.c.0.s8 %v374_v13  ;;  %v363_v26 = vld [vmem:[%s6507_s13] sm:$0xff]  ;;  %v6823_v29 = vsub.s32 0, %v6812_v16  ;;  %s6482_s13 = smov 96   ;;  %s7477_s14 = sld [smem:[#allocation23_spill]]  ;;  %vm1535_vm11 = vcmask 523264  }
  0xb0   :  { %5661 = vmatmul.mubr.msk.f32.vlgmr.msra.gmra.mrb[0].mxu1 %vm289_vm1, %v279_v5  ;;  %v5345_v40 = vld [vmem:[%s6552_s24] ss:$0 sm:$0xff]  ;;  %s7478_s19 = sld [smem:[#allocation19_spill]]  ;;  %s7479_s24 = sld [smem:[#allocation15_spill]] }
  0xb1   :  { %6022 = vmatpush3.bf16.msra.mxu1 %v6019_v8  ;;  %v367_v18 = vstv %s273_s9  ;;  %v6817_v20 = vsub.s32 %v375_v15, %v6812_v16  ;;  %v275_v47 = vld [vmem:[%s6497_s5] sm:$0x3]  ;;  %s6484_s5 = smov 64   ;;  %s7483_s15 = sld [smem:[#allocation18_spill]] }
  0xb2   :  { %6024 = vmatprep.subr.bf16.mxu1 %v6023_v11  ;;  %v368_v25 = vmul.f32 %v367_v18, %v365_v19  ;;  %v369_v27 = vmul.f32 %v367_v18, %v366_v22  ;;  %vm276_vm3 = vcmp.ne.s32.totalorder %v275_v47, 0  ;;  %s7484_s16 = sld [smem:[#allocation24_spill]]  ;;  %s7485_s0 = sld [smem:[#allocation27_spill]] }
  0xb3   :  { %v505_v49 = vsel %vm276_vm3, 1, %v6483_v48  ;;  %s7486_s3 = sld [smem:[#allocation20_spill]]  ;;  %s7487_s18 = sld [smem:[#allocation26_spill]] }
  0xb4   :  { %v370_v33 = vadd.f32 %v368_v25, %v363_v26  ;;  %v371_v34 = vadd.f32 %v369_v27, %v364_v30  ;;  %v512_v50 = vrot.slane %v505_v49, %v6817_v20  ;;  %s7488_s22 = sld [smem:[#allocation14_spill]]  ;;  %s5342_s23 = sld [smem:[#allocation2 + $0x1]] }
  0xb5   :  { %6026 = vmatpush3.bf16.msra.mxu1 %v6023_v11  ;;  %s7489_s26 = sld [smem:[#allocation28_spill]]  ;;  %s7495_s1 = sld [smem:[#allocation29_spill]] }
  0xb6   :  { %5684 = vmatprep.subr.mxu1 %v6480_v4  ;;  %v520_v51 = vrot.slane %v512_v50, %v6817_v20  ;;  %v513_v52 = vcombine.high %v512_v50, %v512_v50  ;;  %s7490_s28 = sld [smem:[#allocation12_spill]]  ;;  %s7496_s4 = sld [smem:[#allocation30_spill]] }
  0xb7   :  { %s7498_s2 = sld [smem:[#allocation21_spill]]  ;;  %s7499_s7 = sld [smem:[#allocation22_spill]] }
  0xb8   :  { %vm528_vm4 = vcmp.ne.s32.totalorder %v520_v51, 0  ;;  %v527_v53 = vrot.slane %v513_v52, %v6817_v20  ;;  %s7500_s10 = sld [smem:[#allocation33_spill]]  ;;  %s7501_s11 = sld [smem:[#allocation31_spill]] }
  0xb9   :  { %v530_v54 = vsel %vm528_vm4, 1, %v6483_v48  ;;  %s7502_s9 = sld [smem:[#allocation32_spill]] }
  0xba   :  { %vm529_vm5 = vcmp.ne.s32.totalorder %v527_v53, 0  ;;  %v535_v55 = vrot.slane %v530_v54, %v6823_v29 }
  0xbb   :  { %v531_v56 = vsel %vm529_vm5, 1, %v6483_v48 }
  0xbc   :  { %vm6869_vm6 = vcmp.eq.s32.totalorder %v535_v55, 1  ;;  %v539_v59 = vrot.slane %v531_v56, %v6823_v29 }
  0xbe   :  { %vm6877_vm8 = vcmp.eq.s32.totalorder %v539_v59, 1 }
 0x183   :  { %v359_v21 = vpop.f32.mrb[0].mxu1 }
 0x184   :  { %v360_v23 = vadd.f32 %v5343_v17, %v359_v21  ;;  %v5662_v24 = vpop.f32.mrb[1].mxu1 }
 0x186   :  { %v379_v28 = vrot.slane %v360_v23, %v6817_v20 }
 0x188   :  { %v380_v31 = vcombine.high %v379_v28, %v379_v28  ;;  %v387_v32 = vrot.slane %v379_v28, %v6817_v20 }
 0x18a   :  { %v394_v35 = vrot.slane %v380_v31, %v6817_v20  ;;  %v398_v36 = vrot.slane %v387_v32, %v6823_v29 }
 0x18c   :  { %v402_v37 = vrot.slane %v394_v35, %v6823_v29  ;;  %v6830_v38 = vadd.f32 %v398_v36, %v370_v33 }
 0x18e   :  { %v6832_v39 = vadd.f32 %v402_v37, %v371_v34  ;;  %5671 = vmatprep.mubr.msk.f32.mxu1 %vm418_vm2, %v6830_v38 }
 0x190   :  { %5672 = vmatmul.mubr.msk.f32.vlgmr.msra.gmra.mrb[2].mxu1 %vm418_vm2, %v6832_v39 }
 0x191   :  { %5686 = vmatprep.mubr.msk.f32.mxu1 %vm6479_vm0, %v6480_v4 }
 0x263   :  { %v5673_v41 = vpop.f32.mrb[2].mxu1 }
 0x264   :  { %v491_v42 = vpop.f32.mrb[3].mxu1  ;;  %v6845_v44 = vadd.f32 %v5673_v41, %v5345_v40 }
 0x265   :  { %v6841_v43 = vadd.f32 %v5345_v40, %v491_v42 }
 0x267   :  { %543 = vrot.lane.b32.xlu0 %v6841_v43, %s6482_s13 }
 0x26b   :  { %620 = vrot.lane.b32.xlu0 %v6845_v44, %s6482_s13 }
 0x2d9   :  { %v544_v45 = vpop.permute.xlu0 %543 }
 0x2da   :  { %5675 = vmatpush3.xpose.msk.msra.mxu0 %vm289_vm1, %v544_v45 }
 0x2db   :  { %5679 = vmatprep.subr.mxu0 %v6480_v4 }
 0x2dd   :  { %5677 = vmatmul.mubr.msk.f32.vlgmr.msra.gmra.mrb[0].mxu0 %vm289_vm1, %v6841_v43  ;;  %v621_v46 = vpop.permute.xlu0 %620 }
 0x2de   :  { %5680 = vmatpush3.xpose.msk.msra.mxu0 %vm289_vm1, %v621_v46  ;;  %5681 = vmatprep.mubr.msk.f32.mxu0 %vm6479_vm0, %v6480_v4 }
 0x2df   :  { %5689 = vmatprep.subr.mxu0 %v6480_v4 }
 0x2e1   :  { %5682 = vmatmul.mubr.msk.f32.vlgmr.msra.gmra.mrb[2].mxu0 %vm289_vm1, %v6845_v44 }
 0x2e2   :  { %5691 = vmatprep.mubr.msk.f32.mxu0 %vm6479_vm0, %v6480_v4 }
 0x3b0   :  { %v615_v57 = vpop.f32.mrb[0].mxu0 }
 0x3b1   :  { %v696_v60 = vmul.f32 0.25, %v615_v57  ;;  %v5678_v61 = vpop.f32.mrb[1].mxu0 }
 0x3b3   :  { %v698_v62 = vsel %vm6869_vm6, %v696_v60, -1e+09 }
 0x3b4   :  { %v692_v63 = vpop.f32.mrb[2].mxu0  ;;  %v701_v0 = vsel %vm700_vm7, %v698_v62, -inf }
 0x3b5   :  { %v697_v2 = vmul.f32 0.25, %v692_v63  ;;  %702 = vmax.xlane.f32.xlu1 %v701_v0  ;;  %v5683_v3 = vpop.f32.mrb[3].mxu0 }
 0x3b7   :  { %v699_v5 = vsel %vm6877_vm8, %v697_v2, -1e+09 }
 0x3b8   :  { %v704_v6 = vsel %vm700_vm7, %v699_v5, -inf }
 0x3b9   :  { %705 = vmax.xlane.f32.xlu1 %v704_v6 }
 0x3ca   :  { %723 = vrot.lane.b32.xlu1 %v6841_v43, %s6484_s5 }
 0x3ce   :  { %799 = vrot.lane.b32.xlu1 %v6845_v44, %s6484_s5 }
 0x3d2   :  { %877 = vrot.lane.b32.xlu1 %v6841_v43, %s6485_s17 }
 0x3d6   :  { %955 = vrot.lane.b32.xlu1 %v6845_v44, %s6485_s17 }
 0x442   :  { %v703_v7 = vpop.xlane.xlu1 %702 }
 0x443   :  { %v707_v8 = vsub.f32 %v698_v62, %v703_v7 }
 0x445   :  { %v709_v9 = vmul.f32 1.442695, %v707_v8  ;;  %v503_v8 = vld [vmem:[%s6557_s30 + $0x18] sm:$0xff] }
 0x446   :  { %v706_v10 = vpop.xlane.xlu1 %705 }
 0x447   :  { %6253 = vpow2.f32 %v709_v9  ;;  %v708_v11 = vsub.f32 %v699_v5, %v706_v10  ;;  %v500_v10 = vld [vmem:[%s6557_s30] sm:$0xff] }
 0x449   :  { %v711_v12 = vmul.f32 1.442695, %v708_v11  ;;  %v501_v11 = vld [vmem:[%s6557_s30 + $0x8] sm:$0xff] }
 0x44a   :  { %v724_v13 = vpop.permute.xlu1 %723 }
 0x44b   :  { %6255 = vpow2.f32 %v711_v12  ;;  %5685 = vmatpush3.msra.mxu1 %v724_v13  ;;  %v6031_v12 = vpack.c.bf16 %v501_v11, %v500_v10 }
 0x44c   :  { %5694 = vmatprep.subr.mxu1 %v6480_v4 }
 0x44e   :  { %v800_v15 = vpop.permute.xlu1 %799 }
 0x44f   :  { %5690 = vmatpush3.msra.mxu0 %v800_v15 }
 0x450   :  { %5699 = vmatprep.subr.mxu0 %v6480_v4 }
 0x451   :  { %v6254_v17 = vpop.eup %6253 }
 0x452   :  { %v713_v18 = vsel %vm700_vm7, %v6254_v17, 0.0  ;;  %v878_v22 = vpop.permute.xlu1 %877 }
 0x453   :  { %714 = vadd.xlane.f32.xlu0 %v713_v18 }
 0x455   :  { %v6256_v19 = vpop.eup %6255 }
 0x456   :  { %v716_v21 = vsel %vm700_vm7, %v6256_v19, 0.0  ;;  %v956_v23 = vpop.permute.xlu1 %955 }
 0x457   :  { %717 = vadd.xlane.f32.xlu1 %v716_v21 }
 0x468   :  { %953 = vrot.lane.b32.xlu1 %v6845_v44, %s6486_s25 }
 0x469   :  { %875 = vrot.lane.b32.xlu0 %v6841_v43, %s6486_s25 }
 0x4e0   :  { %v715_v24 = vpop.xlane.xlu0 %714 }
 0x4e1   :  { %6257 = vrcp.f32 %v715_v24 }
 0x4e4   :  { %v718_v25 = vpop.xlane.xlu1 %717  ;;  %v876_v31 = vpop.permute.xlu0 %875 }
 0x4e5   :  { %6259 = vrcp.f32 %v718_v25 }
 0x4e8   :  { %v954_v32 = vpop.permute.xlu1 %953 }
 0x4eb   :  { %v6258_v26 = vpop.eup %6257 }
 0x4ec   :  { %v721_v27 = vmul.f32 %v6258_v26, %v6254_v17 }
 0x4ee   :  { %1663 = vst.msk [vmem:[%s6772_s27] sm:$0xff] %vm700_vm7, %v721_v27  ;;  %5687 = vmatmul.mubr.msk.f32.vlgmr.msra.gmra.mrb[4].mxu1 %vm700_vm7, %v721_v27 }
 0x4ef   :  { %v6260_v28 = vpop.eup %6259  ;;  %5695 = vmatpush3.xpose.msk.msra.mxu1 %vm289_vm1, %v878_v22  ;;  %5696 = vmatprep.mubr.msk.f32.mxu1 %vm6479_vm0, %v6480_v4 }
 0x4f0   :  { %v722_v30 = vmul.f32 %v6260_v28, %v6256_v19  ;;  %5704 = vmatprep.subr.mxu1 %v6480_v4  ;;  %v5364_v19 = vld [vmem:[%s6562_s6] ss:$0 sm:$0xff]  ;;  %s7481_s6 = sld [smem:[#allocation13_spill]] }
 0x4f2   :  { %1664 = vst.msk [vmem:[%s6772_s27 + $0x8] sm:$0xff] %vm700_vm7, %v722_v30  ;;  %5692 = vmatmul.mubr.msk.f32.vlgmr.msra.gmra.mrb[4].mxu0 %vm700_vm7, %v722_v30  ;;  %5697 = vmatmul.mubr.msk.f32.vlgmr.msra.gmra.mrb[6].mxu1 %vm289_vm1, %v876_v31 }
 0x4f3   :  { %5700 = vmatpush3.xpose.msk.msra.mxu0 %vm289_vm1, %v956_v23  ;;  %5701 = vmatprep.mubr.msk.f32.mxu0 %vm6479_vm0, %v6480_v4 }
 0x4f4   :  { %5709 = vmatprep.subr.mxu0 %v6480_v4  ;;  %5706 = vmatprep.mubr.msk.f32.mxu1 %vm6479_vm0, %v6480_v4 }
 0x4f6   :  { %5702 = vmatmul.mubr.msk.f32.vlgmr.msra.gmra.mrb[6].mxu0 %vm289_vm1, %v954_v32 }
 0x4f7   :  { %5711 = vmatprep.mubr.msk.f32.mxu0 %vm6479_vm0, %v6480_v4 }
 0x5c1   :  { %v6920_v33 = vpop.f32.mrb[4].mxu1 }
 0x5c2   :  { %v5688_v34 = vpop.f32.mrb[5].mxu1 }
 0x5c5   :  { %v6922_v35 = vpop.f32.mrb[4].mxu0  ;;  %v949_v36 = vpop.f32.mrb[6].mxu1 }
 0x5c6   :  { %v1031_v37 = vmul.f32 0.25, %v949_v36  ;;  %v5693_v40 = vpop.f32.mrb[5].mxu0  ;;  %v5698_v41 = vpop.f32.mrb[7].mxu1 }
 0x5c7   :  { %v1426_v40 = vld [vmem:[%s7476_s8] sm:$0xff]  ;;  %v1427_v41 = vld [vmem:[%s7476_s8 + $0x8] sm:$0xff] }
 0x5c8   :  { %v1033_v42 = vsel %vm6869_vm6, %v1031_v37, -1e+09 }
 0x5c9   :  { %v1027_v45 = vpop.f32.mrb[6].mxu0  ;;  %v1035_v46 = vsel %vm700_vm7, %v1033_v42, -inf }
 0x5ca   :  { %v1032_v47 = vmul.f32 0.25, %v1027_v45  ;;  %v5703_v49 = vpop.f32.mrb[7].mxu0  ;;  %1036 = vmax.xlane.f32.xlu1 %v1035_v46  ;;  %v1428_v45 = vld [vmem:[%s7476_s8 + $0x10] sm:$0xff]  ;;  %v1429_v46 = vld [vmem:[%s7476_s8 + $0x18] sm:$0xff]  ;;  %s7509_s8 = sld [smem:[#allocation39_spill]] }
 0x5cb   :  { %v1670_v49 = vld [vmem:[%s7477_s14] sm:$0xf]  ;;  %s7510_s14 = sld [smem:[#allocation40_spill]] }
 0x5cc   :  { %v1034_v50 = vsel %vm6877_vm8, %v1032_v47, -1e+09  ;;  %v6039_v47 = vpack.c.bf16 %v1429_v46, %v1428_v45  ;;  %v1869_v46 = vld [vmem:[%s7485_s0 + $0x10] sm:$0xff] }
 0x5cd   :  { %v1038_v51 = vsel %vm700_vm7, %v1034_v50, -inf }
 0x5ce   :  { %1039 = vmax.xlane.f32.xlu0 %v1038_v51  ;;  %v1521_v51 = vld [vmem:[%s7478_s19 + $0x8] sm:$0xff] }
 0x5e4   :  { %1133 = vrot.lane.b32.xlu0 %v6845_v44, %s6487_s29 }
 0x657   :  { %v1037_v52 = vpop.xlane.xlu1 %1036 }
 0x658   :  { %v1041_v53 = vsub.f32 %v1033_v42, %v1037_v52  ;;  %v6035_v42 = vpack.c.bf16 %v1427_v41, %v1426_v40  ;;  %v1522_v52 = vld [vmem:[%s7478_s19 + $0x10] sm:$0xff]  ;;  %v1867_v41 = vld [vmem:[%s7485_s0] sm:$0xff] }
 0x65a   :  { %v1043_v54 = vmul.f32 1.442695, %v1041_v53 }
 0x65b   :  { %v1040_v55 = vpop.xlane.xlu0 %1039 }
 0x65c   :  { %6261 = vpow2.f32 %v1043_v54  ;;  %v1042_v56 = vsub.f32 %v1034_v50, %v1040_v55  ;;  %v1520_v50 = vld [vmem:[%s7478_s19] sm:$0xff]  ;;  %v1523_v54 = vld [vmem:[%s7478_s19 + $0x18] sm:$0xff] }
 0x65d   :  { %v6043_v53 = vpack.c.bf16 %v1521_v51, %v1520_v50  ;;  %v6047_v55 = vpack.c.bf16 %v1523_v54, %v1522_v52  ;;  %v7007_v50 = vld [vmem:[%s7486_s3] ss:$0 sm:$0xff]  ;;  %s7518_s3 = sld [smem:[#allocation49_spill]] }
 0x65e   :  { %v1045_v57 = vmul.f32 1.442695, %v1042_v56  ;;  %v1524_v56 = vld [vmem:[%s7478_s19 + $0x20] sm:$0xff] }
 0x65f   :  { %v1134_v59 = vpop.permute.xlu0 %1133  ;;  %v5381_v54 = vld [vmem:[%s7487_s18] ss:$0 sm:$0xff] }
 0x660   :  { %6263 = vpow2.f32 %v1045_v57  ;;  %5710 = vmatpush3.msra.mxu0 %v1134_v59  ;;  %v1525_v57 = vld [vmem:[%s7478_s19 + $0x28] sm:$0xff] }
 0x661   :  { %6036 = vmatprep.subr.bf16.mxu0 %v6035_v42  ;;  %v6051_v59 = vpack.c.bf16 %v1525_v57, %v1524_v56  ;;  %v1860_v56 = vld [vmem:[%s7488_s22] sm:$0xff] }
 0x666   :  { %v6262_v60 = vpop.eup %6261 }
 0x667   :  { %v1047_v61 = vsel %vm700_vm7, %v6262_v60, 0.0 }
 0x668   :  { %1048 = vadd.xlane.f32.xlu1 %v1047_v61 }
 0x66a   :  { %v6264_v62 = vpop.eup %6263 }
 0x66b   :  { %v1050_v63 = vsel %vm700_vm7, %v6264_v62, 0.0 }
 0x66c   :  { %1051 = vadd.xlane.f32.xlu1 %v1050_v63 }
 0x67d   :  { %1057 = vrot.lane.b32.xlu1 %v6841_v43, %s6487_s29  ;;  %v502_v43 = vld [vmem:[%s6557_s30 + $0x10] sm:$0xff]  ;;  %s7480_s30 = sld [smem:[#allocation16_spill]] }
 0x67e   :  { %v6027_v9 = vpack.c.bf16 %v503_v8, %v502_v43 }
 0x683   :  { %v5366_v43 = vld [vmem:[%s7480_s30] ss:$0 sm:$0xff]  ;;  %s7513_s30 = sld [smem:[#allocation47_spill]] }
 0x6f5   :  { %v1049_v44 = vpop.xlane.xlu1 %1048 }
 0x6f6   :  { %6265 = vrcp.f32 %v1049_v44 }
 0x6f9   :  { %v1052_v0 = vpop.xlane.xlu1 %1051 }
 0x6fa   :  { %6267 = vrcp.f32 %v1052_v0 }
 0x6fd   :  { %v1058_v2 = vpop.permute.xlu1 %1057 }
 0x6fe   :  { %5705 = vmatpush3.msra.mxu1 %v1058_v2 }
 0x6ff   :  { %6028 = vmatprep.subr.bf16.mxu1 %v6027_v9 }
 0x700   :  { %v6266_v3 = vpop.eup %6265 }
 0x701   :  { %v1055_v5 = vmul.f32 %v6266_v3, %v6262_v60  ;;  %v5365_v3 = vld [vmem:[%s7479_s24] ss:$0 sm:$0xff]  ;;  %s7512_s24 = sld [smem:[#allocation44_spill]] }
 0x703   :  { %5375 = vst.msk [vmem:[%s6772_s27 + $0x10] sm:$0xff] %vm700_vm7, %v1055_v5  ;;  %5707 = vmatmul.mubr.msk.f32.vlgmr.msra.gmra.mrb[8].mxu1 %vm700_vm7, %v1055_v5 }
 0x704   :  { %v6268_v6 = vpop.eup %6267  ;;  %6030 = vmatpush3.bf16.msra.mxu1 %v6027_v9 }
 0x705   :  { %v1056_v7 = vmul.f32 %v6268_v6, %v6264_v62  ;;  %6032 = vmatprep.subr.bf16.mxu1 %v6031_v12 }
 0x707   :  { %5376 = vst.msk [vmem:[%s6772_s27 + $0x18] sm:$0xff] %vm700_vm7, %v1056_v7  ;;  %5712 = vmatmul.mubr.msk.f32.vlgmr.msra.gmra.mrb[8].mxu0 %vm700_vm7, %v1056_v7  ;;  %s7482_s27 = sld [smem:[#allocation25_spill]] }
 0x708   :  { %6038 = vmatpush3.bf16.msra.mxu0 %v6035_v42  ;;  %v1868_v42 = vld [vmem:[%s7485_s0 + $0x8] sm:$0xff] }
 0x709   :  { %6040 = vmatprep.subr.bf16.mxu0 %v6039_v47  ;;  %v6067_v45 = vpack.c.bf16 %v1868_v42, %v1867_v41 }
 0x70c   :  { %6042 = vmatpush3.bf16.msra.mxu0 %v6039_v47  ;;  %v1870_v47 = vld [vmem:[%s7485_s0 + $0x18] sm:$0xff]  ;;  %s6488_s0 = smov 124  }
 0x70d   :  { %5758 = vmatprep.subr.msk.mxu0 %vm1685_vm9, %v1670_v49 }
 0x7d6   :  { %v1129_v13 = vpop.f32.mrb[8].mxu1 }
 0x7d7   :  { %v5708_v15 = vpop.f32.mrb[9].mxu1  ;;  %5718 = vmatprep.mubr.msk.f32.mxu1 %vm289_vm1, %v1129_v13  ;;  %v1669_v13 = vld [vmem:[%s7481_s6 + $0x8] sm:$0xff] }
 0x7d8   :  { %v1526_v15 = vld [vmem:[%s7478_s19 + $0x30] sm:$0xff] }
 0x7da   :  { %v1205_v17 = vpop.f32.mrb[8].mxu0 }
 0x7db   :  { %v5713_v18 = vpop.f32.mrb[9].mxu0  ;;  %5719 = vmatmul.mubr.msk.f32.vlgmr.msra.gmra.mrb[10].mxu1 %vm289_vm1, %v1205_v17  ;;  %v1527_v17 = vld [vmem:[%s7478_s19 + $0x38] sm:$0xff]  ;;  %s7511_s19 = sld [smem:[#allocation42_spill]] }
 0x7dc   :  { %6034 = vmatpush3.bf16.msra.mxu1 %v6031_v12  ;;  %5725 = vmatprep.mubr.msk.f32.mxu1 %vm289_vm1, %v6920_v33  ;;  %v1668_v12 = vld [vmem:[%s7481_s6] sm:$0xff]  ;;  %s7514_s6 = sld [smem:[#allocation45_spill]] }
 0x7dd   :  { %6044 = vmatprep.subr.bf16.mxu1 %v6043_v53  ;;  %v1766_v18 = vld [vmem:[%s7482_s27] sm:$0xff] }
 0x7e3   :  { %5726 = vmatmul.mubr.msk.f32.vlgmr.msra.gmra.mrb[10].mxu1 %vm289_vm1, %v6922_v35 }
 0x7e4   :  { %6046 = vmatpush3.bf16.msra.mxu1 %v6043_v53 }
 0x7e5   :  { %6048 = vmatprep.subr.bf16.mxu1 %v6047_v55 }
 0x7e8   :  { %6050 = vmatpush3.bf16.msra.mxu1 %v6047_v55  ;;  %v1862_v55 = vstv %s5342_s23 }
 0x7e9   :  { %6052 = vmatprep.subr.bf16.mxu1 %v6051_v59 }
 0x7ec   :  { %6054 = vmatpush3.bf16.msra.mxu1 %v6051_v59  ;;  %v1861_v59 = vld [vmem:[%s7488_s22 + $0x8] sm:$0xff] }
 0x8b6   :  { %v5727_v21 = vpop.f32.mrb[10].mxu1 }
 0x8b7   :  { %v1378_v22 = vadd.f32 %v5727_v21, %v5364_v19  ;;  %v1362_v23 = vpop.f32.mrb[11].mxu1  ;;  %v1767_v21 = vld [vmem:[%s7482_s27 + $0x8] sm:$0xff] }
 0x8b8   :  { %v1377_v24 = vadd.f32 %v5364_v19, %v1362_v23  ;;  %v6055_v19 = vpack.c.bf16 %v1527_v17, %v1526_v15  ;;  %v1768_v23 = vld [vmem:[%s7482_s27 + $0x10] sm:$0xff]  ;;  %v277_v15 = vld [vmem:[%s7490_s28] sm:$0x3] }
 0x8b9   :  { %v1380_v25 = vadd.f32 %v1378_v22, %v6832_v39  ;;  %v6059_v22 = vpack.c.bf16 %v1767_v21, %v1766_v18  ;;  %vm278_vm12 = vcmp.ne.s32.totalorder %v277_v15, 0 }
 0x8ba   :  { %v1379_v26 = vadd.f32 %v1377_v24, %v6830_v38  ;;  %6056 = vmatprep.subr.bf16.mxu1 %v6055_v19  ;;  %v1769_v24 = vld [vmem:[%s7482_s27 + $0x18] sm:$0xff]  ;;  %v1964_v17 = vsel %vm278_vm12, 1, %v6483_v48  ;;  %s7515_s27 = sld [smem:[#allocation46_spill]] }
 0x8bb   :  { %v1386_v27 = vsel %vm418_vm2, %v1380_v25, 0.0  ;;  %6058 = vmatpush3.bf16.msra.mxu1 %v6055_v19  ;;  %v1971_v18 = vrot.slane %v1964_v17, %v6817_v20 }
 0x8bc   :  { %1387 = vadd.xlane.f32.xlu0 %v1386_v27  ;;  %v1383_v28 = vsel %vm418_vm2, %v1379_v26, 0.0  ;;  %5785 = vmatprep.subr.mxu1 %v6480_v4 }
 0x8bd   :  { %1384 = vadd.xlane.f32.xlu1 %v1383_v28  ;;  %v1979_v19 = vrot.slane %v1971_v18, %v6817_v20  ;;  %v1972_v21 = vcombine.high %v1971_v18, %v1971_v18 }
 0x8bf   :  { %vm1987_vm13 = vcmp.ne.s32.totalorder %v1979_v19, 0 }
 0x949   :  { %v1388_v30 = vpop.xlane.xlu0 %1387 }
 0x94a   :  { %v1391_v31 = vmul.f32 0.03125, %v1388_v30  ;;  %v1385_v32 = vpop.xlane.xlu1 %1384 }
 0x94b   :  { %v1390_v33 = vmul.f32 0.03125, %v1385_v32  ;;  %v5377_v32 = vld [vmem:[%s7484_s16] ss:$0 sm:$0xff]  ;;  %s7517_s16 = sld [smem:[#allocation50_spill]] }
 0x94c   :  { %v1393_v34 = vsub.f32 %v1380_v25, %v1391_v31  ;;  %v6063_v25 = vpack.c.bf16 %v1769_v24, %v1768_v23  ;;  %v1989_v23 = vsel %vm1987_vm13, 1, %v6483_v48 }
 0x94d   :  { %v1392_v35 = vsub.f32 %v1379_v26, %v1390_v33  ;;  %v5367_v26 = vld [vmem:[%s7483_s15] ss:$0 sm:$0xff]  ;;  %v1994_v24 = vrot.slane %v1989_v23, %v6823_v29  ;;  %s7516_s15 = sld [smem:[#allocation48_spill]] }
 0x94e   :  { %v1395_v36 = vmul.f32 %v1393_v34, %v1393_v34 }
 0x94f   :  { %v1394_v39 = vmul.f32 %v1392_v35, %v1392_v35  ;;  %vm1999_vm15 = vcmp.eq.s32.totalorder %v1994_v24, 1 }
 0x950   :  { %v1399_v38 = vsel %vm418_vm2, %v1395_v36, 0.0 }
 0x951   :  { %1400 = vadd.xlane.f32.xlu0 %v1399_v38  ;;  %v1396_v37 = vsel %vm418_vm2, %v1394_v39, 0.0 }
 0x952   :  { %1397 = vadd.xlane.f32.xlu1 %v1396_v37 }
 0x9de   :  { %v1401_v60 = vpop.xlane.xlu0 %1400 }
 0x9df   :  { %v1403_v61 = vmul.f32 0.03125, %v1401_v60  ;;  %v1398_v62 = vpop.xlane.xlu1 %1397 }
 0x9e0   :  { %v1402_v63 = vmul.f32 0.03125, %v1398_v62 }
 0x9e1   :  { %v1405_v44 = vadd.f32 1e-05, %v1403_v61 }
 0x9e2   :  { %v1404_v0 = vadd.f32 1e-05, %v1402_v63  ;;  %v1863_v63 = vmul.f32 %v1862_v55, %v1860_v56 }
 0x9e3   :  { %6269 = vrsqrt.f32 %v1405_v44 }
 0x9e4   :  { %6271 = vrsqrt.f32 %v1404_v0  ;;  %v1864_v0 = vmul.f32 %v1862_v55, %v1861_v59 }
 0x9ed   :  { %v6270_v2 = vpop.eup %6269 }
 0x9ee   :  { %v6272_v5 = vpop.eup %6271  ;;  %v1409_v6 = vmul.f32 %v6270_v2, %v1393_v34 }
 0x9ef   :  { %v1408_v7 = vmul.f32 %v6272_v5, %v1392_v35 }
 0x9f0   :  { %v1417_v8 = vmul.f32 %v5365_v3, %v1409_v6  ;;  %v5384_v6 = vld [vmem:[%s7489_s26] ss:$0 sm:$0xff] }
 0x9f1   :  { %v1416_v9 = vmul.f32 %v5365_v3, %v1408_v7 }
 0x9f2   :  { %v6975_v11 = vadd.f32 %v5366_v43, %v1417_v8 }
 0x9f3   :  { %v6973_v10 = vadd.f32 %v5366_v43, %v1416_v9 }
 0x9f5   :  { %5736 = vmatprep.mubr.msk.f32.mxu0 %vm418_vm2, %v6973_v10 }
 0x9f6   :  { %5737 = vmatmul.mubr.msk.f32.vlgmr.msra.gmra.mrb[10].mxu0 %vm418_vm2, %v6975_v11 }
 0x9f7   :  { %5759 = vmatpush3.msk.msra.mxu0 %vm1685_vm9, %v1670_v49  ;;  %5760 = vmatprep.mubr.msk.f32.mxu0 %vm1678_vm10, %v1668_v12  ;;  %v6071_v49 = vpack.c.bf16 %v1870_v47, %v1869_v46 }
 0x9f8   :  { %6060 = vmatprep.subr.bf16.mxu0 %v6059_v22 }
 0x9fa   :  { %5761 = vmatmul.mubr.msk.f32.vlgmr.msra.gmra.mrb[12].mxu0 %vm1678_vm10, %v1669_v13 }
 0x9fb   :  { %6062 = vmatpush3.bf16.msra.mxu0 %v6059_v22  ;;  %v1986_v22 = vrot.slane %v1972_v21, %v6817_v20 }
 0x9fc   :  { %6064 = vmatprep.subr.bf16.mxu0 %v6063_v25 }
 0x9fd   :  { %vm1988_vm14 = vcmp.ne.s32.totalorder %v1986_v22, 0 }
 0x9ff   :  { %6066 = vmatpush3.bf16.msra.mxu0 %v6063_v25  ;;  %v2004_v25 = vand.u32 127, %v376_v14 }
 0xa00   :  { %6068 = vmatprep.subr.bf16.mxu0 %v6067_v45 }
 0xa01   :  { %vm2005_vm3 = vcmp.ge.s32.totalorder %v6812_v16, %v2004_v25 }
 0xa02   :  { %vm7059_vm4 = vmand %vm1999_vm15, %vm2005_vm3 }
 0xac9   :  { %v5738_v27 = vpop.f32.mrb[10].mxu0 }
 0xaca   :  { %v1515_v28 = vadd.f32 %v5738_v27, %v5367_v26  ;;  %v1509_v30 = vpop.f32.mrb[11].mxu0 }
 0xacb   :  { %v1510_v31 = vadd.f32 %v5367_v26, %v1509_v30  ;;  %v1990_v26 = vsel %vm1988_vm14, 1, %v6483_v48 }
 0xacc   :  { %v1519_v35 = vmax.f32 %v1515_v28, 0.0  ;;  %v1998_v27 = vrot.slane %v1990_v26, %v6823_v29 }
 0xacd   :  { %v1518_v33 = vmax.f32 %v1510_v31, 0.0  ;;  %v5762_v34 = vpop.f32.mrb[12].mxu0 }
 0xace   :  { %v1761_v36 = vadd.f32 %v5762_v34, %v5377_v32  ;;  %v1755_v39 = vpop.f32.mrb[13].mxu0  ;;  %vm2000_vm5 = vcmp.eq.s32.totalorder %v1998_v27, 1 }
 0xacf   :  { %v1756_v38 = vadd.f32 %v5377_v32, %v1755_v39  ;;  %5755 = vmatprep.mubr.msk.f32.mxu1 %vm1535_vm11, %v1518_v33  ;;  %vm7066_vm12 = vmand %vm2000_vm5, %vm2005_vm3 }
 0xad0   :  { %5756 = vmatmul.mubr.msk.f32.vlgmr.msra.gmra.mrb[12].mxu1 %vm1535_vm11, %v1519_v35  ;;  %v1765_v40 = vmax.f32 %v1761_v36, 0.0 }
 0xad1   :  { %v1764_v37 = vmax.f32 %v1756_v38, 0.0  ;;  %5787 = vmatprep.mubr.msk.f32.mxu1 %vm6479_vm0, %v6480_v4 }
 0xad3   :  { %5771 = vmatprep.mubr.msk.f32.mxu0 %vm418_vm2, %v1764_v37 }
 0xad4   :  { %5772 = vmatmul.mubr.msk.f32.vlgmr.msra.gmra.mrb[14].mxu0 %vm418_vm2, %v1765_v40 }
 0xad5   :  { %6070 = vmatpush3.bf16.msra.mxu0 %v6067_v45 }
 0xad6   :  { %6072 = vmatprep.subr.bf16.mxu0 %v6071_v49 }
 0xad9   :  { %6074 = vmatpush3.bf16.msra.mxu0 %v6071_v49 }
 0xada   :  { %5795 = vmatprep.subr.mxu0 %v6480_v4 }
 0xba3   :  { %v5757_v51 = vpop.f32.mrb[12].mxu1 }
 0xba4   :  { %v7010_v52 = vadd.f32 %v5757_v51, %v7007_v50  ;;  %v7012_v53 = vpop.f32.mrb[13].mxu1 }
 0xba5   :  { %v1609_v24 = vadd.f32 %v7007_v50, %v7012_v53 }
 0xba7   :  { %v5773_v57 = vpop.f32.mrb[14].mxu0  ;;  %v7124_v25 = vadd.f32 %v1609_v24, %v6973_v10 }
 0xba8   :  { %v1855_v60 = vadd.f32 %v5773_v57, %v5381_v54  ;;  %v1849_v61 = vpop.f32.mrb[15].mxu0 }
 0xba9   :  { %v1850_v62 = vadd.f32 %v5381_v54, %v1849_v61  ;;  %v1621_v26 = vsel %vm418_vm2, %v7124_v25, 0.0 }
 0xbaa   :  { %v1859_v44 = vmax.f32 %v1855_v60, 0.0 }
 0xbab   :  { %v1858_v2 = vmax.f32 %v1850_v62, 0.0 }
 0xbac   :  { %v7019_v5 = vadd.f32 %v1864_v0, %v1859_v44 }
 0xbad   :  { %v7017_v3 = vadd.f32 %v1863_v63, %v1858_v2 }
 0xbaf   :  { %5782 = vmatprep.mubr.msk.f32.mxu0 %vm418_vm2, %v7017_v3 }
 0xbb0   :  { %5783 = vmatmul.mubr.msk.f32.vlgmr.msra.gmra.mrb[16].mxu0 %vm418_vm2, %v7019_v5 }
 0xbb1   :  { %5797 = vmatprep.mubr.msk.f32.mxu0 %vm6479_vm0, %v6480_v4 }
 0xc83   :  { %v5784_v7 = vpop.f32.mrb[16].mxu0 }
 0xc84   :  { %v7028_v43 = vadd.f32 %v5784_v7, %v5384_v6  ;;  %v1950_v8 = vpop.f32.mrb[17].mxu0 }
 0xc85   :  { %v7030_v9 = vadd.f32 %v5384_v6, %v1950_v8 }
 0xc86   :  { %2088 = vrot.lane.b32.xlu0 %v7028_v43, %s6482_s13 }
 0xc87   :  { %2011 = vrot.lane.b32.xlu1 %v7030_v9, %s6482_s13 }
 0xcf8   :  { %v2089_v13 = vpop.permute.xlu0 %2088 }
 0xcf9   :  { %v2012_v12 = vpop.permute.xlu1 %2011 }
 0xcfa   :  { %5786 = vmatpush3.xpose.msk.msra.mxu1 %vm289_vm1, %v2012_v12 }
 0xcfb   :  { %5790 = vmatprep.subr.mxu1 %v6480_v4 }
 0xcfd   :  { %5788 = vmatmul.mubr.msk.f32.vlgmr.msra.gmra.mrb[14].mxu1 %vm289_vm1, %v7030_v9 }
 0xcfe   :  { %5791 = vmatpush3.xpose.msk.msra.mxu1 %vm289_vm1, %v2089_v13  ;;  %5792 = vmatprep.mubr.msk.f32.mxu1 %vm6479_vm0, %v6480_v4 }
 0xcff   :  { %5800 = vmatprep.subr.mxu1 %v6480_v4 }
 0xd01   :  { %5793 = vmatmul.mubr.msk.f32.vlgmr.msra.gmra.mrb[16].mxu1 %vm289_vm1, %v7028_v43 }
 0xd02   :  { %5802 = vmatprep.mubr.msk.f32.mxu1 %vm6479_vm0, %v6480_v4 }
 0xdd0   :  { %v2083_v28 = vpop.f32.mrb[14].mxu1 }
 0xdd1   :  { %v2164_v20 = vmul.f32 0.25, %v2083_v28  ;;  %v5789_v31 = vpop.f32.mrb[15].mxu1 }
 0xdd3   :  { %v2166_v32 = vsel %vm7059_vm4, %v2164_v20, -1e+09 }
 0xdd4   :  { %v2160_v33 = vpop.f32.mrb[16].mxu1  ;;  %v2168_v14 = vsel %vm700_vm7, %v2166_v32, -inf }
 0xdd5   :  { %v2165_v16 = vmul.f32 0.25, %v2160_v33  ;;  %2169 = vmax.xlane.f32.xlu1 %v2168_v14  ;;  %v5794_v29 = vpop.f32.mrb[17].mxu1  ;;  %v1618_v14 = vadd.f32 %v7010_v52, %v6975_v11 }
 0xdd7   :  { %v2167_v34 = vsel %vm7066_vm12, %v2165_v16, -1e+09  ;;  %v1624_v48 = vsel %vm418_vm2, %v1618_v14, 0.0 }
 0xdd8   :  { %v2171_v35 = vsel %vm700_vm7, %v2167_v34, -inf }
 0xdd9   :  { %2172 = vmax.xlane.f32.xlu0 %v2171_v35 }
 0xde6   :  { %2190 = vrot.lane.b32.xlu1 %v7030_v9, %s6484_s5 }
 0xdea   :  { %2344 = vrot.lane.b32.xlu1 %v7030_v9, %s6485_s17 }
 0xdee   :  { %2422 = vrot.lane.b32.xlu1 %v7028_v43, %s6485_s17 }
 0xdef   :  { %2266 = vrot.lane.b32.xlu0 %v7028_v43, %s6484_s5  ;;  %s7503_s5 = sld [smem:[#allocation36_spill]] }
 0xe62   :  { %v2170_v36 = vpop.xlane.xlu1 %2169 }
 0xe63   :  { %v2174_v39 = vsub.f32 %v2166_v32, %v2170_v36 }
 0xe65   :  { %v2176_v38 = vmul.f32 1.442695, %v2174_v39  ;;  %v1962_v39 = vld [vmem:[%s7495_s1 + $0x18] sm:$0xff] }
 0xe66   :  { %v2191_v37 = vpop.permute.xlu1 %2190  ;;  %v2173_v40 = vpop.xlane.xlu0 %2172 }
 0xe67   :  { %6273 = vpow2.f32 %v2176_v38  ;;  %v2175_v41 = vsub.f32 %v2167_v34, %v2173_v40  ;;  %5796 = vmatpush3.msra.mxu0 %v2191_v37  ;;  %v1959_v37 = vld [vmem:[%s7495_s1] sm:$0xff]  ;;  %v1960_v40 = vld [vmem:[%s7495_s1 + $0x8] sm:$0xff] }
 0xe68   :  { %5805 = vmatprep.subr.mxu0 %v6480_v4 }
 0xe69   :  { %v2178_v42 = vmul.f32 1.442695, %v2175_v41  ;;  %v6079_v41 = vpack.c.bf16 %v1960_v40, %v1959_v37  ;;  %v2894_v37 = vld [vmem:[%s7500_s10 + $0x10] sm:$0xff]  ;;  %v2895_v40 = vld [vmem:[%s7500_s10 + $0x18] sm:$0xff] }
 0xe6a   :  { %v2267_v45 = vpop.permute.xlu0 %2266  ;;  %v2345_v54 = vpop.permute.xlu1 %2344 }
 0xe6b   :  { %6275 = vpow2.f32 %v2178_v42  ;;  %5801 = vmatpush3.msra.mxu1 %v2267_v45 }
 0xe6c   :  { %5810 = vmatprep.subr.mxu1 %v6480_v4 }
 0xe6e   :  { %v2423_v55 = vpop.permute.xlu1 %2422 }
 0xe71   :  { %v6274_v46 = vpop.eup %6273 }
 0xe72   :  { %v2180_v47 = vsel %vm700_vm7, %v6274_v46, 0.0 }
 0xe73   :  { %2181 = vadd.xlane.f32.xlu1 %v2180_v47 }
 0xe75   :  { %v6276_v49 = vpop.eup %6275 }
 0xe76   :  { %v2183_v51 = vsel %vm700_vm7, %v6276_v49, 0.0 }
 0xe77   :  { %2184 = vadd.xlane.f32.xlu0 %v2183_v51 }
 0xe84   :  { %2420 = vrot.lane.b32.xlu1 %v7028_v43, %s6486_s25 }
 0xe8d   :  { %2342 = vrot.lane.b32.xlu0 %v7030_v9, %s6486_s25 }
 0xf00   :  { %v2182_v56 = vpop.xlane.xlu1 %2181 }
 0xf01   :  { %6277 = vrcp.f32 %v2182_v56  ;;  %v5403_v56 = vld [vmem:[%s7496_s4] ss:$0 sm:$0xff] }
 0xf04   :  { %v2185_v57 = vpop.xlane.xlu0 %2184  ;;  %v2421_v44 = vpop.permute.xlu1 %2420 }
 0xf05   :  { %6279 = vrcp.f32 %v2185_v57 }
 0xf08   :  { %v2343_v63 = vpop.permute.xlu0 %2342 }
 0xf0b   :  { %v6278_v59 = vpop.eup %6277 }
 0xf0c   :  { %v2188_v60 = vmul.f32 %v6278_v59, %v6274_v46 }
 0xf0e   :  { %5248 = vst.msk [vmem:[%s6777_s21] sm:$0xff] %vm700_vm7, %v2188_v60  ;;  %5798 = vmatmul.mubr.msk.f32.vlgmr.msra.gmra.mrb[18].mxu0 %vm700_vm7, %v2188_v60 }
 0xf0f   :  { %v6280_v61 = vpop.eup %6279  ;;  %5806 = vmatpush3.xpose.msk.msra.mxu0 %vm289_vm1, %v2345_v54  ;;  %5807 = vmatprep.mubr.msk.f32.mxu0 %vm6479_vm0, %v6480_v4 }
 0xf10   :  { %v2189_v62 = vmul.f32 %v6280_v61, %v6276_v49  ;;  %5815 = vmatprep.subr.mxu0 %v6480_v4 }
 0xf12   :  { %5249 = vst.msk [vmem:[%s6777_s21 + $0x8] sm:$0xff] %vm700_vm7, %v2189_v62  ;;  %5803 = vmatmul.mubr.msk.f32.vlgmr.msra.gmra.mrb[18].mxu1 %vm700_vm7, %v2189_v62  ;;  %5808 = vmatmul.mubr.msk.f32.vlgmr.msra.gmra.mrb[20].mxu0 %vm289_vm1, %v2343_v63 }
 0xf13   :  { %5811 = vmatpush3.xpose.msk.msra.mxu1 %vm289_vm1, %v2423_v55  ;;  %5812 = vmatprep.mubr.msk.f32.mxu1 %vm6479_vm0, %v6480_v4 }
 0xf14   :  { %5820 = vmatprep.subr.mxu1 %v6480_v4  ;;  %5817 = vmatprep.mubr.msk.f32.mxu0 %vm6479_vm0, %v6480_v4 }
 0xf16   :  { %5813 = vmatmul.mubr.msk.f32.vlgmr.msra.gmra.mrb[20].mxu1 %vm289_vm1, %v2421_v44 }
 0xf17   :  { %5822 = vmatprep.mubr.msk.f32.mxu1 %vm6479_vm0, %v6480_v4 }
 0xfe1   :  { %v7109_v0 = vpop.f32.mrb[18].mxu0 }
 0xfe2   :  { %v5799_v2 = vpop.f32.mrb[19].mxu0 }
 0xfe5   :  { %v7111_v6 = vpop.f32.mrb[18].mxu1  ;;  %v2416_v7 = vpop.f32.mrb[20].mxu0 }
 0xfe6   :  { %v2498_v8 = vmul.f32 0.25, %v2416_v7  ;;  %v5804_v12 = vpop.f32.mrb[19].mxu1  ;;  %v5809_v13 = vpop.f32.mrb[21].mxu0 }
 0xfe8   :  { %v2500_v15 = vsel %vm7059_vm4, %v2498_v8, -1e+09 }
 0xfe9   :  { %v2494_v17 = vpop.f32.mrb[20].mxu1  ;;  %v2502_v18 = vsel %vm700_vm7, %v2500_v15, -inf }
 0xfea   :  { %v2499_v19 = vmul.f32 0.25, %v2494_v17  ;;  %2503 = vmax.xlane.f32.xlu0 %v2502_v18  ;;  %v5814_v21 = vpop.f32.mrb[21].mxu1 }
 0xfec   :  { %v2501_v22 = vsel %vm7066_vm12, %v2499_v19, -1e+09 }
 0xfed   :  { %v2505_v23 = vsel %vm700_vm7, %v2501_v22, -inf }
 0xfee   :  { %2506 = vmax.xlane.f32.xlu1 %v2505_v23 }
 0xfff   :  { %2524 = vrot.lane.b32.xlu1 %v7030_v9, %s6487_s29 }
0x1023   :  { %1622 = vadd.xlane.f32.xlu1 %v1621_v26 }
0x1077   :  { %v2504_v27 = vpop.xlane.xlu0 %2503 }
0x1078   :  { %v2508_v28 = vsub.f32 %v2500_v15, %v2504_v27 }
0x107a   :  { %v2510_v30 = vmul.f32 1.442695, %v2508_v28 }
0x107b   :  { %v2507_v20 = vpop.xlane.xlu1 %2506 }
0x107c   :  { %6281 = vpow2.f32 %v2510_v30  ;;  %v2509_v31 = vsub.f32 %v2501_v22, %v2507_v20 }
0x107e   :  { %v2512_v32 = vmul.f32 1.442695, %v2509_v31 }
0x107f   :  { %v2525_v33 = vpop.permute.xlu1 %2524 }
0x1080   :  { %6283 = vpow2.f32 %v2512_v32  ;;  %5816 = vmatpush3.msra.mxu0 %v2525_v33 }
0x1086   :  { %v6282_v9 = vpop.eup %6281 }
0x1087   :  { %v2514_v50 = vsel %vm700_vm7, %v6282_v9, 0.0 }
0x1088   :  { %2515 = vadd.xlane.f32.xlu0 %v2514_v50 }
0x108a   :  { %v6284_v10 = vpop.eup %6283 }
0x108b   :  { %v2517_v53 = vsel %vm700_vm7, %v6284_v10, 0.0 }
0x108c   :  { %2518 = vadd.xlane.f32.xlu0 %v2517_v53 }
0x10a2   :  { %2600 = vrot.lane.b32.xlu0 %v7028_v43, %s6487_s29  ;;  %v1961_v43 = vld [vmem:[%s7495_s1 + $0x10] sm:$0xff]  ;;  %s7504_s29 = sld [smem:[#allocation34_spill]] }
0x10a3   :  { %v6075_v38 = vpack.c.bf16 %v1962_v39, %v1961_v43  ;;  %v2892_v43 = vld [vmem:[%s7500_s10] sm:$0xff]  ;;  %v2893_v39 = vld [vmem:[%s7500_s10 + $0x8] sm:$0xff] }
0x10a5   :  { %6076 = vmatprep.subr.bf16.mxu0 %v6075_v38 }
0x10b0   :  { %v1623_v51 = vpop.xlane.xlu1 %1622 }
0x10b1   :  { %v1627_v55 = vmul.f32 0.03125, %v1623_v51 }
0x10b3   :  { %v1629_v62 = vsub.f32 %v7124_v25, %v1627_v55  ;;  %v5404_v55 = vld [vmem:[%s7501_s11] ss:$0 sm:$0xff] }
0x10b5   :  { %v1631_v8 = vmul.f32 %v1629_v62, %v1629_v62 }
0x10b7   :  { %v1633_v13 = vsel %vm418_vm2, %v1631_v8, 0.0 }
0x10c1   :  { %1625 = vadd.xlane.f32.xlu0 %v1624_v48 }
0x1115   :  { %v2516_v16 = vpop.xlane.xlu0 %2515 }
0x1116   :  { %6285 = vrcp.f32 %v2516_v16 }
0x1119   :  { %v2519_v29 = vpop.xlane.xlu0 %2518 }
0x111a   :  { %6287 = vrcp.f32 %v2519_v29 }
0x111d   :  { %v2601_v34 = vpop.permute.xlu0 %2600 }
0x111e   :  { %5821 = vmatpush3.msra.mxu1 %v2601_v34  ;;  %v5374_v34 = vld [vmem:[%s7499_s7] ss:$0 sm:$0xff] }
0x1120   :  { %v6286_v35 = vpop.eup %6285 }
0x1121   :  { %v2522_v36 = vmul.f32 %v6286_v35, %v6282_v9 }
0x1123   :  { %5471 = vst.msk [vmem:[%s6777_s21 + $0x10] sm:$0xff] %vm700_vm7, %v2522_v36  ;;  %5818 = vmatmul.mubr.msk.f32.vlgmr.msra.gmra.mrb[22].mxu0 %vm700_vm7, %v2522_v36 }
0x1124   :  { %v6288_v11 = vpop.eup %6287  ;;  %6078 = vmatpush3.bf16.msra.mxu0 %v6075_v38  ;;  %v6083_v38 = vpack.c.bf16 %v2893_v39, %v2892_v43 }
0x1125   :  { %v2523_v52 = vmul.f32 %v6288_v11, %v6284_v10  ;;  %6080 = vmatprep.subr.bf16.mxu0 %v6079_v41 }
0x1126   :  { %6084 = vmatprep.subr.bf16.mxu1 %v6083_v38 }
0x1127   :  { %5472 = vst.msk [vmem:[%s6777_s21 + $0x18] sm:$0xff] %vm700_vm7, %v2523_v52  ;;  %5823 = vmatmul.mubr.msk.f32.vlgmr.msra.gmra.mrb[22].mxu1 %vm700_vm7, %v2523_v52  ;;  %s7497_s21 = sld [smem:[#allocation35_spill]] }
0x1128   :  { %6086 = vmatpush3.bf16.msra.mxu1 %v6083_v38 }
0x112d   :  { %v2984_v15 = vld [vmem:[%s7497_s21] sm:$0xff]  ;;  %v2985_v17 = vld [vmem:[%s7497_s21 + $0x8] sm:$0xff]  ;;  %v2986_v18 = vld [vmem:[%s7497_s21 + $0x10] sm:$0xff] }
0x112e   :  { %v2987_v19 = vld [vmem:[%s7497_s21 + $0x18] sm:$0xff] }
0x114e   :  { %v1626_v49 = vpop.xlane.xlu0 %1625 }
0x114f   :  { %v1628_v54 = vmul.f32 0.03125, %v1626_v49 }
0x1151   :  { %v1630_v59 = vsub.f32 %v1618_v14, %v1628_v54  ;;  %v5373_v14 = vld [vmem:[%s7498_s2] ss:$0 sm:$0xff] }
0x11f6   :  { %v2596_v42 = vpop.f32.mrb[22].mxu0 }
0x11f7   :  { %v5819_v45 = vpop.f32.mrb[23].mxu0  ;;  %5829 = vmatprep.mubr.msk.f32.mxu0 %vm289_vm1, %v2596_v42 }
0x11fa   :  { %v2672_v46 = vpop.f32.mrb[22].mxu1 }
0x11fb   :  { %v5824_v47 = vpop.f32.mrb[23].mxu1  ;;  %5830 = vmatmul.mubr.msk.f32.vlgmr.msra.gmra.mrb[24].mxu0 %vm289_vm1, %v2672_v46 }
0x11fc   :  { %6082 = vmatpush3.bf16.msra.mxu0 %v6079_v41  ;;  %5836 = vmatprep.mubr.msk.f32.mxu0 %vm289_vm1, %v7109_v0  ;;  %v6087_v41 = vpack.c.bf16 %v2895_v40, %v2894_v37 }
0x11fe   :  { %6088 = vmatprep.subr.bf16.mxu1 %v6087_v41 }
0x11ff   :  { %6090 = vmatpush3.bf16.msra.mxu1 %v6087_v41 }
0x1200   :  { %5861 = vmatprep.subr.mxu1 %v6480_v4 }
0x1203   :  { %5837 = vmatmul.mubr.msk.f32.vlgmr.msra.gmra.mrb[24].mxu0 %vm289_vm1, %v7111_v6  ;;  %v1632_v6 = vmul.f32 %v1630_v59, %v1630_v59 }
0x1205   :  { %v1636_v12 = vsel %vm418_vm2, %v1632_v6, 0.0 }
0x12d6   :  { %v5838_v57 = vpop.f32.mrb[24].mxu0 }
0x12d7   :  { %v2845_v60 = vadd.f32 %v5838_v57, %v5403_v56  ;;  %v2829_v61 = vpop.f32.mrb[25].mxu0 }
0x12d8   :  { %v2844_v63 = vadd.f32 %v5403_v56, %v2829_v61 }
0x12d9   :  { %v2847_v44 = vadd.f32 %v2845_v60, %v7019_v5  ;;  %v6091_v5 = vpack.c.bf16 %v2985_v17, %v2984_v15  ;;  %v5405_v60 = vld [vmem:[%s7502_s9] ss:$0 sm:$0xff] }
0x12da   :  { %v2846_v0 = vadd.f32 %v2844_v63, %v7017_v3  ;;  %v6095_v3 = vpack.c.bf16 %v2987_v19, %v2986_v18 }
0x12db   :  { %v2853_v2 = vsel %vm418_vm2, %v2847_v44, 0.0  ;;  %6092 = vmatprep.subr.bf16.mxu0 %v6091_v5 }
0x12dc   :  { %2854 = vadd.xlane.f32.xlu0 %v2853_v2  ;;  %v2850_v7 = vsel %vm418_vm2, %v2846_v0, 0.0  ;;  %6094 = vmatpush3.bf16.msra.mxu0 %v6091_v5 }
0x12dd   :  { %2851 = vadd.xlane.f32.xlu1 %v2850_v7  ;;  %6096 = vmatprep.subr.bf16.mxu0 %v6095_v3 }
0x12e0   :  { %1637 = vadd.xlane.f32.xlu0 %v1636_v12  ;;  %6098 = vmatpush3.bf16.msra.mxu0 %v6095_v3  ;;  %v5406_v12 = vld [vmem:[%s7504_s29] ss:$0 sm:$0xff] }
0x12e1   :  { %1634 = vadd.xlane.f32.xlu1 %v1633_v13  ;;  %5871 = vmatprep.subr.mxu0 %v6480_v4 }
0x1369   :  { %v2855_v21 = vpop.xlane.xlu0 %2854 }
0x136a   :  { %v2857_v22 = vmul.f32 0.03125, %v2855_v21  ;;  %v2852_v23 = vpop.xlane.xlu1 %2851 }
0x136b   :  { %v2856_v24 = vmul.f32 0.03125, %v2852_v23 }
0x136c   :  { %v2859_v25 = vsub.f32 %v2847_v44, %v2857_v22 }
0x136d   :  { %v2858_v26 = vsub.f32 %v2846_v0, %v2856_v24  ;;  %v1638_v27 = vpop.xlane.xlu0 %1637  ;;  %v5409_v0 = vld [vmem:[%s7503_s5] ss:$0 sm:$0xff] }
0x136e   :  { %v1640_v28 = vmul.f32 0.03125, %v1638_v27  ;;  %v1635_v30 = vpop.xlane.xlu1 %1634  ;;  %v2861_v20 = vmul.f32 %v2859_v25, %v2859_v25 }
0x136f   :  { %v1639_v31 = vmul.f32 0.03125, %v1635_v30  ;;  %v2860_v32 = vmul.f32 %v2858_v26, %v2858_v26 }
0x1370   :  { %v1642_v33 = vadd.f32 1e-05, %v1640_v28  ;;  %v2865_v9 = vsel %vm418_vm2, %v2861_v20, 0.0 }
0x1371   :  { %v1641_v50 = vadd.f32 1e-05, %v1639_v31  ;;  %2866 = vadd.xlane.f32.xlu0 %v2865_v9  ;;  %v2862_v10 = vsel %vm418_vm2, %v2860_v32, 0.0 }
0x1372   :  { %6289 = vrsqrt.f32 %v1642_v33  ;;  %2863 = vadd.xlane.f32.xlu1 %v2862_v10 }
0x1373   :  { %6291 = vrsqrt.f32 %v1641_v50 }
0x137c   :  { %v6290_v53 = vpop.eup %6289 }
0x137d   :  { %v6292_v48 = vpop.eup %6291  ;;  %v1646_v16 = vmul.f32 %v6290_v53, %v1630_v59 }
0x137e   :  { %v1645_v29 = vmul.f32 %v6292_v48, %v1629_v62 }
0x137f   :  { %v1654_v35 = vmul.f32 %v5373_v14, %v1646_v16 }
0x1380   :  { %v1653_v36 = vmul.f32 %v5373_v14, %v1645_v29 }
0x1381   :  { %v1662_v52 = vadd.f32 %v5374_v34, %v1654_v35 }
0x1382   :  { %v1661_v11 = vadd.f32 %v5374_v34, %v1653_v36 }
0x1384   :  { %5858 = vmatprep.mubr.msk.f32.mxu0 %vm418_vm2, %v1661_v11 }
0x1385   :  { %5859 = vmatmul.mubr.msk.f32.vlgmr.msra.gmra.mrb[26].mxu0 %vm418_vm2, %v1662_v52 }
0x1386   :  { %5873 = vmatprep.mubr.msk.f32.mxu0 %vm6479_vm0, %v6480_v4 }
0x13fe   :  { %v2867_v42 = vpop.xlane.xlu0 %2866 }
0x13ff   :  { %v2869_v45 = vmul.f32 0.03125, %v2867_v42  ;;  %v2864_v46 = vpop.xlane.xlu1 %2863 }
0x1400   :  { %v2868_v47 = vmul.f32 0.03125, %v2864_v46 }
0x1401   :  { %v2871_v49 = vadd.f32 1e-05, %v2869_v45 }
0x1402   :  { %v2870_v51 = vadd.f32 1e-05, %v2868_v47 }
0x1403   :  { %6293 = vrsqrt.f32 %v2871_v49 }
0x1404   :  { %6295 = vrsqrt.f32 %v2870_v51 }
0x140d   :  { %v6294_v54 = vpop.eup %6293 }
0x140e   :  { %v6296_v56 = vpop.eup %6295  ;;  %v2875_v57 = vmul.f32 %v6294_v54, %v2859_v25 }
0x140f   :  { %v2874_v59 = vmul.f32 %v6296_v56, %v2858_v26 }
0x1410   :  { %v2883_v61 = vmul.f32 %v5404_v55, %v2875_v57 }
0x1411   :  { %v2882_v62 = vmul.f32 %v5404_v55, %v2874_v59 }
0x1412   :  { %v7181_v44 = vadd.f32 %v5405_v60, %v2883_v61 }
0x1413   :  { %v7179_v63 = vadd.f32 %v5405_v60, %v2882_v62 }
0x1415   :  { %5847 = vmatprep.mubr.msk.f32.mxu1 %vm418_vm2, %v7179_v63 }
0x1416   :  { %5848 = vmatmul.mubr.msk.f32.vlgmr.msra.gmra.mrb[24].mxu1 %vm418_vm2, %v7181_v44 }
0x1417   :  { %5863 = vmatprep.mubr.msk.f32.mxu1 %vm6479_vm0, %v6480_v4 }
0x1458   :  { %v5860_v2 = vpop.f32.mrb[26].mxu0 }
0x1459   :  { %v7190_v6 = vadd.f32 %v5860_v2, %v5409_v0  ;;  %v3067_v7 = vpop.f32.mrb[27].mxu0 }
0x145a   :  { %v7192_v8 = vadd.f32 %v5409_v0, %v3067_v7 }
0x145c   :  { %5862 = vmatpush3.xpose.msk.msra.mxu1 %vm289_vm1, %v7192_v8 }
0x145d   :  { %5866 = vmatprep.subr.mxu1 %v6480_v4 }
0x14e9   :  { %v5849_v13 = vpop.f32.mrb[24].mxu1 }
0x14ea   :  { %v2975_v15 = vpop.f32.mrb[25].mxu1  ;;  %v2981_v5 = vadd.f32 %v5849_v13, %v5406_v12 }
0x14eb   :  { %v2976_v17 = vadd.f32 %v5406_v12, %v2975_v15 }
0x14ed   :  { %5864 = vmatmul.mubr.msk.f32.vlgmr.msra.gmra.mrb[26].mxu1 %vm289_vm1, %v2976_v17 }
0x14ee   :  { %5867 = vmatpush3.xpose.msk.msra.mxu1 %vm289_vm1, %v7190_v6  ;;  %5868 = vmatprep.mubr.msk.f32.mxu1 %vm6479_vm0, %v6480_v4 }
0x14ef   :  { %5876 = vmatprep.subr.mxu1 %v6480_v4 }
0x14f1   :  { %5869 = vmatmul.mubr.msk.f32.vlgmr.msra.gmra.mrb[28].mxu1 %vm289_vm1, %v2981_v5 }
0x14f2   :  { %5878 = vmatprep.mubr.msk.f32.mxu1 %vm6479_vm0, %v6480_v4 }
0x15c0   :  { %v3153_v18 = vpop.f32.mrb[26].mxu1 }
0x15c1   :  { %v3233_v19 = vmul.f32 0.25, %v3153_v18  ;;  %v5865_v3 = vpop.f32.mrb[27].mxu1 }
0x15c3   :  { %v3235_v21 = vsel %vm6869_vm6, %v3233_v19, -1e+09 }
0x15c4   :  { %v3229_v22 = vpop.f32.mrb[28].mxu1  ;;  %v3237_v23 = vsel %vm700_vm7, %v3235_v21, -inf }
0x15c5   :  { %v3234_v24 = vmul.f32 0.25, %v3229_v22  ;;  %3238 = vmax.xlane.f32.xlu1 %v3237_v23  ;;  %v5870_v25 = vpop.f32.mrb[29].mxu1 }
0x15c7   :  { %v3236_v26 = vsel %vm6877_vm8, %v3234_v24, -1e+09 }
0x15c8   :  { %v3240_v27 = vsel %vm700_vm7, %v3236_v26, -inf }
0x15c9   :  { %3241 = vmax.xlane.f32.xlu0 %v3240_v27 }
0x15d6   :  { %3259 = vrot.lane.b32.xlu1 %v7192_v8, %s6482_s13 }
0x15da   :  { %3413 = vrot.lane.b32.xlu1 %v7192_v8, %s6486_s25 }
0x15de   :  { %3491 = vrot.lane.b32.xlu1 %v7190_v6, %s6486_s25 }
0x15df   :  { %3335 = vrot.lane.b32.xlu0 %v7190_v6, %s6482_s13  ;;  %s7505_s13 = sld [smem:[#allocation37_spill]] }
0x15e5   :  { %v3076_v23 = vld [vmem:[%s7505_s13] sm:$0xff]  ;;  %v3077_v24 = vld [vmem:[%s7505_s13 + $0x8] sm:$0xff] }
0x15e6   :  { %v6103_v25 = vpack.c.bf16 %v3077_v24, %v3076_v23 }
0x1652   :  { %v3239_v28 = vpop.xlane.xlu1 %3238 }
0x1653   :  { %v3243_v30 = vsub.f32 %v3235_v21, %v3239_v28  ;;  %v3079_v21 = vld [vmem:[%s7505_s13 + $0x18] sm:$0xff] }
0x1655   :  { %v3245_v20 = vmul.f32 1.442695, %v3243_v30 }
0x1656   :  { %v3260_v31 = vpop.permute.xlu1 %3259  ;;  %v3242_v32 = vpop.xlane.xlu0 %3241 }
0x1657   :  { %6297 = vpow2.f32 %v3245_v20  ;;  %v3244_v33 = vsub.f32 %v3236_v26, %v3242_v32  ;;  %5872 = vmatpush3.msra.mxu0 %v3260_v31 }
0x1658   :  { %5881 = vmatprep.subr.mxu0 %v6480_v4 }
0x1659   :  { %v3247_v9 = vmul.f32 1.442695, %v3244_v33 }
0x165a   :  { %v3336_v50 = vpop.permute.xlu0 %3335  ;;  %v3414_v16 = vpop.permute.xlu1 %3413 }
0x165b   :  { %6299 = vpow2.f32 %v3247_v9  ;;  %5877 = vmatpush3.msra.mxu1 %v3336_v50 }
0x165c   :  { %5886 = vmatprep.subr.mxu1 %v6480_v4 }
0x165e   :  { %v3492_v29 = vpop.permute.xlu1 %3491 }
0x1661   :  { %v6298_v10 = vpop.eup %6297 }
0x1662   :  { %v3249_v53 = vsel %vm700_vm7, %v6298_v10, 0.0 }
0x1663   :  { %3250 = vadd.xlane.f32.xlu1 %v3249_v53 }
0x1665   :  { %v6300_v14 = vpop.eup %6299 }
0x1666   :  { %v3252_v48 = vsel %vm700_vm7, %v6300_v14, 0.0 }
0x1667   :  { %3253 = vadd.xlane.f32.xlu0 %v3252_v48 }
0x1674   :  { %3489 = vrot.lane.b32.xlu1 %v2981_v5, %s6486_s25 }
0x167d   :  { %3411 = vrot.lane.b32.xlu0 %v2976_v17, %s6486_s25  ;;  %s7508_s25 = sld [smem:[#allocation43_spill]] }
0x16f0   :  { %v3251_v34 = vpop.xlane.xlu1 %3250 }
0x16f1   :  { %6301 = vrcp.f32 %v3251_v34 }
0x16f4   :  { %v3254_v35 = vpop.xlane.xlu0 %3253  ;;  %v3490_v38 = vpop.permute.xlu1 %3489 }
0x16f5   :  { %6303 = vrcp.f32 %v3254_v35 }
0x16f8   :  { %v3412_v39 = vpop.permute.xlu0 %3411 }
0x16fb   :  { %v6302_v36 = vpop.eup %6301 }
0x16fc   :  { %v3257_v11 = vmul.f32 %v6302_v36, %v6298_v10 }
0x16fe   :  { %5253 = vst.msk [vmem:[%s6782_s20] sm:$0xff] %vm700_vm7, %v3257_v11  ;;  %5874 = vmatmul.mubr.msk.f32.vlgmr.msra.gmra.mrb[28].mxu0 %vm700_vm7, %v3257_v11 }
0x16ff   :  { %v6304_v52 = vpop.eup %6303  ;;  %5882 = vmatpush3.xpose.msk.msra.mxu0 %vm289_vm1, %v3414_v16  ;;  %5883 = vmatprep.mubr.msk.f32.mxu0 %vm6479_vm0, %v6480_v4 }
0x1700   :  { %v3258_v43 = vmul.f32 %v6304_v52, %v6300_v14  ;;  %5891 = vmatprep.subr.mxu0 %v6480_v4 }
0x1702   :  { %5254 = vst.msk [vmem:[%s6782_s20 + $0x8] sm:$0xff] %vm700_vm7, %v3258_v43  ;;  %5879 = vmatmul.mubr.msk.f32.vlgmr.msra.gmra.mrb[30].mxu1 %vm700_vm7, %v3258_v43  ;;  %5884 = vmatmul.mubr.msk.f32.vlgmr.msra.gmra.mrb[30].mxu0 %vm289_vm1, %v3412_v39 }
0x1703   :  { %5887 = vmatpush3.xpose.msk.msra.mxu1 %vm289_vm1, %v3492_v29  ;;  %5888 = vmatprep.mubr.msk.f32.mxu1 %vm6479_vm0, %v6480_v4 }
0x1704   :  { %5896 = vmatprep.subr.mxu1 %v6480_v4  ;;  %5893 = vmatprep.mubr.msk.f32.mxu0 %vm6479_vm0, %v6480_v4 }
0x1706   :  { %5889 = vmatmul.mubr.msk.f32.vlgmr.msra.gmra.mrb[32].mxu1 %vm289_vm1, %v3490_v38 }
0x1707   :  { %5898 = vmatprep.mubr.msk.f32.mxu1 %vm6479_vm0, %v6480_v4  ;;  %vm4320_vm0 = vcmask 1041408  }
0x17d1   :  { %v7247_v37 = vpop.f32.mrb[28].mxu0 }
0x17d2   :  { %v5875_v40 = vpop.f32.mrb[29].mxu0 }
0x17d5   :  { %v7249_v41 = vpop.f32.mrb[30].mxu1  ;;  %v3485_v42 = vpop.f32.mrb[30].mxu0 }
0x17d6   :  { %v3567_v45 = vmul.f32 0.25, %v3485_v42  ;;  %v5880_v46 = vpop.f32.mrb[31].mxu1  ;;  %v5885_v47 = vpop.f32.mrb[31].mxu0  ;;  %v4055_v42 = vld [vmem:[%s7508_s25] sm:$0xff] }
0x17d7   :  { %v4057_v46 = vld [vmem:[%s7508_s25 + $0x10] sm:$0xff] }
0x17d8   :  { %v3569_v49 = vsel %vm6869_vm6, %v3567_v45, -1e+09  ;;  %v4056_v45 = vld [vmem:[%s7508_s25 + $0x8] sm:$0xff]  ;;  %vm4500_vm6 = vcmask 1045504  }
0x17d9   :  { %v3563_v51 = vpop.f32.mrb[32].mxu1  ;;  %v3571_v54 = vsel %vm700_vm7, %v3569_v49, -inf  ;;  %v6115_v47 = vpack.c.bf16 %v4056_v45, %v4055_v42 }
0x17da   :  { %v3568_v55 = vmul.f32 0.25, %v3563_v51  ;;  %3572 = vmax.xlane.f32.xlu0 %v3571_v54  ;;  %v5890_v56 = vpop.f32.mrb[33].mxu1  ;;  %v4059_v54 = vld [vmem:[%s7508_s25 + $0x20] sm:$0xff] }
0x17dc   :  { %v3570_v4 = vsel %vm6877_vm8, %v3568_v55, -1e+09  ;;  %v4060_v55 = vld [vmem:[%s7508_s25 + $0x28] sm:$0xff]  ;;  %vm5245_vm8 = vcmask 7168  }
0x17dd   :  { %v3574_v57 = vsel %vm700_vm7, %v3570_v4, -inf  ;;  %v6123_v56 = vpack.c.bf16 %v4060_v55, %v4059_v54  ;;  %v5438_v55 = vld [vmem:[%s7515_s27] ss:$0 sm:$0xff] }
0x17de   :  { %3575 = vmax.xlane.f32.xlu1 %v3574_v57 }
0x17ef   :  { %3593 = vrot.lane.b32.xlu1 %v7192_v8, %s6485_s17 }
0x1867   :  { %v3573_v59 = vpop.xlane.xlu0 %3572 }
0x1868   :  { %v3577_v60 = vsub.f32 %v3569_v49, %v3573_v59  ;;  %v4058_v49 = vld [vmem:[%s7508_s25 + $0x18] sm:$0xff] }
0x1869   :  { %v6119_v51 = vpack.c.bf16 %v4058_v49, %v4057_v46 }
0x186a   :  { %v3579_v61 = vmul.f32 1.442695, %v3577_v60 }
0x186b   :  { %v3576_v58 = vpop.xlane.xlu1 %3575 }
0x186c   :  { %6305 = vpow2.f32 %v3579_v61  ;;  %v3578_v62 = vsub.f32 %v3570_v4, %v3576_v58 }
0x186e   :  { %v3581_v0 = vmul.f32 1.442695, %v3578_v62 }
0x186f   :  { %v3594_v2 = vpop.permute.xlu1 %3593 }
0x1870   :  { %6307 = vpow2.f32 %v3581_v0  ;;  %5892 = vmatpush3.msra.mxu0 %v3594_v2  ;;  %v5429_v0 = vld [vmem:[%s7509_s8] ss:$0 sm:$0xff] }
0x1876   :  { %v6306_v7 = vpop.eup %6305 }
0x1877   :  { %v3583_v1 = vsel %vm700_vm7, %v6306_v7, 0.0 }
0x1878   :  { %3584 = vadd.xlane.f32.xlu0 %v3583_v1 }
0x187a   :  { %v6308_v12 = vpop.eup %6307 }
0x187b   :  { %v3586_v13 = vsel %vm700_vm7, %v6308_v12, 0.0 }
0x187c   :  { %3587 = vadd.xlane.f32.xlu0 %v3586_v13 }
0x1892   :  { %3669 = vrot.lane.b32.xlu0 %v7190_v6, %s6485_s17  ;;  %v3078_v6 = vld [vmem:[%s7505_s13 + $0x10] sm:$0xff]  ;;  %s7506_s17 = sld [smem:[#allocation38_spill]] }
0x1893   :  { %v6099_v22 = vpack.c.bf16 %v3079_v21, %v3078_v6 }
0x1895   :  { %6100 = vmatprep.subr.bf16.mxu0 %v6099_v22 }
0x1898   :  { %v5428_v20 = vld [vmem:[%s7506_s17] ss:$0 sm:$0xff] }
0x1905   :  { %v3585_v8 = vpop.xlane.xlu0 %3584 }
0x1906   :  { %6309 = vrcp.f32 %v3585_v8 }
0x1909   :  { %v3588_v15 = vpop.xlane.xlu0 %3587 }
0x190a   :  { %6311 = vrcp.f32 %v3588_v15 }
0x190d   :  { %v3670_v17 = vpop.permute.xlu0 %3669 }
0x190e   :  { %5897 = vmatpush3.msra.mxu1 %v3670_v17 }
0x1910   :  { %v6310_v5 = vpop.eup %6309 }
0x1911   :  { %v3591_v18 = vmul.f32 %v6310_v5, %v6306_v7  ;;  %v4061_v5 = vld [vmem:[%s7508_s25 + $0x30] sm:$0xff] }
0x1913   :  { %5473 = vst.msk [vmem:[%s6782_s20 + $0x10] sm:$0xff] %vm700_vm7, %v3591_v18  ;;  %5894 = vmatmul.mubr.msk.f32.vlgmr.msra.gmra.mrb[32].mxu0 %vm700_vm7, %v3591_v18  ;;  %v4062_v18 = vld [vmem:[%s7508_s25 + $0x38] sm:$0xff] }
0x1914   :  { %v6312_v19 = vpop.eup %6311  ;;  %6102 = vmatpush3.bf16.msra.mxu0 %v6099_v22 }
0x1915   :  { %v3592_v3 = vmul.f32 %v6312_v19, %v6308_v12  ;;  %6104 = vmatprep.subr.bf16.mxu0 %v6103_v25  ;;  %v5430_v12 = vld [vmem:[%s7510_s14] ss:$0 sm:$0xff]  ;;  %v6127_v19 = vpack.c.bf16 %v4062_v18, %v4061_v5 }
0x1917   :  { %5474 = vst.msk [vmem:[%s6782_s20 + $0x18] sm:$0xff] %vm700_vm7, %v3592_v3  ;;  %5899 = vmatmul.mubr.msk.f32.vlgmr.msra.gmra.mrb[34].mxu1 %vm700_vm7, %v3592_v3  ;;  %s7507_s20 = sld [smem:[#allocation41_spill]]  ;;  %v5431_v3 = vld [vmem:[%s7511_s19] ss:$0 sm:$0xff]  ;;  %vm4591_vm7 = vcmask 1044480  }
0x191d   :  { %v3961_v43 = vld [vmem:[%s7507_s20] sm:$0xff]  ;;  %v3962_v39 = vld [vmem:[%s7507_s20 + $0x8] sm:$0xff]  ;;  %v3964_v40 = vld [vmem:[%s7507_s20 + $0x18] sm:$0xff] }
0x191e   :  { %v6107_v38 = vpack.c.bf16 %v3962_v39, %v3961_v43  ;;  %v4200_v43 = vld [vmem:[%s7513_s30 + $0x18] sm:$0xff] }
0x1920   :  { %6108 = vmatprep.subr.bf16.mxu1 %v6107_v38 }
0x1921   :  { %6110 = vmatpush3.bf16.msra.mxu1 %v6107_v38 }
0x19e6   :  { %v3665_v26 = vpop.f32.mrb[32].mxu0 }
0x19e7   :  { %v5895_v27 = vpop.f32.mrb[33].mxu0  ;;  %5905 = vmatprep.mubr.msk.f32.mxu0 %vm289_vm1, %v3665_v26  ;;  %v5434_v26 = vld [vmem:[%s7512_s24] ss:$0 sm:$0xff] }
0x19ea   :  { %v3741_v28 = vpop.f32.mrb[34].mxu1 }
0x19eb   :  { %v5900_v30 = vpop.f32.mrb[35].mxu1  ;;  %5906 = vmatmul.mubr.msk.f32.vlgmr.msra.gmra.mrb[34].mxu0 %vm289_vm1, %v3741_v28 }
0x19ec   :  { %6106 = vmatpush3.bf16.msra.mxu0 %v6103_v25  ;;  %5912 = vmatprep.mubr.msk.f32.mxu0 %vm289_vm1, %v7247_v37  ;;  %v3963_v37 = vld [vmem:[%s7507_s20 + $0x10] sm:$0xff] }
0x19ed   :  { %6116 = vmatprep.subr.bf16.mxu0 %v6115_v47 }
0x19f3   :  { %5913 = vmatmul.mubr.msk.f32.vlgmr.msra.gmra.mrb[34].mxu0 %vm289_vm1, %v7249_v41  ;;  %v6111_v41 = vpack.c.bf16 %v3964_v40, %v3963_v37 }
0x19f4   :  { %6118 = vmatpush3.bf16.msra.mxu0 %v6115_v47  ;;  %v5437_v47 = vld [vmem:[%s7514_s6] ss:$0 sm:$0xff] }
0x19f5   :  { %6112 = vmatprep.subr.bf16.mxu1 %v6111_v41  ;;  %6120 = vmatprep.subr.bf16.mxu0 %v6119_v51 }
0x19f6   :  { %6114 = vmatpush3.bf16.msra.mxu1 %v6111_v41 }
0x19f8   :  { %6122 = vmatpush3.bf16.msra.mxu0 %v6119_v51 }
0x19f9   :  { %6124 = vmatprep.subr.bf16.mxu0 %v6123_v56 }
0x19fc   :  { %6126 = vmatpush3.bf16.msra.mxu0 %v6123_v56 }
0x19fd   :  { %6128 = vmatprep.subr.bf16.mxu0 %v6127_v19 }
0x1a00   :  { %6130 = vmatpush3.bf16.msra.mxu0 %v6127_v19 }
0x1ac6   :  { %v5914_v31 = vpop.f32.mrb[34].mxu0 }
0x1ac7   :  { %v3914_v32 = vadd.f32 %v5914_v31, %v5428_v20  ;;  %v3898_v33 = vpop.f32.mrb[35].mxu0 }
0x1ac8   :  { %v3913_v9 = vadd.f32 %v5428_v20, %v3898_v33 }
0x1ac9   :  { %v3916_v50 = vadd.f32 %v3914_v32, %v7181_v44 }
0x1aca   :  { %v3915_v10 = vadd.f32 %v3913_v9, %v7179_v63 }
0x1acb   :  { %v3922_v53 = vsel %vm418_vm2, %v3916_v50, 0.0 }
0x1acc   :  { %3923 = vadd.xlane.f32.xlu0 %v3922_v53  ;;  %v3919_v14 = vsel %vm418_vm2, %v3915_v10, 0.0 }
0x1acd   :  { %3920 = vadd.xlane.f32.xlu1 %v3919_v14 }
0x1b59   :  { %v3924_v48 = vpop.xlane.xlu0 %3923 }
0x1b5a   :  { %v3926_v16 = vmul.f32 0.03125, %v3924_v48  ;;  %v3921_v29 = vpop.xlane.xlu1 %3920 }
0x1b5b   :  { %v3925_v34 = vmul.f32 0.03125, %v3921_v29 }
0x1b5c   :  { %v3928_v35 = vsub.f32 %v3916_v50, %v3926_v16 }
0x1b5d   :  { %v3927_v36 = vsub.f32 %v3915_v10, %v3925_v34 }
0x1b5e   :  { %v3930_v11 = vmul.f32 %v3928_v35, %v3928_v35 }
0x1b5f   :  { %v3929_v44 = vmul.f32 %v3927_v36, %v3927_v36 }
0x1b60   :  { %v3934_v63 = vsel %vm418_vm2, %v3930_v11, 0.0  ;;  %v4197_v11 = vld [vmem:[%s7513_s30] sm:$0xff] }
0x1b61   :  { %3935 = vadd.xlane.f32.xlu0 %v3934_v63  ;;  %v3931_v52 = vsel %vm418_vm2, %v3929_v44, 0.0  ;;  %v4198_v44 = vld [vmem:[%s7513_s30 + $0x8] sm:$0xff] }
0x1b62   :  { %3932 = vadd.xlane.f32.xlu1 %v3931_v52  ;;  %v6131_v63 = vpack.c.bf16 %v4198_v44, %v4197_v11  ;;  %v4199_v52 = vld [vmem:[%s7513_s30 + $0x10] sm:$0xff] }
0x1b63   :  { %v6135_v39 = vpack.c.bf16 %v4200_v43, %v4199_v52 }
0x1b64   :  { %6132 = vmatprep.subr.bf16.mxu1 %v6131_v63 }
0x1bee   :  { %v3936_v4 = vpop.xlane.xlu0 %3935 }
0x1bef   :  { %v3938_v57 = vmul.f32 0.03125, %v3936_v4  ;;  %v3933_v59 = vpop.xlane.xlu1 %3932 }
0x1bf0   :  { %v3937_v60 = vmul.f32 0.03125, %v3933_v59 }
0x1bf1   :  { %v3940_v61 = vadd.f32 1e-05, %v3938_v57 }
0x1bf2   :  { %v3939_v58 = vadd.f32 1e-05, %v3937_v60  ;;  %v4301_v60 = vld [vmem:[%s7516_s15] sm:$0xff] }
0x1bf3   :  { %6313 = vrsqrt.f32 %v3940_v61  ;;  %v4337_v61 = vrot.slane %v4301_v60, 4 }
0x1bf4   :  { %6315 = vrsqrt.f32 %v3939_v58  ;;  %v5439_v58 = vld [vmem:[#allocation5] ss:$0 sm:$0xff] }
0x1bfd   :  { %v6314_v62 = vpop.eup %6313 }
0x1bfe   :  { %v6316_v2 = vpop.eup %6315  ;;  %v3944_v7 = vmul.f32 %v6314_v62, %v3928_v35 }
0x1bff   :  { %v3943_v1 = vmul.f32 %v6316_v2, %v3927_v36 }
0x1c00   :  { %v3952_v13 = vmul.f32 %v5429_v0, %v3944_v7 }
0x1c01   :  { %v3951_v8 = vmul.f32 %v5429_v0, %v3943_v1 }
0x1c02   :  { %v3960_v17 = vadd.f32 %v5430_v12, %v3952_v13 }
0x1c03   :  { %v3959_v15 = vadd.f32 %v5430_v12, %v3951_v8 }
0x1c05   :  { %5923 = vmatprep.mubr.msk.f32.mxu1 %vm418_vm2, %v3959_v15 }
0x1c06   :  { %5924 = vmatmul.mubr.msk.f32.vlgmr.msra.gmra.mrb[36].mxu1 %vm418_vm2, %v3960_v17 }
0x1c07   :  { %6134 = vmatpush3.bf16.msra.mxu1 %v6131_v63 }
0x1c08   :  { %6136 = vmatprep.subr.bf16.mxu1 %v6135_v39 }
0x1c0b   :  { %6138 = vmatpush3.bf16.msra.mxu1 %v6135_v39 }
0x1c0c   :  { %5956 = vmatprep.subr.msk.mxu1 %vm1685_vm9, %v4337_v61 }
0x1cd9   :  { %v5925_v6 = vpop.f32.mrb[36].mxu1 }
0x1cda   :  { %v4050_v21 = vadd.f32 %v5925_v6, %v5431_v3  ;;  %v4044_v22 = vpop.f32.mrb[37].mxu1 }
0x1cdb   :  { %v4045_v23 = vadd.f32 %v5431_v3, %v4044_v22 }
0x1cdc   :  { %v4054_v25 = vmax.f32 %v4050_v21, 0.0 }
0x1cdd   :  { %v4053_v24 = vmax.f32 %v4045_v23, 0.0 }
0x1cdf   :  { %5942 = vmatprep.mubr.msk.f32.mxu0 %vm1535_vm11, %v4053_v24  ;;  %v4302_v24 = vld [vmem:[%s7516_s15 + $0x8] sm:$0xff] }
0x1ce0   :  { %5943 = vmatmul.mubr.msk.f32.vlgmr.msra.gmra.mrb[36].mxu0 %vm1535_vm11, %v4054_v25 }
0x1db3   :  { %v5944_v27 = vpop.f32.mrb[36].mxu0 }
0x1db4   :  { %v4148_v28 = vadd.f32 %v5944_v27, %v5434_v26  ;;  %v4142_v30 = vpop.f32.mrb[37].mxu0 }
0x1db5   :  { %v4143_v20 = vadd.f32 %v5434_v26, %v4142_v30 }
0x1db6   :  { %v4152_v31 = vadd.f32 %v4148_v28, %v3960_v17 }
0x1db7   :  { %v4151_v32 = vadd.f32 %v4143_v20, %v3959_v15 }
0x1db8   :  { %v4158_v33 = vsel %vm418_vm2, %v4152_v31, 0.0 }
0x1db9   :  { %4159 = vadd.xlane.f32.xlu0 %v4158_v33  ;;  %v4155_v9 = vsel %vm418_vm2, %v4151_v32, 0.0 }
0x1dba   :  { %4156 = vadd.xlane.f32.xlu1 %v4155_v9 }
0x1e46   :  { %v4160_v50 = vpop.xlane.xlu0 %4159 }
0x1e47   :  { %v4162_v10 = vmul.f32 0.03125, %v4160_v50  ;;  %v4157_v53 = vpop.xlane.xlu1 %4156 }
0x1e48   :  { %v4161_v14 = vmul.f32 0.03125, %v4157_v53 }
0x1e49   :  { %v4164_v48 = vsub.f32 %v4152_v31, %v4162_v10  ;;  %v4598_v31 = vrot.slane %v4302_v24, 4 }
0x1e4a   :  { %v4163_v16 = vsub.f32 %v4151_v32, %v4161_v14  ;;  %v4303_v14 = vld [vmem:[%s7516_s15 + $0x10] sm:$0xf] }
0x1e4b   :  { %v4166_v29 = vmul.f32 %v4164_v48, %v4164_v48 }
0x1e4c   :  { %v4165_v34 = vmul.f32 %v4163_v16, %v4163_v16 }
0x1e4d   :  { %v4170_v35 = vsel %vm418_vm2, %v4166_v29, 0.0 }
0x1e4e   :  { %4171 = vadd.xlane.f32.xlu0 %v4170_v35  ;;  %v4167_v36 = vsel %vm418_vm2, %v4165_v34, 0.0 }
0x1e4f   :  { %4168 = vadd.xlane.f32.xlu1 %v4167_v36 }
0x1edb   :  { %v4172_v38 = vpop.xlane.xlu0 %4171 }
0x1edc   :  { %v4174_v37 = vmul.f32 0.03125, %v4172_v38  ;;  %v4169_v40 = vpop.xlane.xlu1 %4168 }
0x1edd   :  { %v4173_v41 = vmul.f32 0.03125, %v4169_v40  ;;  %v4306_v40 = vld [vmem:[%s7518_s3 + $0x10] sm:$0xff] }
0x1ede   :  { %v4176_v42 = vadd.f32 1e-05, %v4174_v37 }
0x1edf   :  { %v4175_v45 = vadd.f32 1e-05, %v4173_v41  ;;  %v4307_v41 = vld [vmem:[%s7518_s3 + $0x18] sm:$0xff] }
0x1ee0   :  { %6317 = vrsqrt.f32 %v4176_v42  ;;  %v6139_v42 = vpack.c.bf16 %v4307_v41, %v4306_v40 }
0x1ee1   :  { %6319 = vrsqrt.f32 %v4175_v45  ;;  %v4304_v45 = vld [vmem:[%s7518_s3] sm:$0xff] }
0x1ee2   :  { %6140 = vmatprep.subr.bf16.mxu0 %v6139_v42 }
0x1ee3   :  { %6142 = vmatpush3.bf16.msra.mxu0 %v6139_v42 }
0x1eea   :  { %v6318_v46 = vpop.eup %6317 }
0x1eeb   :  { %v6320_v49 = vpop.eup %6319  ;;  %v4180_v51 = vmul.f32 %v6318_v46, %v4164_v48  ;;  %v4305_v46 = vld [vmem:[%s7518_s3 + $0x8] sm:$0xff] }
0x1eec   :  { %v4179_v54 = vmul.f32 %v6320_v49, %v4163_v16  ;;  %v5459_v49 = vld [vmem:[#allocation6] ss:$0 sm:$0xff] }
0x1eed   :  { %v4188_v56 = vmul.f32 %v5437_v47, %v4180_v51 }
0x1eee   :  { %v4187_v4 = vmul.f32 %v5437_v47, %v4179_v54  ;;  %v6143_v47 = vpack.c.bf16 %v4305_v46, %v4304_v45 }
0x1eef   :  { %v4196_v59 = vadd.f32 %v5438_v55, %v4188_v56 }
0x1ef0   :  { %v4195_v57 = vadd.f32 %v5438_v55, %v4187_v4  ;;  %6144 = vmatprep.subr.bf16.mxu0 %v6143_v47 }
0x1ef2   :  { %5953 = vmatprep.mubr.msk.f32.mxu1 %vm418_vm2, %v4195_v57 }
0x1ef3   :  { %5954 = vmatmul.mubr.msk.f32.vlgmr.msra.gmra.mrb[38].mxu1 %vm418_vm2, %v4196_v59  ;;  %vm4329_vm2 = vcmask 1046528  }
0x1ef4   :  { %5957 = vmatpush3.msk.msra.mxu1 %vm1685_vm9, %v4337_v61 }
0x1ef5   :  { %5961 = vmatprep.subr.msk.mxu1 %vm1685_vm9, %v4301_v60 }
0x1fc6   :  { %v5955_v62 = vpop.f32.mrb[38].mxu1 }
0x1fc7   :  { %v7322_v0 = vadd.f32 %v5955_v62, %v5439_v58  ;;  %v4280_v2 = vpop.f32.mrb[39].mxu1 }
0x1fc8   :  { %v7324_v7 = vadd.f32 %v5439_v58, %v4280_v2 }
0x1fc9   :  { %v5443_v1 = vmul.f32 -1.442695, %v7322_v0  ;;  %v4317_v12 = vrot.slane %v7322_v0, 6  ;;  %5234 = vst.msk [vmem:[%s7517_s16 + $0x8] sm:$0xff] %vm1678_vm10, %v7322_v0 }
0x1fca   :  { %v5442_v13 = vmul.f32 -1.442695, %v7324_v7  ;;  %v4316_v8 = vrot.slane %v7324_v7, 6  ;;  %5233 = vst.msk [vmem:[%s7517_s16] sm:$0xff] %vm1678_vm10, %v7324_v7 }
0x1fcb   :  { %6321 = vpow2.f32 %v5443_v1  ;;  %v7337_v15 = vsel %vm4320_vm0, 0.0, %v4317_v12  ;;  %v4324_v17 = vsel %vm4320_vm0, %v4317_v12, 0.0 }
0x1fcc   :  { %6323 = vpow2.f32 %v5442_v13  ;;  %v4321_v5 = vsel %vm4320_vm0, 0.0, %v4316_v8  ;;  %v4323_v18 = vsel %vm4320_vm0, %v4316_v8, 0.0  ;;  %v4333_v19 = vrot.slane %v7337_v15, 1  ;;  %v4308_v13 = vld [vmem:[%s7518_s3 + $0x20] sm:$0xff]  ;;  %v4309_v8 = vld [vmem:[%s7518_s3 + $0x28] sm:$0xff] }
0x1fcd   :  { %v4330_v3 = vrot.slane %v4321_v5, 1  ;;  %v4331_v6 = vrot.slane %v4323_v18, 1  ;;  %v4334_v21 = vrot.slane %v4324_v17, 1  ;;  %v4501_v26 = vrot.slane %v4321_v5, 2 }
0x1fce   :  { %v4502_v27 = vrot.slane %v4323_v18, 2  ;;  %v4504_v33 = vrot.slane %v7337_v15, 2  ;;  %v4505_v9 = vrot.slane %v4324_v17, 2  ;;  %v4592_v50 = vrot.slane %v4321_v5, 3 }
0x1fcf   :  { %v4332_v22 = vsel %vm4329_vm2, %v4330_v3, %v4331_v6  ;;  %v4335_v23 = vsel %vm4329_vm2, %v4333_v19, %v4334_v21  ;;  %v4593_v10 = vrot.slane %v4323_v18, 3  ;;  %v4595_v34 = vrot.slane %v7337_v15, 3  ;;  %v4310_v3 = vld [vmem:[%s7518_s3 + $0x30] sm:$0xff]  ;;  %v4311_v6 = vld [vmem:[%s7518_s3 + $0x38] sm:$0xff] }
0x1fd0   :  { %5958 = vmatprep.mubr.msk.f32.mxu1 %vm1678_vm10, %v4332_v22  ;;  %v4503_v32 = vsel %vm4500_vm6, %v4501_v26, %v4502_v27  ;;  %v4506_v53 = vsel %vm4500_vm6, %v4504_v33, %v4505_v9  ;;  %v4596_v35 = vrot.slane %v4324_v17, 3  ;;  %v4682_v36 = vrot.slane %v4321_v5, 4  ;;  %v4312_v27 = vld [vmem:[%s7518_s3 + $0x40] sm:$0xff] }
0x1fd1   :  { %5959 = vmatmul.mubr.msk.f32.vlgmr.msra.gmra.mrb[40].mxu1 %vm1678_vm10, %v4335_v23  ;;  %v4594_v48 = vsel %vm4591_vm7, %v4592_v50, %v4593_v10  ;;  %v4683_v11 = vrot.slane %v4323_v18, 4  ;;  %v4685_v52 = vrot.slane %v7337_v15, 4  ;;  %v4686_v43 = vrot.slane %v4324_v17, 4 }
0x1fd2   :  { %5962 = vmatpush3.msk.msra.mxu1 %vm1685_vm9, %v4301_v60  ;;  %5963 = vmatprep.mubr.msk.f32.mxu1 %vm1678_vm10, %v4321_v5  ;;  %v4597_v44 = vsel %vm4591_vm7, %v4595_v34, %v4596_v35  ;;  %v6147_v18 = vpack.c.bf16 %v4309_v8, %v4308_v13  ;;  %v6151_v23 = vpack.c.bf16 %v4311_v6, %v4310_v3 }
0x1fd3   :  { %5966 = vmatprep.subr.msk.mxu1 %vm1685_vm9, %v4302_v24  ;;  %v4684_v63 = vsel %vm1685_vm9, %v4682_v36, %v4683_v11  ;;  %v4687_v39 = vsel %vm1685_vm9, %v4685_v52, %v4686_v43  ;;  %v5470_v36 = vld [vmem:[#allocation8] ss:$0 sm:$0xff] }
0x1fd5   :  { %v6322_v25 = vpop.eup %6321 }
0x1fd6   :  { %v6324_v28 = vpop.eup %6323  ;;  %v4296_v30 = vadd.f32 1.0, %v6322_v25 }
0x1fd7   :  { %v4295_v20 = vadd.f32 1.0, %v6324_v28  ;;  %v4313_v28 = vld [vmem:[%s7518_s3 + $0x48] sm:$0xff] }
0x1fd8   :  { %6325 = vrcp.f32 %v4296_v30 }
0x1fd9   :  { %6327 = vrcp.f32 %v4295_v20  ;;  %5964 = vmatmul.mubr.msk.f32.vlgmr.msra.gmra.mrb[40].mxu1 %vm1678_vm10, %v7337_v15 }
0x1fda   :  { %5967 = vmatpush3.msk.msra.mxu1 %vm1685_vm9, %v4302_v24  ;;  %5968 = vmatprep.mubr.msk.f32.mxu1 %vm1678_vm10, %v4503_v32 }
0x1fdb   :  { %5971 = vmatprep.subr.msk.mxu1 %vm1685_vm9, %v4598_v31 }
0x1fe1   :  { %5969 = vmatmul.mubr.msk.f32.vlgmr.msra.gmra.mrb[40].mxu1 %vm1678_vm10, %v4506_v53 }
0x1fe2   :  { %v6326_v16 = vpop.eup %6325  ;;  %5972 = vmatpush3.msk.msra.mxu1 %vm1685_vm9, %v4598_v31  ;;  %5973 = vmatprep.mubr.msk.f32.mxu1 %vm1678_vm10, %v4594_v48  ;;  %v6155_v31 = vpack.c.bf16 %v4313_v28, %v4312_v27 }
0x1fe3   :  { %v6328_v29 = vpop.eup %6327  ;;  %5241 = vrot.lane.b32.xlu0 %v6326_v16, %s6488_s0  ;;  %5976 = vmatprep.subr.msk.mxu1 %vm1685_vm9, %v4303_v14 }
0x1fe4   :  { %5239 = vrot.lane.b32.xlu1 %v6328_v29, %s6488_s0 }
0x1fe9   :  { %5974 = vmatmul.mubr.msk.f32.vlgmr.msra.gmra.mrb[40].mxu1 %vm1678_vm10, %v4597_v44 }
0x1fea   :  { %5977 = vmatpush3.msk.msra.mxu1 %vm1685_vm9, %v4303_v14  ;;  %5978 = vmatprep.mubr.msk.f32.mxu1 %vm1678_vm10, %v4684_v63 }
0x1ff1   :  { %5979 = vmatmul.mubr.msk.f32.vlgmr.msra.gmra.mrb[40].mxu1 %vm1678_vm10, %v4687_v39 }
0x2055   :  { %v5242_v38 = vpop.permute.xlu0 %5241 }
0x2056   :  { %5247 = vst.msk [vmem:[%s6767_s12 + $0x8] sm:$0xff] %vm5245_vm8, %v5242_v38  ;;  %v5240_v37 = vpop.permute.xlu1 %5239 }
0x2057   :  { %5246 = vst.msk [vmem:[%s6767_s12] sm:$0xff] %vm5245_vm8, %v5240_v37  ;;  %s7519_s12 = sld [smem:[#allocation51_spill]] }
0x20c4   :  { %v5980_v51 = vpop.f32.mrb[40].mxu1 }
0x20c5   :  { %v4780_v54 = vadd.f32 %v5980_v51, %v5459_v49  ;;  %v4761_v55 = vpop.f32.mrb[41].mxu1 }
0x20c6   :  { %v4779_v56 = vadd.f32 %v5459_v49, %v4761_v55 }
0x20c7   :  { %6329 = vtanh.f32 %v4780_v54 }
0x20c8   :  { %6331 = vtanh.f32 %v4779_v56 }
0x20d1   :  { %v6330_v4 = vpop.eup %6329 }
0x20d2   :  { %v6332_v57 = vpop.eup %6331  ;;  %v4786_v59 = vrot.slane %v6330_v4, 6 }
0x20d3   :  { %v4785_v60 = vrot.slane %v6332_v57, 6 }
0x20d4   :  { %v4790_v61 = vsel %vm4320_vm0, 0.0, %v4786_v59  ;;  %v4792_v58 = vsel %vm4320_vm0, %v4786_v59, 0.0 }
0x20d5   :  { %v4801_v62 = vrot.slane %v4792_v58, 1  ;;  %v4789_v2 = vsel %vm4320_vm0, 0.0, %v4785_v60  ;;  %v4791_v1 = vsel %vm4320_vm0, %v4785_v60, 0.0  ;;  %v4800_v12 = vrot.slane %v4790_v61, 1 }
0x20d6   :  { %v4797_v15 = vrot.slane %v4789_v2, 1  ;;  %v4798_v17 = vrot.slane %v4791_v1, 1  ;;  %v4961_v21 = vrot.slane %v4789_v2, 2  ;;  %v4962_v22 = vrot.slane %v4791_v1, 2 }
0x20d7   :  { %v4802_v19 = vsel %vm4329_vm2, %v4800_v12, %v4801_v62  ;;  %v4965_v25 = vrot.slane %v4792_v58, 2  ;;  %v4964_v26 = vrot.slane %v4790_v61, 2  ;;  %v5048_v30 = vrot.slane %v4789_v2, 3 }
0x20d8   :  { %v4799_v5 = vsel %vm4329_vm2, %v4797_v15, %v4798_v17  ;;  %v4963_v24 = vsel %vm4500_vm6, %v4961_v21, %v4962_v22  ;;  %v5049_v20 = vrot.slane %v4791_v1, 3  ;;  %v5052_v9 = vrot.slane %v4792_v58, 3 }
0x20d9   :  { %5985 = vmatprep.mubr.msk.f32.mxu0 %vm289_vm1, %v4799_v5  ;;  %v4966_v32 = vsel %vm4500_vm6, %v4964_v26, %v4965_v25  ;;  %v5051_v50 = vrot.slane %v4790_v61, 3  ;;  %v5135_v10 = vrot.slane %v4789_v2, 4  ;;  %v5136_v53 = vrot.slane %v4791_v1, 4 }
0x20da   :  { %5986 = vmatmul.mubr.msk.f32.vlgmr.msra.gmra.mrb[38].mxu0 %vm289_vm1, %v4802_v19  ;;  %v5050_v33 = vsel %vm4591_vm7, %v5048_v30, %v5049_v20  ;;  %v5139_v16 = vrot.slane %v4792_v58, 4  ;;  %v5138_v29 = vrot.slane %v4790_v61, 4 }
0x20db   :  { %6146 = vmatpush3.bf16.msra.mxu0 %v6143_v47  ;;  %5992 = vmatprep.mubr.msk.f32.mxu0 %vm289_vm1, %v4789_v2  ;;  %v5053_v14 = vsel %vm4591_vm7, %v5051_v50, %v5052_v9  ;;  %v5137_v48 = vsel %vm1685_vm9, %v5135_v10, %v5136_v53 }
0x20dc   :  { %6148 = vmatprep.subr.bf16.mxu0 %v6147_v18  ;;  %v5140_v34 = vsel %vm1685_vm9, %v5138_v29, %v5139_v16 }
0x20e2   :  { %5993 = vmatmul.mubr.msk.f32.vlgmr.msra.gmra.mrb[38].mxu0 %vm289_vm1, %v4790_v61 }
0x20e3   :  { %6150 = vmatpush3.bf16.msra.mxu0 %v6147_v18  ;;  %5999 = vmatprep.mubr.msk.f32.mxu0 %vm289_vm1, %v4963_v24 }
0x20e4   :  { %6152 = vmatprep.subr.bf16.mxu0 %v6151_v23 }
0x20ea   :  { %6000 = vmatmul.mubr.msk.f32.vlgmr.msra.gmra.mrb[38].mxu0 %vm289_vm1, %v4966_v32 }
0x20eb   :  { %6154 = vmatpush3.bf16.msra.mxu0 %v6151_v23  ;;  %6006 = vmatprep.mubr.msk.f32.mxu0 %vm289_vm1, %v5050_v33 }
0x20ec   :  { %6156 = vmatprep.subr.bf16.mxu0 %v6155_v31 }
0x20f2   :  { %6007 = vmatmul.mubr.msk.f32.vlgmr.msra.gmra.mrb[38].mxu0 %vm289_vm1, %v5053_v14 }
0x20f3   :  { %6158 = vmatpush3.bf16.msra.mxu0 %v6155_v31  ;;  %6013 = vmatprep.mubr.msk.f32.mxu0 %vm289_vm1, %v5137_v48 }
0x20fa   :  { %6014 = vmatmul.mubr.msk.f32.vlgmr.msra.gmra.mrb[38].mxu0 %vm289_vm1, %v5140_v34 }
0x21cd   :  { %v6015_v35 = vpop.f32.mrb[38].mxu0 }
0x21ce   :  { %v5223_v11 = vadd.f32 %v6015_v35, %v7322_v0  ;;  %v5211_v44 = vpop.f32.mrb[39].mxu0 }
0x21cf   :  { %v5222_v63 = vadd.f32 %v5211_v44, %v7324_v7 }
0x21d0   :  { %v5232_v52 = vadd.f32 %v5470_v36, %v5223_v11 }
0x21d1   :  { %v5231_v43 = vadd.f32 %v5470_v36, %v5222_v63 }
0x21d2   :  { %5236 = vst.msk [vmem:[%s7519_s12 + $0x8] sm:$0xff] %vm1678_vm10, %v5232_v52 }
0x21d3   :  { %5235 = vst.msk [vmem:[%s7519_s12] sm:$0xff] %vm1678_vm10, %v5231_v43 }
0x21d4   :  { %5282 = vsyncpa [#allocation3], 1 }
0x21d5   :  { %5283 = vsyncpa [#allocation7], 1 }
0x21d6   :  { %5284 = vsyncpa [#allocation4], 1 }

</bundles_post_ra>
